<compile_context>
chip_gen: v7x
topology: tpu7x:2x2x1
jax: 0.10.0
libtpu: 0.0.40
codegen_flags: <defaults>
</compile_context>

<pallas_src>
import functools

import jax
import jax.numpy as jnp
from jax.experimental import pallas as pl
from jax.experimental.pallas import tpu as pltpu

C_IN = 32
C_OUT = 192
BN_EPS = 1e-5
_FALLBACK_TILE = 2048          # spatial tile for the fallback path (mult of 128)
_FUSED_VMEM_BUDGET = 12 * 1024 * 1024   # stay under the v5e default scoped limit


# ----------------------------------------------------------------------------
# Fused single-pass kernel: add + batch stats + BN fold + matmul + bias.
# One grid step handles one C_OUT block (96 rows) over the whole (N, 32, HW) x.
# ----------------------------------------------------------------------------
def _fused_kernel(x71_ref, x57_ref, w_ref, gamma_ref, beta_ref, o_ref, *, count):
    n = x71_ref.shape[0]

    # Pass A: per-channel sum of x = x71 + x57 over (batch, spatial).
    s = jnp.zeros((C_IN, 1), jnp.float32)
    for b in range(n):
        s = s + jnp.sum(x71_ref[b, :, :] + x57_ref[b, :, :],
                        axis=1, keepdims=True)
    mean_x = s * (1.0 / count)                                  # (C_IN, 1)

    # Pass B: Gram of the *centered* x -> covariance (avoids E[y^2]-(E[y])^2
    # cancellation when channel means are large).
    gram = jnp.zeros((C_IN, C_IN), jnp.float32)
    for b in range(n):
        xc = (x71_ref[b, :, :] + x57_ref[b, :, :]) - mean_x     # (C_IN, HW)
        gram = gram + jax.lax.dot_general(                       # xc @ xc.T (MXU)
            xc, xc, (((1,), (1,)), ((), ())),
            preferred_element_type=jnp.float32)
    cov_x = gram * (1.0 / count)                                 # (C_IN, C_IN)

    # Fold training-mode BatchNorm into the conv for this C_OUT block.
    # y = W x  =>  mean_y = W mean_x,  var_y = diag(W cov_x W^T)  (biased var).
    w = w_ref[...]                                               # (co_tile, C_IN)
    mean_y = jnp.dot(w, mean_x, preferred_element_type=jnp.float32)      # (co_tile, 1)
    var_y = jnp.sum(jnp.dot(w, cov_x, preferred_element_type=jnp.float32) * w,
                    axis=1, keepdims=True)                       # (co_tile, 1)
    var_y = jnp.maximum(var_y, 0.0)
    scale = gamma_ref[...] * jax.lax.rsqrt(var_y + BN_EPS)       # (co_tile, 1)
    w_f = w * scale                                              # (co_tile, C_IN)
    b_f = beta_ref[...] - mean_y * scale                         # (co_tile, 1)

    # Pass C: matmul + bias, single writeback of the 192-wide activation.
    for b in range(n):
        x = x71_ref[b, :, :] + x57_ref[b, :, :]                  # (C_IN, HW)
        y = jnp.dot(w_f, x, preferred_element_type=jnp.float32)  # (co_tile, HW)
        o_ref[b, :, :] = (y + b_f).astype(o_ref.dtype)


# ----------------------------------------------------------------------------
# Fallback two-pass kernels (only used when the fused blocks don't fit VMEM).
# ----------------------------------------------------------------------------
def _stats_kernel(x71_ref, x57_ref, s_ref, g_ref, *, hw, tile):
    """Accumulate per-channel sum and the C_IN x C_IN Gram of x = x71 + x57."""
    i = pl.program_id(0)   # batch index
    t = pl.program_id(1)   # spatial tile index

    @pl.when(jnp.logical_and(i == 0, t == 0))
    def _init():
        s_ref[...] = jnp.zeros_like(s_ref)
        g_ref[...] = jnp.zeros_like(g_ref)

    x = x71_ref[0, :, :] + x57_ref[0, :, :]                      # (C_IN, tile)
    if hw % tile != 0:
        # Mask the padded (out-of-bounds) columns of the last tile.
        col = t * tile + jax.lax.broadcasted_iota(jnp.int32, x.shape, 1)
        x = jnp.where(col < hw, x, 0.0)

    s_ref[...] += jnp.sum(x, axis=1, keepdims=True)              # (C_IN, 1)
    g_ref[...] += jax.lax.dot_general(                            # x @ x.T (MXU)
        x, x, (((1,), (1,)), ((), ())),
        preferred_element_type=jnp.float32)


def _conv_bias_kernel(x71_ref, x57_ref, w_ref, b_ref, o_ref):
    """Fused add + 1x1 conv (matmul) + folded-BN affine, one spatial tile."""
    x = x71_ref[0, :, :] + x57_ref[0, :, :]                      # (C_IN, tile)
    y = jnp.dot(w_ref[...], x, preferred_element_type=jnp.float32)  # (C_OUT, tile)
    o_ref[0, :, :] = (y + b_ref[...]).astype(o_ref.dtype)


# ----------------------------------------------------------------------------
# Wrapper
# ----------------------------------------------------------------------------
def add_conv1x1_bn(x71, x57, weight, gamma, beta):
    """x71, x57: (N, C_IN, H, W) f32.  weight: 1x1-conv weight, (C_OUT, C_IN)
    or (C_OUT, C_IN, 1, 1), no bias.  gamma, beta: (C_OUT,) BN affine params.
    Returns (N, C_OUT, H, W) f32, matching M.forward in training mode."""
    n, c, h, w = x71.shape
    assert c == C_IN and x57.shape == x71.shape
    hw = h * w

    x71_r = x71.reshape(n, C_IN, hw)
    x57_r = x57.reshape(n, C_IN, hw)
    w_mat = weight.astype(jnp.float32).reshape(C_OUT, C_IN)
    g_col = gamma.astype(jnp.float32).reshape(C_OUT, 1)
    b_col = beta.astype(jnp.float32).reshape(C_OUT, 1)

    co_tile = C_OUT // 2   # two 96-row output blocks -> both v7x TCs get work

    # Estimated VMEM for the fused path: double-buffered input/output blocks
    # plus the live x / y intermediates.
    fused_bytes = (2 * 2 * n * C_IN * hw * 4     # x71 + x57 blocks (2 bufs each)
                   + 2 * n * co_tile * hw * 4    # output block (2 bufs)
                   + n * C_IN * hw * 4           # x intermediate
                   + n * co_tile * hw * 4)       # y intermediate

    if fused_bytes <= _FUSED_VMEM_BUDGET:
        # ---- Fused single-pass path (used at the spec shape). ----
        out = pl.pallas_call(
            functools.partial(_fused_kernel, count=float(n * hw)),
            out_shape=jax.ShapeDtypeStruct((n, C_OUT, hw), jnp.float32),
            grid=(C_OUT // co_tile,),
            in_specs=[
                pl.BlockSpec((n, C_IN, hw), lambda j: (0, 0, 0)),    # x71 (resident)
                pl.BlockSpec((n, C_IN, hw), lambda j: (0, 0, 0)),    # x57 (resident)
                pl.BlockSpec((co_tile, C_IN), lambda j: (j, 0)),     # weight half
                pl.BlockSpec((co_tile, 1), lambda j: (j, 0)),        # gamma half
                pl.BlockSpec((co_tile, 1), lambda j: (j, 0)),        # beta half
            ],
            out_specs=pl.BlockSpec((n, co_tile, hw), lambda j: (0, j, 0)),
            compiler_params=pltpu.CompilerParams(
                dimension_semantics=("parallel",)),
        )(x71_r, x57_r, w_mat, g_col, b_col)
        return out.reshape(n, C_OUT, h, w)

    # ---- Fallback: tiled two-pass path (large N*HW only). ----
    tile = hw if hw <= _FALLBACK_TILE else _FALLBACK_TILE
    n_t = pl.cdiv(hw, tile)

    # Pass 1: accumulated batch statistics of x = x71 + x57.
    s, g = pl.pallas_call(
        functools.partial(_stats_kernel, hw=hw, tile=tile),
        out_shape=(jax.ShapeDtypeStruct((C_IN, 1), jnp.float32),
                   jax.ShapeDtypeStruct((C_IN, C_IN), jnp.float32)),
        grid=(n, n_t),
        in_specs=[
            pl.BlockSpec((1, C_IN, tile), lambda i, t: (i, 0, t)),
            pl.BlockSpec((1, C_IN, tile), lambda i, t: (i, 0, t)),
        ],
        out_specs=(
            pl.BlockSpec((C_IN, 1), lambda i, t: (0, 0)),
            pl.BlockSpec((C_IN, C_IN), lambda i, t: (0, 0)),
        ),
        compiler_params=pltpu.CompilerParams(
            dimension_semantics=("arbitrary", "arbitrary")),
    )(x71_r, x57_r)

    # Fold training-mode BatchNorm into the conv (tiny XLA math).
    count = jnp.float32(n * hw)
    mean_x = s[:, 0] / count
    exx = g / count
    mean_y = w_mat @ mean_x
    e_y2 = jnp.sum((w_mat @ exx) * w_mat, axis=1)
    var_y = jnp.maximum(e_y2 - mean_y * mean_y, 0.0)
    scale = gamma.astype(jnp.float32) * jax.lax.rsqrt(var_y + BN_EPS)
    w_folded = w_mat * scale[:, None]
    b_folded = (beta.astype(jnp.float32) - mean_y * scale)[:, None]

    # Pass 2: tiled matmul + bias, NCHW-native output written exactly once.
    out = pl.pallas_call(
        _conv_bias_kernel,
        out_shape=jax.ShapeDtypeStruct((n, C_OUT, hw), jnp.float32),
        grid=(n, n_t),
        in_specs=[
            pl.BlockSpec((1, C_IN, tile), lambda i, t: (i, 0, t)),
            pl.BlockSpec((1, C_IN, tile), lambda i, t: (i, 0, t)),
            pl.BlockSpec((C_OUT, C_IN), lambda i, t: (0, 0)),    # resident weight
            pl.BlockSpec((C_OUT, 1), lambda i, t: (0, 0)),       # resident bias
        ],
        out_specs=pl.BlockSpec((1, C_OUT, tile), lambda i, t: (i, 0, t)),
        compiler_params=pltpu.CompilerParams(
            dimension_semantics=("parallel", "parallel")),
    )(x71_r, x57_r, w_folded, b_folded)

    return out.reshape(n, C_OUT, h, w)


if __name__ == "__main__":
    key = jax.random.PRNGKey(0)
    k1, k2, k3, k4, k5 = jax.random.split(key, 5)

    # Shapes from the original module: (1, 32, 56, 56) inputs.
    N, H, W = 1, 56, 56
    x71 = jax.random.normal(k1, (N, C_IN, H, W), dtype=jnp.float32)
    x57 = jax.random.normal(k2, (N, C_IN, H, W), dtype=jnp.float32)

    # Conv2d(32, 192, 1x1, bias=False) weight and BatchNorm2d(192) affine
    # params (non-trivial so the gamma/beta path is actually exercised).
    conv_w = 0.1 * jax.random.normal(k3, (C_OUT, C_IN), dtype=jnp.float32)
    bn_gamma = 1.0 + 0.1 * jax.random.normal(k4, (C_OUT,), dtype=jnp.float32)
    bn_beta = 0.1 * jax.random.normal(k5, (C_OUT,), dtype=jnp.float32)

    out = add_conv1x1_bn(x71, x57, conv_w, bn_gamma, bn_beta)
    jax.block_until_ready(out)

    # Pure-JAX reference (training-mode BatchNorm with affine).
    x = x71 + x57
    y_ref = jnp.einsum("nchw,oc->nohw", x, conv_w)
    mean = jnp.mean(y_ref, axis=(0, 2, 3), keepdims=True)
    var = jnp.mean((y_ref - mean) ** 2, axis=(0, 2, 3), keepdims=True)
    ref = ((y_ref - mean) * jax.lax.rsqrt(var + BN_EPS)
           * bn_gamma.reshape(1, C_OUT, 1, 1)
           + bn_beta.reshape(1, C_OUT, 1, 1))

    assert out.shape == ref.shape
    err = float(jnp.max(jnp.abs(out - ref)))
    assert jnp.allclose(out, ref, atol=1e-3, rtol=1e-3), f"mismatch, max|d|={err}"

    # TODO(synk): running_mean / running_var buffer updates (momentum=0.1) are
    # not produced; only the forward output tensor is computed.
    print("KERNEL_OK")
</pallas_src>

<mosaic_0001>
module attributes {stable_mosaic.version = 11 : i64} {
  func.func @_fused_kernel(%arg0: i32, %arg1: memref<1x32x3136xf32, #tpu.memory_space<vmem>>, %arg2: memref<1x32x3136xf32, #tpu.memory_space<vmem>>, %arg3: memref<96x32xf32, #tpu.memory_space<vmem>>, %arg4: memref<96x1xf32, #tpu.memory_space<vmem>>, %arg5: memref<96x1xf32, #tpu.memory_space<vmem>>, %arg6: memref<1x96x3136xf32, #tpu.memory_space<vmem>>) attributes {dimension_semantics = [#tpu.dimension_semantics<parallel>], iteration_bounds = array<i64: 2>, scalar_prefetch = 0 : i64, scratch_operands = 0 : i64, tpu.core_type = #tpu.core_type<tc>, window_params = [{pipeline_mode = #tpu.pipeline_mode<synchronous>, transform_indices = @transform_0, window_bounds = array<i64: 1, 32, 3136>}, {pipeline_mode = #tpu.pipeline_mode<synchronous>, transform_indices = @transform_1, window_bounds = array<i64: 1, 32, 3136>}, {transform_indices = @transform_2, window_bounds = array<i64: 96, 32>}, {transform_indices = @transform_3, window_bounds = array<i64: 96, 1>}, {transform_indices = @transform_4, window_bounds = array<i64: 96, 1>}, {transform_indices = @transform_5, window_bounds = array<i64: 1, 96, 3136>}]} {
    %cst = arith.constant 0.000000e+00 : f32
    %0 = vector.broadcast %cst : f32 to vector<32x1xf32>
    %c0 = arith.constant 0 : index
    %c0_0 = arith.constant 0 : index
    %c0_1 = arith.constant 0 : index
    %1 = vector.load %arg1[%c0, %c0_0, %c0_1] : memref<1x32x3136xf32, #tpu.memory_space<vmem>>, vector<1x32x3136xf32>
    %2 = vector.shape_cast %1 : vector<1x32x3136xf32> to vector<32x3136xf32>
    %c0_2 = arith.constant 0 : index
    %c0_3 = arith.constant 0 : index
    %c0_4 = arith.constant 0 : index
    %3 = vector.load %arg2[%c0_2, %c0_3, %c0_4] : memref<1x32x3136xf32, #tpu.memory_space<vmem>>, vector<1x32x3136xf32>
    %4 = vector.shape_cast %3 : vector<1x32x3136xf32> to vector<32x3136xf32>
    %5 = arith.addf %2, %4 : vector<32x3136xf32>
    %cst_5 = arith.constant dense<0.000000e+00> : vector<32xf32>
    %6 = vector.multi_reduction <add>, %5, %cst_5 [1] : vector<32x3136xf32> to vector<32xf32>
    %7 = vector.shape_cast %6 : vector<32xf32> to vector<32x1xf32>
    %8 = arith.addf %0, %7 : vector<32x1xf32>
    %cst_6 = arith.constant 3.18877544E-4 : f32
    %9 = vector.broadcast %cst_6 : f32 to vector<32x1xf32>
    %10 = arith.mulf %8, %9 : vector<32x1xf32>
    %cst_7 = arith.constant 0.000000e+00 : f32
    %11 = vector.broadcast %cst_7 : f32 to vector<32x32xf32>
    %c0_8 = arith.constant 0 : index
    %c0_9 = arith.constant 0 : index
    %c0_10 = arith.constant 0 : index
    %12 = vector.load %arg1[%c0_8, %c0_9, %c0_10] : memref<1x32x3136xf32, #tpu.memory_space<vmem>>, vector<1x32x3136xf32>
    %13 = vector.shape_cast %12 : vector<1x32x3136xf32> to vector<32x3136xf32>
    %c0_11 = arith.constant 0 : index
    %c0_12 = arith.constant 0 : index
    %c0_13 = arith.constant 0 : index
    %14 = vector.load %arg2[%c0_11, %c0_12, %c0_13] : memref<1x32x3136xf32, #tpu.memory_space<vmem>>, vector<1x32x3136xf32>
    %15 = vector.shape_cast %14 : vector<1x32x3136xf32> to vector<32x3136xf32>
    %16 = arith.addf %13, %15 : vector<32x3136xf32>
    %17 = vector.broadcast %10 : vector<32x1xf32> to vector<32x3136xf32>
    %18 = arith.subf %16, %17 : vector<32x3136xf32>
    %cst_14 = arith.constant dense<0.000000e+00> : vector<32x32xf32>
    %19 = tpu.matmul %18, %18, %cst_14 {dimension_numbers = #tpu.dot_dimension_numbers<[1], [1], [0], [0], [0, 0, 1, 0], [], []>} : vector<32x3136xf32>, vector<32x3136xf32>, vector<32x32xf32> -> vector<32x32xf32>
    %20 = arith.addf %11, %19 : vector<32x32xf32>
    %cst_15 = arith.constant 3.18877544E-4 : f32
    %21 = vector.broadcast %cst_15 : f32 to vector<32x32xf32>
    %22 = arith.mulf %20, %21 : vector<32x32xf32>
    %c0_16 = arith.constant 0 : index
    %c0_17 = arith.constant 0 : index
    %23 = vector.load %arg3[%c0_16, %c0_17] : memref<96x32xf32, #tpu.memory_space<vmem>>, vector<96x32xf32>
    %cst_18 = arith.constant dense<0.000000e+00> : vector<96x1xf32>
    %24 = tpu.matmul %23, %10, %cst_18 {dimension_numbers = #tpu.dot_dimension_numbers<[1], [0], [0], [1], [0, 0, 1, 1], [], []>} : vector<96x32xf32>, vector<32x1xf32>, vector<96x1xf32> -> vector<96x1xf32>
    %cst_19 = arith.constant dense<0.000000e+00> : vector<96x32xf32>
    %25 = tpu.matmul %23, %22, %cst_19 {dimension_numbers = #tpu.dot_dimension_numbers<[1], [0], [0], [1], [0, 0, 1, 1], [], []>} : vector<96x32xf32>, vector<32x32xf32>, vector<96x32xf32> -> vector<96x32xf32>
    %26 = arith.mulf %25, %23 : vector<96x32xf32>
    %cst_20 = arith.constant dense<0.000000e+00> : vector<96xf32>
    %27 = vector.multi_reduction <add>, %26, %cst_20 [1] : vector<96x32xf32> to vector<96xf32>
    %28 = vector.shape_cast %27 : vector<96xf32> to vector<96x1xf32>
    %cst_21 = arith.constant 0.000000e+00 : f32
    %29 = vector.broadcast %cst_21 : f32 to vector<96x1xf32>
    %30 = arith.maximumf %28, %29 : vector<96x1xf32>
    %c0_22 = arith.constant 0 : index
    %c0_23 = arith.constant 0 : index
    %31 = vector.load %arg4[%c0_22, %c0_23] : memref<96x1xf32, #tpu.memory_space<vmem>>, vector<96x1xf32>
    %cst_24 = arith.constant 9.99999974E-6 : f32
    %32 = vector.broadcast %cst_24 : f32 to vector<96x1xf32>
    %33 = arith.addf %30, %32 : vector<96x1xf32>
    %34 = math.rsqrt %33 : vector<96x1xf32>
    %35 = arith.mulf %31, %34 : vector<96x1xf32>
    %36 = vector.broadcast %35 : vector<96x1xf32> to vector<96x32xf32>
    %37 = arith.mulf %23, %36 : vector<96x32xf32>
    %c0_25 = arith.constant 0 : index
    %c0_26 = arith.constant 0 : index
    %38 = vector.load %arg5[%c0_25, %c0_26] : memref<96x1xf32, #tpu.memory_space<vmem>>, vector<96x1xf32>
    %39 = arith.mulf %24, %35 : vector<96x1xf32>
    %40 = arith.subf %38, %39 : vector<96x1xf32>
    %c0_27 = arith.constant 0 : index
    %c0_28 = arith.constant 0 : index
    %c0_29 = arith.constant 0 : index
    %41 = vector.load %arg1[%c0_27, %c0_28, %c0_29] : memref<1x32x3136xf32, #tpu.memory_space<vmem>>, vector<1x32x3136xf32>
    %42 = vector.shape_cast %41 : vector<1x32x3136xf32> to vector<32x3136xf32>
    %c0_30 = arith.constant 0 : index
    %c0_31 = arith.constant 0 : index
    %c0_32 = arith.constant 0 : index
    %43 = vector.load %arg2[%c0_30, %c0_31, %c0_32] : memref<1x32x3136xf32, #tpu.memory_space<vmem>>, vector<1x32x3136xf32>
    %44 = vector.shape_cast %43 : vector<1x32x3136xf32> to vector<32x3136xf32>
    %45 = arith.addf %42, %44 : vector<32x3136xf32>
    %cst_33 = arith.constant dense<0.000000e+00> : vector<96x3136xf32>
    %46 = tpu.matmul %37, %45, %cst_33 {dimension_numbers = #tpu.dot_dimension_numbers<[1], [0], [0], [1], [0, 0, 1, 1], [], []>} : vector<96x32xf32>, vector<32x3136xf32>, vector<96x3136xf32> -> vector<96x3136xf32>
    %47 = vector.broadcast %40 : vector<96x1xf32> to vector<96x3136xf32>
    %48 = arith.addf %46, %47 : vector<96x3136xf32>
    %c0_34 = arith.constant 0 : index
    %c0_35 = arith.constant 0 : index
    %c0_36 = arith.constant 0 : index
    %49 = vector.load %arg6[%c0_34, %c0_35, %c0_36] : memref<1x96x3136xf32, #tpu.memory_space<vmem>>, vector<1x96x3136xf32>
    %50 = vector.shape_cast %49 : vector<1x96x3136xf32> to vector<96x3136xf32>
    %51 = vector.shape_cast %48 : vector<96x3136xf32> to vector<1x96x3136xf32>
    tpu.vector_store %arg6[%c0_34, %c0_35, %c0_36], %51 {strides = array<i32>} : memref<1x96x3136xf32, #tpu.memory_space<vmem>>, vector<1x96x3136xf32>,
    return
  }
  func.func @transform_0(%arg0: i32) -> (i32, i32, i32) {
    %c0_i32 = arith.constant 0 : i32
    %c0_i32_0 = arith.constant 0 : i32
    %c0_i32_1 = arith.constant 0 : i32
    %c0_i32_2 = arith.constant 0 : i32
    return %c0_i32, %c0_i32_0, %c0_i32_1 : i32, i32, i32
  }
  func.func @transform_1(%arg0: i32) -> (i32, i32, i32) {
    %c0_i32 = arith.constant 0 : i32
    %c0_i32_0 = arith.constant 0 : i32
    %c0_i32_1 = arith.constant 0 : i32
    %c0_i32_2 = arith.constant 0 : i32
    return %c0_i32, %c0_i32_0, %c0_i32_1 : i32, i32, i32
  }
  func.func @transform_2(%arg0: i32) -> (i32, i32) {
    %c0_i32 = arith.constant 0 : i32
    %c0_i32_0 = arith.constant 0 : i32
    return %arg0, %c0_i32 : i32, i32
  }
  func.func @transform_3(%arg0: i32) -> (i32, i32) {
    %c0_i32 = arith.constant 0 : i32
    %c0_i32_0 = arith.constant 0 : i32
    return %arg0, %c0_i32 : i32, i32
  }
  func.func @transform_4(%arg0: i32) -> (i32, i32) {
    %c0_i32 = arith.constant 0 : i32
    %c0_i32_0 = arith.constant 0 : i32
    return %arg0, %c0_i32 : i32, i32
  }
  func.func @transform_5(%arg0: i32) -> (i32, i32, i32) {
    %c0_i32 = arith.constant 0 : i32
    %c0_i32_0 = arith.constant 0 : i32
    %c0_i32_1 = arith.constant 0 : i32
    return %c0_i32, %arg0, %c0_i32_0 : i32, i32, i32
  }
}

</mosaic_0001>

<bundles_post_ra>
// kernel: tpu_custom_call.1
= control target key start
LH: loop header
LB: loop body
LE: loop exit
PB: predicated region body
PF: predicated region fallthrough
CT: control target
= control target key end

     0   :  { %10 = vsyncpa [#allocation3], 0  ;;  %s8238_s0 = inlined_call_operand.hbm [shape: f32[1,32,3136], index: 0, kind: input, shape index: {}]   ;;  %s8239_s1 = inlined_call_operand.hbm [shape: f32[1,32,3136], index: 1, kind: input, shape index: {}]   ;;  %s8240_s2 = inlined_call_operand.vmem [shape: f32[192,32], index: 2, kind: input, shape index: {}]   ;;  %s8241_s3 = inlined_call_operand.vmem [shape: f32[192,1], index: 3, kind: input, shape index: {}]   ;;  %s8242_s4 = inlined_call_operand.vmem [shape: f32[192,1], index: 4, kind: input, shape index: {}]   ;;  %s8243_s5 = inlined_call_operand.hbm [shape: f32[1,192,3136], index: 5, kind: output, shape index: {}]  }
   0x1   :  { %11 = vsyncpa [#allocation6], 0 }
   0x2   :  { %12 = vsyncpa [#allocation4], 0 }
   0x3   :  { %14 = vsyncpa [#allocation4 + $0x1], 0  ;;  %s5673_s18 = smov 0   ;;  %s5675_s19 = smov 0  }
   0x4   :  { %s5677_s20 = smov 0   ;;  %s5679_s21 = smov 0  }
   0x5 LB: > { %s5694_s22 = sadd.s32 4294967295, %s5632_s21   ;;  %s4741_s23 = sadd.s32 4294967294, %s5632_s21   ;;  %s5632_s21 = sphi %s5679_s21, %s8793_s21   ;;  %s5628_s20 = sphi %s5677_s20, %s8792_s20   ;;  %s5624_s19 = sphi %s5675_s19, %s8791_s19   ;;  %s5620_s18 = sphi %s5673_s18, %s8790_s18  }
   0x6   : > { %s5698_s24 = sadd.s32 1, %s5632_s21   ;;  %s147_s25 = sadd.s32 1, %s5628_s20 }
   0x7   : > { %s144_s26 = ssub.s32 %s5632_s21, %s5698_s24  ;;  %p157_p0 = scmp.ne.s32.totalorder %s5628_s20, %s5624_s19 }
   0x8   : > { %p145_p1 = scmp.eq.s32.totalorder %s144_s26, 0  ;;  %p158_p2 = scmp.eq.s32.totalorder %s5694_s22, 1 }
   0x9   : > { %p163_p3 = scmp.ne.s32.totalorder %s5624_s19, %s5620_s18  ;;  %p164_p4 = scmp.eq.s32.totalorder %s4741_s23, 1 }
   0xa   : > { %s5709_s27 = scalar_select %p145_p1, %s5628_s20, %s147_s25  }
   0xb   : > { %p5711_p5 = por %p158_p2, %p157_p0  ;;  %p5715_p6 = por %p164_p4, %p163_p3 }
   0xc   : > { %p4742_p7 = scmp.ge.s32.totalorder %s5632_s21, 1  ;;  %p171_p8 = scmp.lt.s32.totalorder %s5632_s21, 3 }
   0xd   : > { %s8451_s28 = scalar_select %p5711_p5, 1, 0 }
   0xe   : > { %s8452_s29 = scalar_select %p5715_p6, 1, 0 }
   0xf   : > { %p8244_p9 = scmp.eq.s32.totalorder %s5694_s22, 0  ;;  %p5722_p10 = pnand %p4742_p7, %p171_p8 }
  0x10   : > { %s5634_s6 = smov [#allocation2]   ;;  %s5635_s9 = smov [#allocation5]  }
  0x11   : > { %s8453_s30 = scalar_select %p5722_p10, 1, 0 }
  0x12   : > { %s183_s7 = sshll.u32 %s5634_s6, 4  ;;  %p5423_p11 = pneg %p5722_p10  ;;  %s184_s7 = int_to_ptr.vmem [resolvable:$true] %s183_s7 }
  0x13   : > { %s196_s10 = sshll.u32 %s5635_s9, 4  ;;  %s5506_s13 = scalar_lea.hbm %s8238_s0, 12800  ;;  %s5734_s10 = int_to_ptr.vmem [resolvable:$true] %s196_s10 }
  0x14   : > { %p5730_p12 = pnand %p8244_p9, %p5423_p11  ;;  %p5507_p13 = scmp.ne.s32.totalorder %s8238_s0, %s5506_s13 }
  0x15   : > { %p5513_p3 = scmp.lt.u32.totalorder %s5506_s13, %s8238_s0 }
  0x16   : > { %p5508_p0 = pneg %p5730_p12 }
  0x18   : > { %p5509_p1 = pnand %p5508_p0, %p5507_p13 }
  0x1a   : > { %p5510_p2 = pneg %p5509_p1 }
  0x1c   : > { %p5515_p4 = pnand %p5513_p3, %p5510_p2 }
  0x1e   : > { %5518 = shalt.err (!%p5515_p4)
}
  0x1f   : > { %s5519_s23 = scalar_lea.vmem %s184_s7, 12800  ;;  %p5527_p9 = scmp.lt.s32.totalorder %s184_s7, %s184_s7 }
  0x20   : > { %p5520_p7 = scmp.ne.s32.totalorder %s184_s7, %s5519_s23  ;;  %p5528_p6 = scmp.lt.s32.totalorder %s5519_s23, %s5519_s23 }
  0x22   : > { %p5522_p8 = pnand %p5520_p7, %p5508_p0  ;;  %p5529_p5 = por %p5528_p6, %p5527_p9 }
  0x24   : > { %p5523_p11 = pneg %p5522_p8 }
  0x26   : > { %p5530_p10 = pnand %p5529_p5, %p5523_p11 }
  0x28   : > { %5533 = shalt.err (!%p5530_p10)
}
  0x29   : > { %s5636_s25 = smov 3200   ;;  %s5637_s26 = smov 200  }
  0x2a   : > { %5426 = dma.hbm_to_vmem [thread:$0]  (!%p5730_p12), %s8238_s0, 12800, %s184_s7, [#allocation3], %s5636_s25, %s5636_s25, %s5637_s26  }
  0x2b   : > { %s5534_s13 = scalar_lea.hbm %s8239_s1, 12800 }
  0x2c   : > { %p5535_p13 = scmp.ne.s32.totalorder %s8239_s1, %s5534_s13  ;;  %p5541_p9 = scmp.lt.u32.totalorder %s5534_s13, %s8239_s1 }
  0x2e   : > { %p5537_p5 = pnand %p5535_p13, %p5508_p0 }
  0x30   : > { %p5538_p6 = pneg %p5537_p5 }
  0x32   : > { %p5543_p10 = pnand %p5541_p9, %p5538_p6 }
  0x34   : > { %5546 = shalt.err (!%p5543_p10)
}
  0x35   : > { %s5547_s7 = scalar_lea.vmem %s5734_s10, 12800  ;;  %p5555_p4 = scmp.lt.s32.totalorder %s5734_s10, %s5734_s10 }
  0x36   : > { %p5548_p1 = scmp.ne.s32.totalorder %s5734_s10, %s5547_s7  ;;  %p5556_p7 = scmp.lt.s32.totalorder %s5547_s7, %s5547_s7 }
  0x38   : > { %p5550_p2 = pnand %p5548_p1, %p5508_p0  ;;  %p5557_p8 = por %p5556_p7, %p5555_p4 }
  0x3a   : > { %p5551_p3 = pneg %p5550_p2 }
  0x3c   : > { %p5558_p11 = pnand %p5557_p8, %p5551_p3 }
  0x3e   : > { %5561 = shalt.err (!%p5558_p11)
}
  0x3f   : > { %5429 = dma.hbm_to_vmem [thread:$0]  (!%p5730_p12), %s8239_s1, 12800, %s5734_s10, [#allocation6], %s5636_s25, %s5636_s25, %s5637_s26  }
  0x40   : > { %p8455_p13 = scmp.ne.s32.totalorder %s8453_s30, 0 }
  0x42   : > { %239 = sbr.rel (%p8455_p13) target bundleno = 1850 (0x73a), region = 40 }
  0x49   : > { %p8456_p5 = scmp.eq.s32.totalorder %s5694_s22, 0 }
  0x4b   : > { %5607 = dma.done.wait (%p8456_p5), [#allocation3], 12800   ;;  %p8457_p0 = pmov %p8456_p5 }
  0x4d   : > { %5609 = vsyncadd (%p8457_p0), [#allocation3], 4294954496  ;;  %p8458_p6 = pmov %p8457_p0 }
  0x4e   : > { %p8459_p9 = pmov %p8457_p0 }
  0x4f   : > { %5611 = dma.done.wait (%p8458_p6), [#allocation6], 12800  }
  0x50   : > { %5613 = vsyncadd (%p8459_p9), [#allocation6], 4294954496  ;;  %v300_v0 = vld [vmem:[#allocation2] sm:$0xff]  ;;  %v301_v1 = vld [vmem:[#allocation2 + $0x8] sm:$0xff]  ;;  %vm623_vm0 = vcmask 523264   ;;  %s281_s30 = smul.u32 12, %s5694_s22 }
  0x51   : > { %v302_v2 = vld [vmem:[#allocation2 + $0x10] sm:$0xff]  ;;  %v303_v3 = vld [vmem:[#allocation2 + $0x18] sm:$0xff]  ;;  %v400_v4 = vld [vmem:[#allocation5] sm:$0xff]  ;;  %vm1950_vm2 = vcmask 261120   ;;  %s278_s16 = sand.u32 1, %s5624_s19   ;;  %s5438_s23 = smul.u32 38400, %s5694_s22 }
  0x52   : > { %v401_v5 = vld [vmem:[#allocation5 + $0x8] sm:$0xff]  ;;  %v402_v6 = vld [vmem:[#allocation5 + $0x10] sm:$0xff]  ;;  %v403_v7 = vld [vmem:[#allocation5 + $0x18] sm:$0xff]  ;;  %v5793_v8 = vadd.f32 %v400_v4, %v300_v0  ;;  %p282_p12 = scmp.lt.s32.totalorder %s281_s30, 23  ;;  %s5411_s17 = smul.u32 2400, %s278_s16 }
  0x53   : > { %v5795_v9 = vadd.f32 %v401_v5, %v301_v1  ;;  %v304_v10 = vld [vmem:[#allocation2 + $0x20] sm:$0xff]  ;;  %v5797_v12 = vadd.f32 %v402_v6, %v302_v2  ;;  %v5799_v13 = vadd.f32 %v403_v7, %v303_v3  ;;  %v305_v15 = vld [vmem:[#allocation2 + $0x28] sm:$0xff]  ;;  %v306_v19 = vld [vmem:[#allocation2 + $0x30] sm:$0xff]  ;;  %s8186_s10 = scalar_lea.hbm %s8243_s5, %s5438_s23  ;;  %s8197_s22 = scalar_lea.sflag [#allocation4], %s278_s16 }
  0x54   : > { %8460 = vst [vmem:[#allocation11_spill] sm:$0xff] %v5793_v8  ;;  %v404_v11 = vld [vmem:[#allocation5 + $0x20] sm:$0xff]  ;;  %v405_v16 = vld [vmem:[#allocation5 + $0x28] sm:$0xff]  ;;  %v406_v20 = vld [vmem:[#allocation5 + $0x30] sm:$0xff]  ;;  %s8795_s30 = smov (!%p282_p12, %s281_s30), 23  ;;  %s7412_s7 = scalar_lea.vmem [#allocation7], %s5411_s17 }
  0x55   : > { %8461 = vst [vmem:[#allocation12_spill] sm:$0xff] %v5795_v9  ;;  %8462 = vst [vmem:[#allocation13_spill] sm:$0xff] %v5797_v12  ;;  %v600_v14 = vadd.f32 %v5795_v9, %v5793_v8  ;;  %v5803_v17 = vadd.f32 %v404_v11, %v304_v10  ;;  %v5806_v21 = vadd.f32 %v405_v16, %v305_v15  ;;  %v307_v23 = vld [vmem:[#allocation2 + $0x38] sm:$0xff]  ;;  %v308_v27 = vld [vmem:[#allocation2 + $0x40] sm:$0xff]  ;;  %s6629_s8 = sshll.u32 %s8795_s30, 3  ;;  %s4633_s6 = sshll.u32 %s7412_s7, 4  ;;  %s8189_s6 = int_to_ptr.vmem [resolvable:$true] %s4633_s6 }
  0x56   : > { %8463 = vst [vmem:[#allocation14_spill] sm:$0xff] %v5799_v13  ;;  %v407_v24 = vld [vmem:[#allocation5 + $0x38] sm:$0xff]  ;;  %v5809_v25 = vadd.f32 %v406_v20, %v306_v19  ;;  %v408_v28 = vld [vmem:[#allocation5 + $0x40] sm:$0xff]  ;;  %v309_v31 = vld [vmem:[#allocation2 + $0x48] sm:$0xff]  ;;  %s6635_s26 = scalar_lea.vmem %s8240_s2, %s6629_s8  ;;  %s6905_s12 = scalar_lea.vmem %s8241_s3, %s6629_s8 }
  0x57   : > { %8464 = vst [vmem:[#allocation15_spill] sm:$0xff] %v5803_v17  ;;  %v601_v18 = vadd.f32 %v600_v14, %v5797_v12  ;;  %8465 = vst [vmem:[#allocation16_spill] sm:$0xff] %v5806_v21  ;;  %v5812_v29 = vadd.f32 %v407_v24, %v307_v23  ;;  %v409_v32 = vld [vmem:[#allocation5 + $0x48] sm:$0xff]  ;;  %v5815_v33 = vadd.f32 %v408_v28, %v308_v27  ;;  %v310_v35 = vld [vmem:[#allocation2 + $0x50] sm:$0xff]  ;;  %s6933_s15 = scalar_lea.vmem %s8242_s4, %s6629_s8  ;;  %s5562_s25 = scalar_lea.vmem %s8189_s6, 38400 }
  0x58   : > { %8466 = vst [vmem:[#allocation17_spill] sm:$0xff] %v5809_v25  ;;  %v410_v36 = vld [vmem:[#allocation5 + $0x50] sm:$0xff]  ;;  %v5818_v37 = vadd.f32 %v409_v32, %v309_v31  ;;  %v351_v40 = vld [vmem:[#allocation2 + $0x198] sm:$0xff]  ;;  %v352_v41 = vld [vmem:[#allocation2 + $0x1a0] sm:$0xff]  ;;  %p5563_p10 = scmp.ne.s32.totalorder %s8189_s6, %s5562_s25  ;;  %p8788_p1 = scmp.ne.s32.totalorder %s8451_s28, 0 }
  0x59   : > { %v602_v22 = vadd.f32 %v601_v18, %v5799_v13  ;;  %8467 = vst [vmem:[#allocation18_spill] sm:$0xff] %v5812_v29  ;;  %8468 = vst [vmem:[#allocation19_spill] sm:$0xff] %v5815_v33  ;;  %v350_v39 = vld [vmem:[#allocation2 + $0x190] sm:$0xff]  ;;  %v311_v42 = vld [vmem:[#allocation2 + $0x58] sm:$0xff]  ;;  %v5821_v45 = vadd.f32 %v410_v36, %v310_v35 }
  0x5a   : > { %8469 = vst [vmem:[#allocation20_spill] sm:$0xff] %v5818_v37  ;;  %v411_v43 = vld [vmem:[#allocation5 + $0x58] sm:$0xff]  ;;  %v353_v44 = vld [vmem:[#allocation2 + $0x1a8] sm:$0xff]  ;;  %v450_v47 = vld [vmem:[#allocation5 + $0x190] sm:$0xff]  ;;  %p5564_p2 = pnand %p5563_p10, %p8788_p1 }
  0x5b   : > { %v603_v26 = vadd.f32 %v602_v22, %v5803_v17  ;;  %8470 = vst [vmem:[#allocation21_spill] sm:$0xff] %v5821_v45  ;;  %v451_v48 = vld [vmem:[#allocation5 + $0x198] sm:$0xff]  ;;  %v452_v49 = vld [vmem:[#allocation5 + $0x1a0] sm:$0xff]  ;;  %v453_v52 = vld [vmem:[#allocation5 + $0x1a8] sm:$0xff]  ;;  %v5824_v53 = vadd.f32 %v450_v47, %v350_v39  ;;  %v5830_v56 = vadd.f32 %v411_v43, %v311_v42 }
  0x5c   : > { %v312_v50 = vld [vmem:[#allocation2 + $0x60] sm:$0xff]  ;;  %v5826_v54 = vadd.f32 %v451_v48, %v351_v40  ;;  %v5828_v55 = vadd.f32 %v452_v49, %v352_v41  ;;  %v354_v58 = vld [vmem:[#allocation2 + $0x1b0] sm:$0xff]  ;;  %v313_v60 = vld [vmem:[#allocation2 + $0x68] sm:$0xff]  ;;  %v5833_v62 = vadd.f32 %v453_v52, %v353_v44  ;;  %p5565_p3 = pneg %p5564_p2 }
  0x5d   : > { %v604_v30 = vadd.f32 %v603_v26, %v5806_v21  ;;  %v412_v51 = vld [vmem:[#allocation5 + $0x60] sm:$0xff]  ;;  %8471 = vst [vmem:[#allocation22_spill] sm:$0xff] %v5824_v53  ;;  %8474 = vst [vmem:[#allocation25_spill] sm:$0xff] %v5830_v56  ;;  %v454_v59 = vld [vmem:[#allocation5 + $0x1b0] sm:$0xff] }
  0x5e   : > { %8472 = vst [vmem:[#allocation23_spill] sm:$0xff] %v5826_v54  ;;  %8473 = vst [vmem:[#allocation24_spill] sm:$0xff] %v5828_v55  ;;  %v413_v61 = vld [vmem:[#allocation5 + $0x68] sm:$0xff]  ;;  %v655_v63 = vadd.f32 %v5826_v54, %v5824_v53  ;;  %v5837_v0 = vadd.f32 %v412_v51, %v312_v50  ;;  %v355_v2 = vld [vmem:[#allocation2 + $0x1b8] sm:$0xff]  ;;  %v5840_v6 = vadd.f32 %v454_v59, %v354_v58 }
  0x5f   : > { %v605_v34 = vadd.f32 %v604_v30, %v5809_v25  ;;  %8475 = vst [vmem:[#allocation26_spill] sm:$0xff] %v5833_v62  ;;  %v455_v3 = vld [vmem:[#allocation5 + $0x1b8] sm:$0xff]  ;;  %v314_v4 = vld [vmem:[#allocation2 + $0x70] sm:$0xff]  ;;  %v5843_v10 = vadd.f32 %v413_v61, %v313_v60  ;;  %v356_v14 = vld [vmem:[#allocation2 + $0x1c0] sm:$0xff] }
  0x60   : > { %8476 = vst [vmem:[#allocation27_spill] sm:$0xff] %v5837_v0  ;;  %v414_v5 = vld [vmem:[#allocation5 + $0x70] sm:$0xff]  ;;  %8477 = vst [vmem:[#allocation28_spill] sm:$0xff] %v5840_v6  ;;  %v656_v7 = vadd.f32 %v655_v63, %v5828_v55  ;;  %v456_v15 = vld [vmem:[#allocation5 + $0x1c0] sm:$0xff]  ;;  %v5846_v19 = vadd.f32 %v455_v3, %v355_v2 }
  0x61   : > { %v606_v38 = vadd.f32 %v605_v34, %v5812_v29  ;;  %8478 = vst [vmem:[#allocation29_spill] sm:$0xff] %v5843_v10  ;;  %v315_v16 = vld [vmem:[#allocation2 + $0x78] sm:$0xff]  ;;  %v5849_v22 = vadd.f32 %v414_v5, %v314_v4  ;;  %v357_v24 = vld [vmem:[#allocation2 + $0x1c8] sm:$0xff]  ;;  %v316_v27 = vld [vmem:[#allocation2 + $0x80] sm:$0xff]  ;;  %v5852_v30 = vadd.f32 %v456_v15, %v356_v14 }
  0x62   : > { %v415_v18 = vld [vmem:[#allocation5 + $0x78] sm:$0xff]  ;;  %8479 = vst [vmem:[#allocation30_spill] sm:$0xff] %v5846_v19  ;;  %v657_v20 = vadd.f32 %v656_v7, %v5833_v62  ;;  %v457_v26 = vld [vmem:[#allocation5 + $0x1c8] sm:$0xff]  ;;  %v416_v28 = vld [vmem:[#allocation5 + $0x80] sm:$0xff] }
  0x63   : > { %v607_v46 = vadd.f32 %v606_v38, %v5815_v33  ;;  %8480 = vst [vmem:[#allocation31_spill] sm:$0xff] %v5849_v22  ;;  %8481 = vst [vmem:[#allocation32_spill] sm:$0xff] %v5852_v30  ;;  %v5855_v32 = vadd.f32 %v415_v18, %v315_v16  ;;  %v358_v35 = vld [vmem:[#allocation2 + $0x1d0] sm:$0xff]  ;;  %v317_v38 = vld [vmem:[#allocation2 + $0x88] sm:$0xff]  ;;  %v5858_v40 = vadd.f32 %v457_v26, %v357_v24 }
  0x64   : > { %v658_v31 = vadd.f32 %v657_v20, %v5840_v6  ;;  %v458_v36 = vld [vmem:[#allocation5 + $0x1d0] sm:$0xff]  ;;  %v417_v39 = vld [vmem:[#allocation5 + $0x88] sm:$0xff]  ;;  %v5861_v42 = vadd.f32 %v416_v28, %v316_v27  ;;  %v359_v44 = vld [vmem:[#allocation2 + $0x1d8] sm:$0xff] }
  0x65   : > { %v608_v57 = vadd.f32 %v607_v46, %v5818_v37  ;;  %8482 = vst [vmem:[#allocation33_spill] sm:$0xff] %v5855_v32  ;;  %8483 = vst [vmem:[#allocation34_spill] sm:$0xff] %v5858_v40  ;;  %v459_v46 = vld [vmem:[#allocation5 + $0x1d8] sm:$0xff]  ;;  %v318_v47 = vld [vmem:[#allocation2 + $0x90] sm:$0xff]  ;;  %v5864_v49 = vadd.f32 %v458_v36, %v358_v35  ;;  %v5867_v51 = vadd.f32 %v417_v39, %v317_v38 }
  0x66   : > { %v659_v41 = vadd.f32 %v658_v31, %v5846_v19  ;;  %8484 = vst [vmem:[#allocation35_spill] sm:$0xff] %v5861_v42  ;;  %v418_v48 = vld [vmem:[#allocation5 + $0x90] sm:$0xff]  ;;  %v460_v58 = vld [vmem:[#allocation5 + $0x1e0] sm:$0xff]  ;;  %v319_v59 = vld [vmem:[#allocation2 + $0x98] sm:$0xff]  ;;  %v5870_v61 = vadd.f32 %v459_v46, %v359_v44 }
  0x67   : > { %v609_v1 = vadd.f32 %v608_v57, %v5821_v45  ;;  %8485 = vst [vmem:[#allocation36_spill] sm:$0xff] %v5864_v49  ;;  %8486 = vst [vmem:[#allocation37_spill] sm:$0xff] %v5867_v51  ;;  %v360_v57 = vld [vmem:[#allocation2 + $0x1e0] sm:$0xff]  ;;  %v419_v60 = vld [vmem:[#allocation5 + $0x98] sm:$0xff]  ;;  %v5873_v2 = vadd.f32 %v418_v48, %v318_v47 }
  0x68   : > { %v660_v50 = vadd.f32 %v659_v41, %v5852_v30  ;;  %8487 = vst [vmem:[#allocation38_spill] sm:$0xff] %v5870_v61  ;;  %v361_v4 = vld [vmem:[#allocation2 + $0x1e8] sm:$0xff]  ;;  %v5876_v15 = vadd.f32 %v460_v58, %v360_v57  ;;  %v5879_v18 = vadd.f32 %v419_v60, %v319_v59  ;;  %v462_v24 = vld [vmem:[#allocation5 + $0x1f0] sm:$0xff]  ;;  %v324_v38 = vld [vmem:[#allocation2 + $0xc0] sm:$0xff] }
  0x69   : > { %v610_v11 = vadd.f32 %v609_v1, %v5830_v56  ;;  %v320_v1 = vld [vmem:[#allocation2 + $0xa0] sm:$0xff]  ;;  %8488 = vst [vmem:[#allocation39_spill] sm:$0xff] %v5873_v2  ;;  %v461_v5 = vld [vmem:[#allocation5 + $0x1e8] sm:$0xff]  ;;  %v322_v27 = vld [vmem:[#allocation2 + $0xb0] sm:$0xff] }
  0x6a   : > { %v661_v63 = vadd.f32 %v660_v50, %v5858_v40  ;;  %v321_v7 = vld [vmem:[#allocation2 + $0xa8] sm:$0xff]  ;;  %8489 = vst [vmem:[#allocation40_spill] sm:$0xff] %v5876_v15  ;;  %8490 = vst [vmem:[#allocation41_spill] sm:$0xff] %v5879_v18  ;;  %v5882_v28 = vadd.f32 %v461_v5, %v361_v4  ;;  %v426_v36 = vld [vmem:[#allocation5 + $0xd0] sm:$0xff] }
  0x6b   : > { %v611_v23 = vadd.f32 %v610_v11, %v5837_v0  ;;  %v420_v11 = vld [vmem:[#allocation5 + $0xa0] sm:$0xff]  ;;  %v421_v14 = vld [vmem:[#allocation5 + $0xa8] sm:$0xff]  ;;  %v463_v44 = vld [vmem:[#allocation5 + $0x1f8] sm:$0xff] }
  0x6c   : > { %v662_v16 = vadd.f32 %v661_v63, %v5864_v49  ;;  %v325_v26 = vld [vmem:[#allocation2 + $0xc8] sm:$0xff]  ;;  %8491 = vst [vmem:[#allocation42_spill] sm:$0xff] %v5882_v28  ;;  %v5885_v39 = vadd.f32 %v420_v11, %v320_v1  ;;  %v323_v46 = vld [vmem:[#allocation2 + $0xb8] sm:$0xff]  ;;  %v422_v47 = vld [vmem:[#allocation5 + $0xb0] sm:$0xff]  ;;  %v5891_v59 = vadd.f32 %v421_v14, %v321_v7 }
  0x6d   : > { %v612_v34 = vadd.f32 %v611_v23, %v5843_v10  ;;  %v362_v23 = vld [vmem:[#allocation2 + $0x1f0] sm:$0xff]  ;;  %v425_v35 = vld [vmem:[#allocation5 + $0xc8] sm:$0xff]  ;;  %v427_v57 = vld [vmem:[#allocation5 + $0xd8] sm:$0xff] }
  0x6e   : > { %v663_v31 = vadd.f32 %v662_v16, %v5870_v61  ;;  %8492 = vst [vmem:[#allocation43_spill] sm:$0xff] %v5885_v39  ;;  %v5888_v48 = vadd.f32 %v462_v24, %v362_v23  ;;  %v424_v58 = vld [vmem:[#allocation5 + $0xc0] sm:$0xff]  ;;  %8494 = vst [vmem:[#allocation45_spill] sm:$0xff] %v5891_v59  ;;  %v423_v5 = vld [vmem:[#allocation5 + $0xb8] sm:$0xff]  ;;  %v5901_v24 = vadd.f32 %v422_v47, %v322_v27 }
  0x6f   : > { %v613_v43 = vadd.f32 %v612_v34, %v5849_v22  ;;  %v326_v34 = vld [vmem:[#allocation2 + $0xd0] sm:$0xff]  ;;  %v364_v63 = vld [vmem:[#allocation2 + $0x200] sm:$0xff]  ;;  %v365_v14 = vld [vmem:[#allocation2 + $0x208] sm:$0xff]  ;;  %v5906_v61 = vadd.f32 %v424_v58, %v324_v38 }
  0x70   : > { %8493 = vst [vmem:[#allocation44_spill] sm:$0xff] %v5888_v48  ;;  %v664_v50 = vadd.f32 %v663_v31, %v5876_v15  ;;  %v464_v1 = vld [vmem:[#allocation5 + $0x200] sm:$0xff]  ;;  %v5896_v4 = vadd.f32 %v426_v36, %v326_v34  ;;  %8498 = vst [vmem:[#allocation49_spill] sm:$0xff] %v5901_v24  ;;  %v465_v31 = vld [vmem:[#allocation5 + $0x208] sm:$0xff] }
  0x71   : > { %v614_v52 = vadd.f32 %v613_v43, %v5855_v32  ;;  %v363_v43 = vld [vmem:[#allocation2 + $0x1f8] sm:$0xff]  ;;  %v428_v23 = vld [vmem:[#allocation5 + $0xe0] sm:$0xff]  ;;  %8500 = vst [vmem:[#allocation51_spill] sm:$0xff] %v5906_v61  ;;  %v429_v36 = vld [vmem:[#allocation5 + $0xe8] sm:$0xff]  ;;  %v5918_v38 = vadd.f32 %v465_v31, %v365_v14 }
  0x72   : > { %8496 = vst [vmem:[#allocation47_spill] sm:$0xff] %v5896_v4  ;;  %v5898_v11 = vadd.f32 %v463_v44, %v363_v43  ;;  %v665_v16 = vadd.f32 %v664_v50, %v5882_v28  ;;  %v5911_v43 = vadd.f32 %v423_v5, %v323_v46  ;;  %v366_v44 = vld [vmem:[#allocation2 + $0x210] sm:$0xff]  ;;  %v467_v46 = vld [vmem:[#allocation5 + $0x218] sm:$0xff]  ;;  %v368_v30 = vld [vmem:[#allocation2 + $0x220] sm:$0xff] }
  0x73   : > { %v615_v3 = vadd.f32 %v614_v52, %v5861_v42  ;;  %v327_v52 = vld [vmem:[#allocation2 + $0xd8] sm:$0xff]  ;;  %v466_v47 = vld [vmem:[#allocation5 + $0x210] sm:$0xff]  ;;  %8504 = vst [vmem:[#allocation55_spill] sm:$0xff] %v5918_v38  ;;  %v468_v25 = vld [vmem:[#allocation5 + $0x220] sm:$0xff] }
  0x74   : > { %8497 = vst [vmem:[#allocation48_spill] sm:$0xff] %v5898_v11  ;;  %v666_v34 = vadd.f32 %v665_v16, %v5888_v48  ;;  %8502 = vst [vmem:[#allocation53_spill] sm:$0xff] %v5911_v43  ;;  %v330_v58 = vld [vmem:[#allocation2 + $0xf0] sm:$0xff]  ;;  %v331_v14 = vld [vmem:[#allocation2 + $0xf8] sm:$0xff]  ;;  %v5940_v21 = vadd.f32 %v468_v25, %v368_v30 }
  0x75   : > { %v616_v20 = vadd.f32 %v615_v3, %v5867_v51  ;;  %v5894_v3 = vadd.f32 %v425_v35, %v325_v26  ;;  %v5908_v26 = vadd.f32 %v464_v1, %v364_v63  ;;  %v329_v35 = vld [vmem:[#allocation2 + $0xe8] sm:$0xff]  ;;  %v367_v1 = vld [vmem:[#allocation2 + $0x218] sm:$0xff]  ;;  %v332_v40 = vld [vmem:[#allocation2 + $0x100] sm:$0xff] }
  0x76   : > { %v5922_v5 = vadd.f32 %v429_v36, %v329_v35  ;;  %v431_v31 = vld [vmem:[#allocation5 + $0xf8] sm:$0xff]  ;;  %v5934_v36 = vadd.f32 %v467_v46, %v367_v1  ;;  %v432_v29 = vld [vmem:[#allocation5 + $0x100] sm:$0xff]  ;;  %v370_v6 = vld [vmem:[#allocation2 + $0x230] sm:$0xff]  ;;  %8510 = vst [vmem:[#allocation61_spill] sm:$0xff] %v5940_v21 }
  0x77   : > { %v617_v41 = vadd.f32 %v616_v20, %v5873_v2  ;;  %8495 = vst [vmem:[#allocation46_spill] sm:$0xff] %v5894_v3  ;;  %v328_v20 = vld [vmem:[#allocation2 + $0xe0] sm:$0xff]  ;;  %8501 = vst [vmem:[#allocation52_spill] sm:$0xff] %v5908_v26  ;;  %v5937_v17 = vadd.f32 %v431_v31, %v331_v14  ;;  %v470_v19 = vld [vmem:[#allocation5 + $0x230] sm:$0xff]  ;;  %v5943_v55 = vadd.f32 %v432_v29, %v332_v40 }
  0x78   : > { %v5914_v50 = vadd.f32 %v428_v23, %v328_v20  ;;  %8505 = vst [vmem:[#allocation56_spill] sm:$0xff] %v5922_v5  ;;  %v624_v20 = vsel %vm623_vm0, %v5906_v61, 0.0  ;;  %v5927_v23 = vadd.f32 %v466_v47, %v366_v44  ;;  %8508 = vst [vmem:[#allocation59_spill] sm:$0xff] %v5934_v36  ;;  %v369_v47 = vld [vmem:[#allocation2 + $0x228] sm:$0xff]  ;;  %v371_v46 = vld [vmem:[#allocation2 + $0x238] sm:$0xff]  ;;  %v5952_v29 = vadd.f32 %v470_v19, %v370_v6 }
  0x79   : > { %v618_v60 = vadd.f32 %v617_v41, %v5879_v18  ;;  %v5904_v41 = vadd.f32 %v427_v57, %v327_v52  ;;  %v628_v52 = vadd.f32 %v5896_v4, %v5894_v3  ;;  %v667_v57 = vadd.f32 %v666_v34, %v5898_v11  ;;  %8509 = vst [vmem:[#allocation60_spill] sm:$0xff] %v5937_v17  ;;  %v433_v1 = vld [vmem:[#allocation5 + $0x108] sm:$0xff]  ;;  %v475_v25 = vld [vmem:[#allocation5 + $0x258] sm:$0xff]  ;;  %v476_v30 = vld [vmem:[#allocation5 + $0x260] sm:$0xff] }
  0x7a   : > { %8503 = vst [vmem:[#allocation54_spill] sm:$0xff] %v5914_v50  ;;  %8506 = vst [vmem:[#allocation57_spill] sm:$0xff] %v5927_v23  ;;  %v436_v19 = vld [vmem:[#allocation5 + $0x120] sm:$0xff]  ;;  %v337_v11 = vld [vmem:[#allocation2 + $0x128] sm:$0xff] }
  0x7b   : > { %v619_v7 = vadd.f32 %v618_v60, %v5885_v39  ;;  %8499 = vst [vmem:[#allocation50_spill] sm:$0xff] %v5904_v41  ;;  %v430_v60 = vld [vmem:[#allocation5 + $0xf0] sm:$0xff]  ;;  %v629_v16 = vadd.f32 %v628_v52, %v5904_v41  ;;  %8511 = vst [vmem:[#allocation62_spill] sm:$0xff] %v5943_v55  ;;  %v471_v41 = vld [vmem:[#allocation5 + $0x238] sm:$0xff] }
  0x7c   : > { %8514 = vst [vmem:[#allocation65_spill] sm:$0xff] %v5952_v29  ;;  %v488_v28 = vld [vmem:[#allocation5 + $0x2c0] sm:$0xff]  ;;  %v489_v49 = vld [vmem:[#allocation5 + $0x2c8] sm:$0xff]  ;;  %vm6152_vm1 = vmpackc.low %vm623_vm0, %vm623_vm0 }
  0x7d   : > { %v620_v27 = vadd.f32 %v619_v7, %v5891_v59  ;;  %v668_v7 = vadd.f32 %v667_v57, %v5908_v26  ;;  %v630_v35 = vadd.f32 %v629_v16, %v5914_v50  ;;  %v469_v57 = vld [vmem:[#allocation5 + $0x228] sm:$0xff]  ;;  %v334_v16 = vld [vmem:[#allocation2 + $0x110] sm:$0xff] }
  0x7e   : > { %v5946_v14 = vadd.f32 %v469_v57, %v369_v47  ;;  %v377_v47 = vld [vmem:[#allocation2 + $0x268] sm:$0xff] }
  0x7f   : > { %v621_v63 = vadd.f32 %v620_v27, %v5901_v24  ;;  %v5931_v27 = vadd.f32 %v430_v60, %v330_v58  ;;  %v669_v52 = vadd.f32 %v668_v7, %v5918_v38  ;;  %v333_v60 = vld [vmem:[#allocation2 + $0x108] sm:$0xff]  ;;  %v434_v7 = vld [vmem:[#allocation5 + $0x110] sm:$0xff] }
  0x80   : > { %8512 = vst [vmem:[#allocation63_spill] sm:$0xff] %v5946_v14  ;;  %v477_v57 = vld [vmem:[#allocation5 + $0x268] sm:$0xff]  ;;  %v5955_v50 = vadd.f32 %v434_v7, %v334_v16 }
  0x81   : > { %v622_v34 = vadd.f32 %v621_v63, %v5911_v43  ;;  %8507 = vst [vmem:[#allocation58_spill] sm:$0xff] %v5931_v27  ;;  %v631_v63 = vadd.f32 %v630_v35, %v5922_v5  ;;  %v670_v58 = vadd.f32 %v669_v52, %v5927_v23  ;;  %v376_v35 = vld [vmem:[#allocation2 + $0x260] sm:$0xff]  ;;  %v374_v52 = vld [vmem:[#allocation2 + $0x250] sm:$0xff]  ;;  %v335_v23 = vld [vmem:[#allocation2 + $0x118] sm:$0xff]  ;;  %v5968_v7 = vadd.f32 %v477_v57, %v377_v47 }
  0x82   : > { %v372_v5 = vld [vmem:[#allocation2 + $0x240] sm:$0xff]  ;;  %8515 = vst [vmem:[#allocation66_spill] sm:$0xff] %v5955_v50  ;;  %v339_v57 = vld [vmem:[#allocation2 + $0x138] sm:$0xff] }
  0x83   : > { %v625_v44 = vadd.f32 %v624_v20, %v622_v34  ;;  %v632_v20 = vadd.f32 %v631_v63, %v5931_v27  ;;  %v375_v34 = vld [vmem:[#allocation2 + $0x258] sm:$0xff]  ;;  %v671_v31 = vadd.f32 %v670_v58, %v5934_v36  ;;  %v472_v27 = vld [vmem:[#allocation5 + $0x240] sm:$0xff]  ;;  %v474_v58 = vld [vmem:[#allocation5 + $0x250] sm:$0xff]  ;;  %8520 = vst [vmem:[#allocation71_spill] sm:$0xff] %v5968_v7 }
  0x84   : > { %v435_v63 = vld [vmem:[#allocation5 + $0x118] sm:$0xff]  ;;  %v336_v36 = vld [vmem:[#allocation2 + $0x120] sm:$0xff]  ;;  %v5958_v48 = vadd.f32 %v475_v25, %v375_v34  ;;  %v5972_v34 = vadd.f32 %v474_v58, %v374_v52 }
  0x85   : > { %626 = vadd.xlane.f32.xlu0 %v625_v44  ;;  %v5949_v44 = vadd.f32 %v433_v1, %v333_v60  ;;  %v633_v26 = vadd.f32 %v632_v20, %v5937_v17  ;;  %v672_v40 = vadd.f32 %v671_v31, %v5940_v21  ;;  %v5960_v60 = vadd.f32 %v476_v30, %v376_v35  ;;  %v378_v20 = vld [vmem:[#allocation2 + $0x270] sm:$0xff]  ;;  %v373_v17 = vld [vmem:[#allocation2 + $0x248] sm:$0xff]  ;;  %v379_v35 = vld [vmem:[#allocation2 + $0x278] sm:$0xff] }
  0x86   : > { %8516 = vst [vmem:[#allocation67_spill] sm:$0xff] %v5958_v48  ;;  %v5962_v1 = vadd.f32 %v471_v41, %v371_v46  ;;  %v478_v31 = vld [vmem:[#allocation5 + $0x270] sm:$0xff]  ;;  %v473_v21 = vld [vmem:[#allocation5 + $0x248] sm:$0xff]  ;;  %v5965_v15 = vadd.f32 %v435_v63, %v335_v23  ;;  %8522 = vst [vmem:[#allocation73_spill] sm:$0xff] %v5972_v34 }
  0x87   : > { %8513 = vst [vmem:[#allocation64_spill] sm:$0xff] %v5949_v44  ;;  %v634_v38 = vadd.f32 %v633_v26, %v5943_v55  ;;  %8517 = vst [vmem:[#allocation68_spill] sm:$0xff] %v5960_v60  ;;  %v673_v6 = vadd.f32 %v672_v40, %v5946_v14  ;;  %v5970_v26 = vadd.f32 %v472_v27, %v372_v5  ;;  %v437_v46 = vld [vmem:[#allocation5 + $0x128] sm:$0xff]  ;;  %v479_v25 = vld [vmem:[#allocation5 + $0x278] sm:$0xff] }
  0x88   : > { %8518 = vst [vmem:[#allocation69_spill] sm:$0xff] %v5962_v1  ;;  %8519 = vst [vmem:[#allocation70_spill] sm:$0xff] %v5965_v15  ;;  %v338_v30 = vld [vmem:[#allocation2 + $0x130] sm:$0xff]  ;;  %v5975_v40 = vadd.f32 %v436_v19, %v336_v36  ;;  %v5978_v23 = vadd.f32 %v478_v31, %v378_v20  ;;  %v5982_v63 = vadd.f32 %v473_v21, %v373_v17  ;;  %v380_v52 = vld [vmem:[#allocation2 + $0x280] sm:$0xff]  ;;  %v678_v17 = vsel %vm623_vm0, %v5972_v34, 0.0 }
  0x89   : > { %v635_v16 = vadd.f32 %v634_v38, %v5949_v44  ;;  %8521 = vst [vmem:[#allocation72_spill] sm:$0xff] %v5970_v26  ;;  %v674_v41 = vadd.f32 %v673_v6, %v5952_v29  ;;  %v682_v38 = vadd.f32 %v5960_v60, %v5958_v48  ;;  %v438_v27 = vld [vmem:[#allocation5 + $0x130] sm:$0xff]  ;;  %v480_v47 = vld [vmem:[#allocation5 + $0x280] sm:$0xff]  ;;  %v5985_v58 = vadd.f32 %v437_v46, %v337_v11  ;;  %v439_v21 = vld [vmem:[#allocation5 + $0x138] sm:$0xff] }
  0x8a   : > { %8523 = vst [vmem:[#allocation74_spill] sm:$0xff] %v5975_v40  ;;  %8524 = vst [vmem:[#allocation75_spill] sm:$0xff] %v5978_v23  ;;  %v5988_v6 = vadd.f32 %v479_v25, %v379_v35  ;;  %v381_v31 = vld [vmem:[#allocation2 + $0x288] sm:$0xff]  ;;  %v5994_v29 = vadd.f32 %v438_v27, %v338_v30  ;;  %v5997_v46 = vadd.f32 %v480_v47, %v380_v52  ;;  %v440_v25 = vld [vmem:[#allocation5 + $0x140] sm:$0xff] }
  0x8b   : > { %v636_v55 = vadd.f32 %v635_v16, %v5955_v50  ;;  %8525 = vst [vmem:[#allocation76_spill] sm:$0xff] %v5982_v63  ;;  %v675_v5 = vadd.f32 %v674_v41, %v5962_v1  ;;  %8526 = vst [vmem:[#allocation77_spill] sm:$0xff] %v5985_v58  ;;  %v683_v19 = vadd.f32 %v682_v38, %v5968_v7  ;;  %v481_v16 = vld [vmem:[#allocation5 + $0x288] sm:$0xff]  ;;  %v340_v41 = vld [vmem:[#allocation2 + $0x140] sm:$0xff] }
  0x8c   : > { %8527 = vst [vmem:[#allocation78_spill] sm:$0xff] %v5988_v6  ;;  %8528 = vst [vmem:[#allocation79_spill] sm:$0xff] %v5994_v29  ;;  %v382_v38 = vld [vmem:[#allocation2 + $0x290] sm:$0xff]  ;;  %v341_v7 = vld [vmem:[#allocation2 + $0x148] sm:$0xff]  ;;  %v6004_v14 = vadd.f32 %v481_v16, %v381_v31 }
  0x8d   : > { %v637_v36 = vadd.f32 %v636_v55, %v5965_v15  ;;  %v676_v20 = vadd.f32 %v675_v5, %v5970_v26  ;;  %8529 = vst [vmem:[#allocation80_spill] sm:$0xff] %v5997_v46  ;;  %v684_v55 = vadd.f32 %v683_v19, %v5978_v23  ;;  %v482_v5 = vld [vmem:[#allocation5 + $0x290] sm:$0xff]  ;;  %v6001_v26 = vadd.f32 %v439_v21, %v339_v57  ;;  %v383_v52 = vld [vmem:[#allocation2 + $0x298] sm:$0xff]  ;;  %v484_v31 = vld [vmem:[#allocation5 + $0x2a0] sm:$0xff] }
  0x8e   : > { %8531 = vst [vmem:[#allocation82_spill] sm:$0xff] %v6004_v14  ;;  %v483_v47 = vld [vmem:[#allocation5 + $0x298] sm:$0xff]  ;;  %v342_v48 = vld [vmem:[#allocation2 + $0x150] sm:$0xff]  ;;  %v6007_v19 = vadd.f32 %v440_v25, %v340_v41  ;;  %v6010_v23 = vadd.f32 %v482_v5, %v382_v38  ;;  %v385_v25 = vld [vmem:[#allocation2 + $0x2a8] sm:$0xff] }
  0x8f   : > { %v638_v11 = vadd.f32 %v637_v36, %v5975_v40  ;;  %v677_v35 = vadd.f32 %v676_v20, %v5982_v63  ;;  %8530 = vst [vmem:[#allocation81_spill] sm:$0xff] %v6001_v26  ;;  %v685_v30 = vadd.f32 %v684_v55, %v5988_v6  ;;  %v441_v36 = vld [vmem:[#allocation5 + $0x148] sm:$0xff]  ;;  %v442_v21 = vld [vmem:[#allocation5 + $0x150] sm:$0xff]  ;;  %v343_v16 = vld [vmem:[#allocation2 + $0x158] sm:$0xff]  ;;  %v6016_v55 = vadd.f32 %v483_v47, %v383_v52 }
  0x90   : > { %8532 = vst [vmem:[#allocation83_spill] sm:$0xff] %v6007_v19  ;;  %8533 = vst [vmem:[#allocation84_spill] sm:$0xff] %v6010_v23  ;;  %v6013_v63 = vadd.f32 %v441_v36, %v341_v7  ;;  %v344_v38 = vld [vmem:[#allocation2 + $0x160] sm:$0xff]  ;;  %v6019_v5 = vadd.f32 %v442_v21, %v342_v48  ;;  %v386_v36 = vld [vmem:[#allocation2 + $0x2b0] sm:$0xff] }
  0x91   : > { %v639_v1 = vadd.f32 %v638_v11, %v5985_v58  ;;  %v679_v27 = vadd.f32 %v678_v17, %v677_v35  ;;  %v686_v57 = vadd.f32 %v685_v30, %v5997_v46  ;;  %v384_v11 = vld [vmem:[#allocation2 + $0x2a0] sm:$0xff]  ;;  %8535 = vst [vmem:[#allocation86_spill] sm:$0xff] %v6016_v55  ;;  %v443_v35 = vld [vmem:[#allocation5 + $0x158] sm:$0xff]  ;;  %v486_v46 = vld [vmem:[#allocation5 + $0x2b0] sm:$0xff] }
  0x92   : > { %8534 = vst [vmem:[#allocation85_spill] sm:$0xff] %v6013_v63  ;;  %8536 = vst [vmem:[#allocation87_spill] sm:$0xff] %v6019_v5  ;;  %v444_v7 = vld [vmem:[#allocation5 + $0x160] sm:$0xff]  ;;  %v6025_v52 = vadd.f32 %v443_v35, %v343_v16  ;;  %v445_v48 = vld [vmem:[#allocation5 + $0x168] sm:$0xff] }
  0x93   : > { %v640_v20 = vadd.f32 %v639_v1, %v5994_v29  ;;  %680 = vadd.xlane.f32.xlu1 %v679_v27  ;;  %v687_v41 = vadd.f32 %v686_v57, %v6004_v14  ;;  %v485_v1 = vld [vmem:[#allocation5 + $0x2a8] sm:$0xff]  ;;  %v6022_v27 = vadd.f32 %v484_v31, %v384_v11  ;;  %v387_v21 = vld [vmem:[#allocation2 + $0x2b8] sm:$0xff]  ;;  %v6031_v11 = vadd.f32 %v444_v7, %v344_v38  ;;  %v446_v16 = vld [vmem:[#allocation5 + $0x170] sm:$0xff] }
  0x94   : > { %8538 = vst [vmem:[#allocation89_spill] sm:$0xff] %v6025_v52  ;;  %v6028_v57 = vadd.f32 %v485_v1, %v385_v25  ;;  %v487_v60 = vld [vmem:[#allocation5 + $0x2b8] sm:$0xff]  ;;  %v388_v35 = vld [vmem:[#allocation2 + $0x2c0] sm:$0xff]  ;;  %v389_v7 = vld [vmem:[#allocation2 + $0x2c8] sm:$0xff] }
  0x95   : > { %v641_v17 = vadd.f32 %v640_v20, %v6001_v26  ;;  %8537 = vst [vmem:[#allocation88_spill] sm:$0xff] %v6022_v27  ;;  %v688_v6 = vadd.f32 %v687_v41, %v6010_v23  ;;  %v345_v20 = vld [vmem:[#allocation2 + $0x168] sm:$0xff]  ;;  %8540 = vst [vmem:[#allocation91_spill] sm:$0xff] %v6031_v11  ;;  %v6034_v41 = vadd.f32 %v486_v46, %v386_v36  ;;  %v447_v38 = vld [vmem:[#allocation5 + $0x178] sm:$0xff] }
  0x96   : > { %8539 = vst [vmem:[#allocation90_spill] sm:$0xff] %v6028_v57  ;;  %v6037_v25 = vadd.f32 %v445_v48, %v345_v20  ;;  %v6040_v1 = vadd.f32 %v487_v60, %v387_v21  ;;  %v349_v46 = vld [vmem:[#allocation2 + $0x188] sm:$0xff]  ;;  %v448_v48 = vld [vmem:[#allocation5 + $0x180] sm:$0xff]  ;;  %v490_v60 = vld [vmem:[#allocation5 + $0x2d0] sm:$0xff] }
  0x97   : > { %v642_v30 = vadd.f32 %v641_v17, %v6007_v19  ;;  %v689_v14 = vadd.f32 %v688_v6, %v6016_v55  ;;  %v346_v17 = vld [vmem:[#allocation2 + $0x170] sm:$0xff]  ;;  %8541 = vst [vmem:[#allocation92_spill] sm:$0xff] %v6034_v41  ;;  %v449_v36 = vld [vmem:[#allocation5 + $0x188] sm:$0xff] }
  0x98   : > { %8542 = vst [vmem:[#allocation93_spill] sm:$0xff] %v6037_v25  ;;  %8543 = vst [vmem:[#allocation94_spill] sm:$0xff] %v6040_v1  ;;  %v6043_v62 = vadd.f32 %v446_v16, %v346_v17  ;;  %v6055_v34 = vadd.f32 %v449_v36, %v349_v46  ;;  %v391_v17 = vld [vmem:[#allocation2 + $0x2d8] sm:$0xff]  ;;  %v393_v36 = vld [vmem:[#allocation2 + $0x2e8] sm:$0xff] }
  0x99   : > { %v643_v47 = vadd.f32 %v642_v30, %v6013_v63  ;;  %v690_v23 = vadd.f32 %v689_v14, %v6022_v27  ;;  %v347_v30 = vld [vmem:[#allocation2 + $0x178] sm:$0xff]  ;;  %v6046_v27 = vadd.f32 %v488_v28, %v388_v35 }
  0x9a   : > { %8544 = vst [vmem:[#allocation95_spill] sm:$0xff] %v6043_v62  ;;  %v6049_v21 = vadd.f32 %v447_v38, %v347_v30  ;;  %8548 = vst [vmem:[#allocation99_spill] sm:$0xff] %v6055_v34  ;;  %v491_v16 = vld [vmem:[#allocation5 + $0x2d8] sm:$0xff]  ;;  %v392_v30 = vld [vmem:[#allocation2 + $0x2e0] sm:$0xff]  ;;  %v651_v46 = vsel %vm623_vm0, %v6055_v34, 0.0 }
  0x9b   : > { %v644_v31 = vadd.f32 %v643_v47, %v6019_v5  ;;  %v691_v55 = vadd.f32 %v690_v23, %v6028_v57  ;;  %v348_v47 = vld [vmem:[#allocation2 + $0x180] sm:$0xff]  ;;  %8545 = vst [vmem:[#allocation96_spill] sm:$0xff] %v6046_v27  ;;  %v6052_v57 = vadd.f32 %v489_v49, %v389_v7  ;;  %v6064_v49 = vadd.f32 %v491_v16, %v391_v17  ;;  %v395_v16 = vld [vmem:[#allocation2 + $0x2f8] sm:$0xff] }
  0x9c   : > { %8546 = vst [vmem:[#allocation97_spill] sm:$0xff] %v6049_v21  ;;  %v492_v38 = vld [vmem:[#allocation5 + $0x2e0] sm:$0xff] }
  0x9d   : > { %v645_v6 = vadd.f32 %v644_v31, %v6025_v52  ;;  %v692_v20 = vadd.f32 %v691_v55, %v6034_v41  ;;  %v390_v31 = vld [vmem:[#allocation2 + $0x2d0] sm:$0xff]  ;;  %8547 = vst [vmem:[#allocation98_spill] sm:$0xff] %v6052_v57  ;;  %8551 = vst [vmem:[#allocation102_spill] sm:$0xff] %v6064_v49 }
  0x9e   : > { %v6060_v55 = vadd.f32 %v490_v60, %v390_v31  ;;  %v494_v60 = vld [vmem:[#allocation5 + $0x2f0] sm:$0xff] }
  0x9f   : > { %v646_v14 = vadd.f32 %v645_v6, %v6031_v11  ;;  %v693_v53 = vadd.f32 %v692_v20, %v6040_v1  ;;  %v6057_v6 = vadd.f32 %v448_v48, %v348_v47  ;;  %v493_v47 = vld [vmem:[#allocation5 + $0x2e8] sm:$0xff]  ;;  %v6070_v48 = vadd.f32 %v492_v38, %v392_v30 }
  0xa0   : > { %8550 = vst [vmem:[#allocation101_spill] sm:$0xff] %v6060_v55  ;;  %v6073_v1 = vadd.f32 %v493_v47, %v393_v36  ;;  %v499_v36 = vld [vmem:[#allocation5 + $0x318] sm:$0xff] }
  0xa1   : > { %v647_v23 = vadd.f32 %v646_v14, %v6037_v25  ;;  %8549 = vst [vmem:[#allocation100_spill] sm:$0xff] %v6057_v6  ;;  %v694_v35 = vadd.f32 %v693_v53, %v6046_v27  ;;  %8552 = vst [vmem:[#allocation103_spill] sm:$0xff] %v6070_v48  ;;  %v394_v53 = vld [vmem:[#allocation2 + $0x2f0] sm:$0xff]  ;;  %v396_v27 = vld [vmem:[#allocation2 + $0x300] sm:$0xff] }
  0xa2   : > { %8553 = vst [vmem:[#allocation104_spill] sm:$0xff] %v6073_v1 }
  0xa3   : > { %v648_v28 = vadd.f32 %v647_v23, %v6043_v62  ;;  %v695_v7 = vadd.f32 %v694_v35, %v6052_v57  ;;  %v6076_v35 = vadd.f32 %v494_v60, %v394_v53 }
  0xa5   : > { %v649_v14 = vadd.f32 %v648_v28, %v6049_v21  ;;  %v696_v31 = vadd.f32 %v695_v7, %v6060_v55  ;;  %v495_v28 = vld [vmem:[#allocation5 + $0x2f8] sm:$0xff]  ;;  %8554 = vst [vmem:[#allocation105_spill] sm:$0xff] %v6076_v35  ;;  %v397_v7 = vld [vmem:[#allocation2 + $0x308] sm:$0xff] }
  0xa6   : > { %v6079_v30 = vadd.f32 %v495_v28, %v395_v16  ;;  %v497_v55 = vld [vmem:[#allocation5 + $0x308] sm:$0xff] }
  0xa7   : > { %v650_v20 = vadd.f32 %v649_v14, %v6057_v6  ;;  %v697_v17 = vadd.f32 %v696_v31, %v6064_v49  ;;  %v496_v14 = vld [vmem:[#allocation5 + $0x300] sm:$0xff]  ;;  %v398_v31 = vld [vmem:[#allocation2 + $0x310] sm:$0xff]  ;;  %v6085_v53 = vadd.f32 %v497_v55, %v397_v7 }
  0xa8   : > { %8555 = vst [vmem:[#allocation106_spill] sm:$0xff] %v6079_v30  ;;  %v6082_v47 = vadd.f32 %v496_v14, %v396_v27 }
  0xa9   : > { %v652_v23 = vadd.f32 %v651_v46, %v650_v20  ;;  %v698_v57 = vadd.f32 %v697_v17, %v6070_v48  ;;  %v399_v46 = vld [vmem:[#allocation2 + $0x318] sm:$0xff]  ;;  %8557 = vst [vmem:[#allocation108_spill] sm:$0xff] %v6085_v53 }
  0xaa   : > { %8556 = vst [vmem:[#allocation107_spill] sm:$0xff] %v6082_v47  ;;  %v6088_v17 = vadd.f32 %v499_v36, %v399_v46 }
  0xab   : > { %653 = vadd.xlane.f32.xlu0 %v652_v23  ;;  %v699_v38 = vadd.f32 %v698_v57, %v6073_v1  ;;  %v498_v23 = vld [vmem:[#allocation5 + $0x310] sm:$0xff] }
  0xac   : > { %8558 = vst [vmem:[#allocation109_spill] sm:$0xff] %v6088_v17  ;;  %v6090_v16 = vadd.f32 %v498_v23, %v398_v31  ;;  %v705_v27 = vsel %vm623_vm0, %v6088_v17, 0.0 }
  0xad   : > { %v700_v20 = vadd.f32 %v699_v38, %v6076_v35 }
  0xae   : > { %8559 = vst [vmem:[#allocation110_spill] sm:$0xff] %v6090_v16 }
  0xaf   : > { %v701_v60 = vadd.f32 %v700_v20, %v6079_v30 }
  0xb1   : > { %v702_v57 = vadd.f32 %v701_v60, %v6082_v47 }
  0xb3   : > { %v703_v28 = vadd.f32 %v702_v57, %v6085_v53 }
  0xb5   : > { %v704_v14 = vadd.f32 %v703_v28, %v6090_v16 }
  0xb7   : > { %v706_v38 = vadd.f32 %v705_v27, %v704_v14 }
  0xb9   : > { %707 = vadd.xlane.f32.xlu1 %v706_v38 }
 0x112   : > { %v627_v1 = vpop.xlane.xlu0 %626 }
 0x113   : > { %v6097_v55 = vmul.f32 0.00031887754, %v627_v1 }
 0x115   : > { %v718_v7 = vsub.f32 %v5795_v9, %v6097_v55  ;;  %v741_v46 = vsub.f32 %v5906_v61, %v6097_v55  ;;  %v6108_v31 = vsub.f32 %v5793_v8, %v6097_v55  ;;  %v6112_v1 = vsub.f32 %v5799_v13, %v6097_v55  ;;  %v8591_v9 = vld [vmem:[#allocation42_spill] sm:$0xff] }
 0x116   : > { %v6116_v23 = vsub.f32 %v5797_v12, %v6097_v55  ;;  %v6120_v60 = vsub.f32 %v5818_v37, %v6097_v55  ;;  %v6124_v57 = vsub.f32 %v5815_v33, %v6097_v55  ;;  %v6128_v28 = vsub.f32 %v5830_v56, %v6097_v55  ;;  %v8613_v33 = vld [vmem:[#allocation75_spill] sm:$0xff] }
 0x117   : > { %893 = vmatprep.mubr.f32.mxu0 %v718_v7  ;;  %5007 = vmatprep.mubr.msk.f32.mxu1 %vm623_vm0, %v741_v46  ;;  %v6132_v27 = vsub.f32 %v5821_v45, %v6097_v55  ;;  %v6148_v61 = vsub.f32 %v5843_v10, %v6097_v55  ;;  %v6158_v37 = vsub.f32 %v5837_v0, %v6097_v55 }
 0x118   : > { %v6166_v45 = vsub.f32 %v5849_v22, %v6097_v55  ;;  %v6170_v10 = vsub.f32 %v5867_v51, %v6097_v55  ;;  %v6178_v13 = vsub.f32 %v5861_v42, %v6097_v55  ;;  %v6186_v22 = vsub.f32 %v5873_v2, %v6097_v55 }
 0x119   : > { %8560 = vst [vmem:[#allocation111_spill] sm:$0xff] %v6132_v27  ;;  %8561 = vst [vmem:[#allocation112_spill] sm:$0xff] %v6148_v61 }
 0x11a   : > { %8564 = vst [vmem:[#allocation113_spill] sm:$0xff] %v6158_v37  ;;  %8566 = vst [vmem:[#allocation115_spill] sm:$0xff] %v6166_v45  ;;  %v8609_v45 = vld [vmem:[#allocation76_spill] sm:$0xff] }
 0x11b   : > { %8567 = vst [vmem:[#allocation116_spill] sm:$0xff] %v6170_v10  ;;  %8568 = vst [vmem:[#allocation117_spill] sm:$0xff] %v6178_v13  ;;  %v8608_v10 = vld [vmem:[#allocation65_spill] sm:$0xff] }
 0x11c   : > { %8570 = vst [vmem:[#allocation119_spill] sm:$0xff] %v6186_v22  ;;  %v8603_v22 = vld [vmem:[#allocation57_spill] sm:$0xff] }
 0x120   : > { %v681_v2 = vpop.xlane.xlu1 %680 }
 0x138   : > { %v654_v36 = vpop.xlane.xlu0 %653 }
 0x139   : > { %v6104_v20 = vmul.f32 0.00031887754, %v654_v36 }
 0x13b   : > { %v6136_v14 = vsub.f32 %v5896_v4, %v6104_v20  ;;  %v6140_v38 = vsub.f32 %v6055_v34, %v6104_v20  ;;  %v6144_v36 = vsub.f32 %v5894_v3, %v6104_v20  ;;  %v6162_v34 = vsub.f32 %v5855_v32, %v6097_v55  ;;  %v8589_v3 = vld [vmem:[#allocation26_spill] sm:$0xff] }
 0x13c   : > { %v6182_v32 = vsub.f32 %v5879_v18, %v6097_v55  ;;  %v6200_v42 = vsub.f32 %v5955_v50, %v6104_v20  ;;  %v6204_v51 = vsub.f32 %v5949_v44, %v6104_v20  ;;  %v6222_v44 = vsub.f32 %v5901_v24, %v6097_v55 }
 0x13d   : > { %8565 = vst [vmem:[#allocation114_spill] sm:$0xff] %v6162_v34  ;;  %v5091_v12 = vpack.c.bf16 %v6136_v14, %v718_v7  ;;  %v5187_v56 = vpack.c.bf16 %v6140_v38, %v741_v46  ;;  %v5093_v0 = vpack.c.bf16 %v6144_v36, %v6108_v31  ;;  %v6190_v7 = vsub.f32 %v5891_v59, %v6097_v55 }
 0x13e   : > { %8569 = vst [vmem:[#allocation118_spill] sm:$0xff] %v6182_v32  ;;  %v6194_v46 = vsub.f32 %v5885_v39, %v6097_v55  ;;  %v6208_v59 = vsub.f32 %v5911_v43, %v6097_v55  ;;  %v6218_v39 = vsub.f32 %v5965_v15, %v6104_v20  ;;  %8574 = vst [vmem:[#allocation123_spill] sm:$0xff] %v6222_v44  ;;  %v6224_v50 = vmul.f32 0.00031887754, %v681_v2  ;;  %v8600_v44 = vld [vmem:[#allocation54_spill] sm:$0xff] }
 0x13f   : > { %8571 = vst [vmem:[#allocation120_spill] sm:$0xff] %v6190_v7  ;;  %5092 = vmatprep.subr.bf16.mxu0 %v5091_v12  ;;  %5189 = vmatprep.subr.msk.bf16.mxu1 %vm6152_vm1, %v5187_v56  ;;  %v6214_v12 = vsub.f32 %v5975_v40, %v6104_v20  ;;  %v6232_v43 = vsub.f32 %v5994_v29, %v6104_v20  ;;  %v8588_v40 = vld [vmem:[#allocation22_spill] sm:$0xff]  ;;  %v8592_v7 = vld [vmem:[#allocation40_spill] sm:$0xff] }
 0x140   : > { %8572 = vst [vmem:[#allocation121_spill] sm:$0xff] %v6194_v46  ;;  %8573 = vst [vmem:[#allocation122_spill] sm:$0xff] %v6208_v59  ;;  %5094 = vmatpush1.bf16.xpose.msra.mxu0 %v5093_v0  ;;  %5192 = vmatpush3.bf16.xpose.msk.msra.mxu1 %vm6152_vm1, %v5187_v56  ;;  %v6240_v2 = vsub.f32 %v5985_v58, %v6104_v20  ;;  %v6244_v0 = vsub.f32 %v6007_v19, %v6104_v20 }
 0x141   : > { %8575 = vst [vmem:[#allocation124_spill] sm:$0xff] %v6232_v43  ;;  %v6250_v29 = vsub.f32 %v6001_v26, %v6104_v20  ;;  %v6254_v18 = vsub.f32 %v6019_v5, %v6104_v20  ;;  %v6258_v15 = vsub.f32 %v6013_v63, %v6104_v20  ;;  %v6266_v56 = vsub.f32 %v6031_v11, %v6104_v20  ;;  %v8586_v5 = vld [vmem:[#allocation73_spill] sm:$0xff] }
 0x142   : > { %8576 = vst [vmem:[#allocation125_spill] sm:$0xff] %v6240_v2  ;;  %8577 = vst [vmem:[#allocation126_spill] sm:$0xff] %v6244_v0  ;;  %v6270_v26 = vsub.f32 %v6025_v52, %v6104_v20  ;;  %v6280_v24 = vsub.f32 %v6043_v62, %v6104_v20  ;;  %v6288_v19 = vsub.f32 %v6037_v25, %v6104_v20  ;;  %v8612_v0 = vld [vmem:[#allocation72_spill] sm:$0xff]  ;;  %v8615_v2 = vld [vmem:[#allocation94_spill] sm:$0xff] }
 0x143   : > { %8578 = vst [vmem:[#allocation127_spill] sm:$0xff] %v6250_v29  ;;  %8579 = vst [vmem:[#allocation128_spill] sm:$0xff] %v6254_v18  ;;  %v6292_v63 = vsub.f32 %v6057_v6, %v6104_v20  ;;  %v6296_v58 = vsub.f32 %v5826_v54, %v6224_v50  ;;  %v6300_v62 = vsub.f32 %v8586_v5, %v6224_v50  ;;  %v8594_v5 = vld [vmem:[#allocation48_spill] sm:$0xff] }
 0x144   : > { %8580 = vst [vmem:[#allocation129_spill] sm:$0xff] %v6258_v15  ;;  %8581 = vst [vmem:[#allocation130_spill] sm:$0xff] %v6266_v56  ;;  %v6306_v52 = vsub.f32 %v6049_v21, %v6104_v20  ;;  %v6310_v6 = vsub.f32 %v8588_v40, %v6224_v50  ;;  %v6314_v54 = vsub.f32 %v8589_v3, %v6224_v50  ;;  %v8590_v21 = vld [vmem:[#allocation36_spill] sm:$0xff] }
 0x145   : > { %8582 = vst [vmem:[#allocation131_spill] sm:$0xff] %v6270_v26  ;;  %8583 = vst [vmem:[#allocation132_spill] sm:$0xff] %v6280_v24  ;;  %v6324_v4 = vsub.f32 %v8590_v21, %v6224_v50  ;;  %v6328_v40 = vsub.f32 %v8591_v9, %v6224_v50  ;;  %v6334_v24 = vsub.f32 %v8592_v7, %v6224_v50  ;;  %v8597_v21 = vld [vmem:[#allocation55_spill] sm:$0xff]  ;;  %v8598_v9 = vld [vmem:[#allocation68_spill] sm:$0xff] }
 0x146   : > { %8584 = vst [vmem:[#allocation133_spill] sm:$0xff] %v6288_v19  ;;  %8585 = vst [vmem:[#allocation134_spill] sm:$0xff] %v6292_v63  ;;  %v708_v25 = vpop.xlane.xlu1 %707  ;;  %v6338_v8 = vsub.f32 %v8594_v5, %v6224_v50  ;;  %v6346_v63 = vsub.f32 %v8597_v21, %v6224_v50  ;;  %v8599_v7 = vld [vmem:[#allocation67_spill] sm:$0xff]  ;;  %v6400_v18 = vsub.f32 %v8608_v10, %v6224_v50  ;;  %v8611_v10 = vld [vmem:[#allocation90_spill] sm:$0xff] }
 0x147   : > { %8587 = vst [vmem:[#allocation135_spill] sm:$0xff] %v6306_v52  ;;  %v6320_v11 = vmul.f32 0.00031887754, %v708_v25  ;;  %8593 = vst [vmem:[#allocation136_spill] sm:$0xff] %v6334_v24  ;;  %v8595_v25 = vld [vmem:[#allocation44_spill] sm:$0xff]  ;;  %v8602_v19 = vld [vmem:[#allocation59_spill] sm:$0xff]  ;;  %v6404_v29 = vsub.f32 %v8609_v45, %v6224_v50  ;;  %v6428_v37 = vsub.f32 %v8612_v0, %v6224_v50 }
 0x148   : > { %v6342_v59 = vsub.f32 %v8595_v25, %v6224_v50  ;;  %v6362_v25 = vsub.f32 %v8600_v44, %v6104_v20  ;;  %v8601_v52 = vld [vmem:[#allocation52_spill] sm:$0xff]  ;;  %v8604_v26 = vld [vmem:[#allocation63_spill] sm:$0xff] }
 0x149   : > { %v6350_v46 = vsub.f32 %v8598_v9, %v6320_v11  ;;  %v6354_v3 = vsub.f32 %v6088_v17, %v6320_v11  ;;  %v6358_v5 = vsub.f32 %v8599_v7, %v6320_v11  ;;  %v6366_v21 = vsub.f32 %v8601_v52, %v6224_v50  ;;  %v8605_v52 = vld [vmem:[#allocation50_spill] sm:$0xff]  ;;  %v8614_v0 = vld [vmem:[#allocation96_spill] sm:$0xff] }
 0x14a   : > { %8596 = vst [vmem:[#allocation137_spill] sm:$0xff] %v6342_v59  ;;  %v6370_v9 = vsub.f32 %v8602_v19, %v6224_v50  ;;  %v6374_v17 = vsub.f32 %v8603_v22, %v6224_v50  ;;  %v6378_v7 = vsub.f32 %v8604_v26, %v6224_v50  ;;  %v6386_v56 = vsub.f32 %v8605_v52, %v6104_v20  ;;  %v8606_v19 = vld [vmem:[#allocation61_spill] sm:$0xff] }
 0x14b   : > { %v5095_v44 = vpack.c.bf16 %v6350_v46, %v6296_v58  ;;  %v5193_v32 = vpack.c.bf16 %v6354_v3, %v6300_v62  ;;  %v6390_v13 = vsub.f32 %v8606_v19, %v6224_v50  ;;  %v5097_v22 = vpack.c.bf16 %v6358_v5, %v6310_v6  ;;  %v8607_v26 = vld [vmem:[#allocation69_spill] sm:$0xff] }
 0x14c   : > { %v6396_v15 = vsub.f32 %v8607_v26, %v6224_v50  ;;  %v5099_v19 = vpack.c.bf16 %v6362_v25, %v6112_v1  ;;  %v5199_v52 = vpack.c.bf16 %v6104_v20, %v6097_v55  ;;  %v8610_v26 = vld [vmem:[#allocation86_spill] sm:$0xff]  ;;  %v6424_v45 = vsub.f32 %v8611_v10, %v6320_v11 }
 0x14d   : > { %5096 = vmatprep.subr.bf16.mxu0 %v5095_v44  ;;  %5195 = vmatprep.subr.msk.bf16.mxu1 %vm6152_vm1, %v5193_v32  ;;  %v6414_v34 = vsub.f32 %v8610_v26, %v6320_v11  ;;  %v6420_v44 = vsub.f32 %v6034_v41, %v6320_v11  ;;  %v6448_v61 = vsub.f32 %v8615_v2, %v6320_v11  ;;  %v8617_v26 = vld [vmem:[#allocation98_spill] sm:$0xff] }
 0x14e   : > { %5098 = vmatpush1.bf16.xpose.msra.mxu0 %v5097_v22  ;;  %5198 = vmatpush3.bf16.xpose.msk.msra.mxu1 %vm6152_vm1, %v5193_v32  ;;  %v5101_v22 = vpack.c.bf16 %v6386_v56, %v6116_v23  ;;  %v6434_v32 = vsub.f32 %v8613_v33, %v6320_v11  ;;  %v8616_v33 = vld [vmem:[#allocation101_spill] sm:$0xff]  ;;  %v6456_v27 = vsub.f32 %v8617_v26, %v6320_v11  ;;  %v8618_v26 = vld [vmem:[#allocation104_spill] sm:$0xff] }
 0x14f   : > { %5100 = vmatprep.subr.bf16.mxu0 %v5099_v19  ;;  %5200 = vmatprep.subr.bf16.mxu1 %v5199_v52  ;;  %v6444_v19 = vsub.f32 %v8614_v0, %v6320_v11  ;;  %v6452_v43 = vsub.f32 %v8616_v33, %v6320_v11  ;;  %v6460_v10 = vsub.f32 %v6070_v48, %v6320_v11 }
 0x150   : > { %v6464_v41 = vsub.f32 %v6064_v49, %v6320_v11  ;;  %v6472_v33 = vsub.f32 %v6076_v35, %v6320_v11  ;;  %v6476_v24 = vsub.f32 %v8618_v26, %v6320_v11  ;;  %v6492_v26 = vsub.f32 %v6082_v47, %v6320_v11 }
 0x151   : > { %v6496_v48 = vsub.f32 %v6079_v30, %v6320_v11  ;;  %v5203_v0 = vpack.c.bf16 %v6320_v11, %v6224_v50  ;;  %v6505_v35 = vsub.f32 %v6090_v16, %v6320_v11  ;;  %v6509_v59 = vsub.f32 %v6085_v53, %v6320_v11  ;;  %v8624_v53 = vld [vmem:[#allocation30_spill] sm:$0xff] }
 0x155   : > { %894 = vmatmul.mubr.f32.vlgmr.msra.gmra.mrb[0].mxu0 %v6108_v31  ;;  %5008 = vmatmul.mubr.msk.f32.vlgmr.msra.gmra.mrb[0].mxu1 %vm623_vm0, %v6140_v38  ;;  %v5103_v31 = vpack.c.bf16 %v6434_v32, %v6314_v54  ;;  %v8620_v38 = vld [vmem:[#allocation71_spill] sm:$0xff] }
 0x156   : > { %898 = vmatprep.mubr.f32.mxu0 %v6136_v14  ;;  %5102 = vmatpush1.bf16.xpose.msra.mxu0 %v5101_v22  ;;  %v8619_v22 = vld [vmem:[#allocation24_spill] sm:$0xff]  ;;  %v794_v47 = vsub.f32 %v8620_v38, %v6320_v11  ;;  %v8634_v38 = vld [vmem:[#allocation17_spill] sm:$0xff] }
 0x157   : > { %5010 = vmatprep.mubr.msk.f32.mxu1 %vm623_vm0, %v6300_v62  ;;  %5202 = vmatpush3.bf16.msra.mxu1 %v5199_v52  ;;  %v769_v30 = vsub.f32 %v8619_v22, %v6224_v50  ;;  %v8621_v62 = vld [vmem:[#allocation58_spill] sm:$0xff]  ;;  %v723_v22 = vsub.f32 %v8634_v38, %v6097_v55 }
 0x158   : > { %5104 = vmatprep.subr.bf16.mxu0 %v5103_v31  ;;  %5204 = vmatprep.subr.bf16.mxu1 %v5203_v0  ;;  %v747_v52 = vsub.f32 %v8621_v62, %v6104_v20  ;;  %v8622_v31 = vld [vmem:[#allocation16_spill] sm:$0xff] }
 0x159   : > { %899 = vmatmul.mubr.f32.gmra.mrb[2].mxu0 %v6144_v36  ;;  %5011 = vmatmul.mubr.msk.f32.gmra.mrb[2].mxu1 %vm623_vm0, %v6354_v3  ;;  %v722_v14 = vsub.f32 %v8622_v31, %v6097_v55  ;;  %v5105_v49 = vpack.c.bf16 %v794_v47, %v769_v30  ;;  %v8623_v36 = vld [vmem:[#allocation56_spill] sm:$0xff] }
 0x15a   : > { %903 = vmatprep.mubr.f32.mxu0 %v6296_v58  ;;  %v746_v3 = vsub.f32 %v8623_v36, %v6104_v20  ;;  %v772_v58 = vsub.f32 %v8624_v53, %v6224_v50 }
 0x15b   : > { %5206 = vmatpush3.bf16.msra.mxu1 %v5203_v0  ;;  %v5107_v2 = vpack.c.bf16 %v747_v52, %v722_v14  ;;  %v8625_v0 = vld [vmem:[#allocation80_spill] sm:$0xff] }
 0x15c   : > { %v797_v16 = vsub.f32 %v8625_v0, %v6320_v11 }
 0x15d   : > { %904 = vmatmul.mubr.f32.gmra.mrb[4].mxu0 %v6310_v6  ;;  %v8626_v6 = vld [vmem:[#allocation15_spill] sm:$0xff] }
 0x15e   : > { %908 = vmatprep.mubr.f32.mxu0 %v6350_v46  ;;  %5106 = vmatpush1.bf16.xpose.msra.mxu0 %v5105_v49  ;;  %v721_v62 = vsub.f32 %v8626_v6, %v6097_v55  ;;  %v5111_v49 = vpack.c.bf16 %v797_v16, %v772_v58 }
 0x15f   : > { %5108 = vmatprep.subr.bf16.mxu0 %v5107_v2  ;;  %v8628_v2 = vld [vmem:[#allocation78_spill] sm:$0xff] }
 0x160   : > { %v5109_v31 = vpack.c.bf16 %v746_v3, %v721_v62  ;;  %v796_v53 = vsub.f32 %v8628_v2, %v6320_v11 }
 0x161   : > { %909 = vmatmul.mubr.f32.gmra.mrb[6].mxu0 %v6358_v5  ;;  %v8627_v5 = vld [vmem:[#allocation28_spill] sm:$0xff] }
 0x162   : > { %978 = vmatprep.mubr.f32.mxu0 %v6112_v1  ;;  %v771_v46 = vsub.f32 %v8627_v5, %v6224_v50  ;;  %v8629_v1 = vld [vmem:[#allocation62_spill] sm:$0xff]  ;;  %v8633_v5 = vld [vmem:[#allocation84_spill] sm:$0xff] }
 0x163   : > { %v749_v0 = vsub.f32 %v8629_v1, %v6104_v20 }
 0x164   : > { %v5113_v6 = vpack.c.bf16 %v796_v53, %v771_v46 }
 0x165   : > { %979 = vmatmul.mubr.f32.vlgmr.msra.gmra.mrb[0].mxu0 %v6116_v23  ;;  %v8630_v23 = vld [vmem:[#allocation18_spill] sm:$0xff] }
 0x166   : > { %983 = vmatprep.mubr.f32.mxu0 %v6362_v25  ;;  %5110 = vmatpush1.bf16.xpose.msra.mxu0 %v5109_v31  ;;  %v724_v36 = vsub.f32 %v8630_v23, %v6097_v55  ;;  %v8631_v31 = vld [vmem:[#allocation60_spill] sm:$0xff]  ;;  %v8637_v55 = vpack.c.bf16 %v6200_v42, %v6120_v60 }
 0x167   : > { %5112 = vmatprep.subr.bf16.mxu0 %v5111_v49  ;;  %v748_v49 = vsub.f32 %v8631_v31, %v6104_v20 }
 0x168   : > { %v5115_v25 = vpack.c.bf16 %v749_v0, %v724_v36 }
 0x169   : > { %984 = vmatmul.mubr.f32.gmra.mrb[2].mxu0 %v6386_v56  ;;  %v8632_v56 = vld [vmem:[#allocation34_spill] sm:$0xff] }
 0x16a   : > { %988 = vmatprep.mubr.f32.mxu0 %v6314_v54  ;;  %v774_v2 = vsub.f32 %v8632_v56, %v6224_v50  ;;  %v799_v54 = vsub.f32 %v8633_v5, %v6320_v11 }
 0x16c   : > { %v5119_v1 = vpack.c.bf16 %v799_v54, %v774_v2 }
 0x16d   : > { %989 = vmatmul.mubr.f32.gmra.mrb[4].mxu0 %v769_v30  ;;  %v5117_v30 = vpack.c.bf16 %v748_v49, %v723_v22 }
 0x16e   : > { %993 = vmatprep.mubr.f32.mxu0 %v6434_v32  ;;  %5114 = vmatpush1.bf16.xpose.msra.mxu0 %v5113_v6  ;;  %v8635_v32 = vld [vmem:[#allocation32_spill] sm:$0xff] }
 0x16f   : > { %5116 = vmatprep.subr.bf16.mxu0 %v5115_v25  ;;  %v773_v20 = vsub.f32 %v8635_v32, %v6224_v50 }
 0x171   : > { %994 = vmatmul.mubr.f32.gmra.mrb[6].mxu0 %v794_v47  ;;  %v8636_v47 = vld [vmem:[#allocation82_spill] sm:$0xff] }
 0x172   : > { %1063 = vmatprep.mubr.f32.mxu0 %v722_v14  ;;  %v798_v6 = vsub.f32 %v8636_v47, %v6320_v11  ;;  %v8638_v14 = vld [vmem:[#allocation38_spill] sm:$0xff] }
 0x174   : > { %v5121_v25 = vpack.c.bf16 %v798_v6, %v773_v20 }
 0x175   : > { %1064 = vmatmul.mubr.f32.vlgmr.msra.gmra.mrb[0].mxu0 %v721_v62  ;;  %v776_v62 = vsub.f32 %v8638_v14, %v6224_v50  ;;  %v8642_v50 = vpack.c.bf16 %v6214_v12, %v6128_v28 }
 0x176   : > { %1068 = vmatprep.mubr.f32.mxu0 %v747_v52  ;;  %5118 = vmatpush1.bf16.xpose.msra.mxu0 %v5117_v30  ;;  %v8639_v52 = vld [vmem:[#allocation88_spill] sm:$0xff] }
 0x177   : > { %5120 = vmatprep.subr.bf16.mxu0 %v5119_v1  ;;  %v801_v1 = vsub.f32 %v8639_v52, %v6320_v11  ;;  %v8643_v11 = vld [vmem:[#allocation111_spill] sm:$0xff] }
 0x179   : > { %1069 = vmatmul.mubr.f32.gmra.mrb[2].mxu0 %v746_v3  ;;  %v5127_v30 = vpack.c.bf16 %v801_v1, %v776_v62  ;;  %v8640_v3 = vpack.c.bf16 %v6204_v51, %v6124_v57 }
 0x17a   : > { %1073 = vmatprep.mubr.f32.mxu0 %v772_v58 }
 0x17d   : > { %1074 = vmatmul.mubr.f32.gmra.mrb[4].mxu0 %v771_v46  ;;  %v8654_v46 = vpack.c.bf16 %v6444_v19, %v6338_v8 }
 0x17e   : > { %1078 = vmatprep.mubr.f32.mxu0 %v797_v16  ;;  %5122 = vmatpush1.bf16.xpose.msra.mxu0 %v5121_v25  ;;  %v8644_v16 = vpack.c.bf16 %v6218_v39, %v8643_v11  ;;  %v8665_v25 = vld [vmem:[#allocation128_spill] sm:$0xff] }
 0x17f   : > { %5124 = vmatprep.subr.bf16.mxu0 %v8637_v55  ;;  %v8666_v55 = vld [vmem:[#allocation116_spill] sm:$0xff] }
 0x181   : > { %1079 = vmatmul.mubr.f32.gmra.mrb[6].mxu0 %v796_v53  ;;  %v8641_v53 = vpack.c.bf16 %v6414_v34, %v6324_v4 }
 0x182   : > { %1148 = vmatprep.mubr.f32.mxu0 %v724_v36  ;;  %v8649_v36 = vld [vmem:[#allocation112_spill] sm:$0xff] }
 0x185   : > { %1149 = vmatmul.mubr.f32.vlgmr.msra.gmra.mrb[0].mxu0 %v723_v22  ;;  %v8645_v22 = vpack.c.bf16 %v6420_v44, %v6328_v40 }
 0x186   : > { %1153 = vmatprep.mubr.f32.mxu0 %v749_v0  ;;  %5126 = vmatpush1.bf16.xpose.msra.mxu0 %v8640_v3  ;;  %v8652_v0 = vld [vmem:[#allocation113_spill] sm:$0xff]  ;;  %v8673_v3 = vld [vmem:[#allocation130_spill] sm:$0xff] }
 0x187   : > { %5128 = vmatprep.subr.bf16.mxu0 %v5127_v30 }
 0x189   : > { %1154 = vmatmul.mubr.f32.gmra.mrb[2].mxu0 %v748_v49 }
 0x18a   : > { %1158 = vmatprep.mubr.f32.mxu0 %v774_v2  ;;  %v8658_v2 = vld [vmem:[#allocation114_spill] sm:$0xff] }
 0x18d   : > { %1159 = vmatmul.mubr.f32.gmra.mrb[4].mxu0 %v773_v20  ;;  %v8663_v20 = vpack.c.bf16 %v6452_v43, %v6346_v63 }
 0x18e   : > { %1163 = vmatprep.mubr.f32.mxu0 %v799_v54  ;;  %5130 = vmatpush1.bf16.xpose.msra.mxu0 %v8641_v53  ;;  %v8674_v53 = vld [vmem:[#allocation118_spill] sm:$0xff] }
 0x18f   : > { %5132 = vmatprep.subr.bf16.mxu0 %v8642_v50  ;;  %v8675_v50 = vpack.c.bf16 %v8673_v3, %v8674_v53 }
 0x191   : > { %1164 = vmatmul.mubr.f32.gmra.mrb[6].mxu0 %v798_v6  ;;  %v8664_v6 = vpack.c.bf16 %v6456_v27, %v6366_v21 }
 0x192   : > { %1233 = vmatprep.mubr.f32.mxu0 %v6120_v60  ;;  %v8646_v60 = vld [vmem:[#allocation136_spill] sm:$0xff] }
 0x195   : > { %1234 = vmatmul.mubr.f32.vlgmr.msra.gmra.mrb[0].mxu0 %v6124_v57  ;;  %v8647_v57 = vpack.c.bf16 %v6424_v45, %v8646_v60 }
 0x196   : > { %1238 = vmatprep.mubr.f32.mxu0 %v6200_v42  ;;  %5134 = vmatpush1.bf16.xpose.msra.mxu0 %v8644_v16  ;;  %v8648_v42 = vld [vmem:[#allocation124_spill] sm:$0xff] }
 0x197   : > { %5136 = vmatprep.subr.bf16.mxu0 %v8645_v22  ;;  %v8650_v58 = vpack.c.bf16 %v8648_v42, %v8649_v36  ;;  %v8681_v16 = vld [vmem:[#allocation132_spill] sm:$0xff] }
 0x198   : > { %v8682_v22 = vld [vmem:[#allocation120_spill] sm:$0xff] }
 0x199   : > { %1239 = vmatmul.mubr.f32.gmra.mrb[2].mxu0 %v6204_v51  ;;  %v8651_v51 = vld [vmem:[#allocation125_spill] sm:$0xff] }
 0x19a   : > { %1243 = vmatprep.mubr.f32.mxu0 %v776_v62  ;;  %v8667_v62 = vpack.c.bf16 %v8665_v25, %v8666_v55 }
 0x19d   : > { %1244 = vmatmul.mubr.f32.gmra.mrb[4].mxu0 %v6324_v4  ;;  %v8653_v4 = vpack.c.bf16 %v8651_v51, %v8652_v0 }
 0x19e   : > { %1248 = vmatprep.mubr.f32.mxu0 %v801_v1  ;;  %5138 = vmatpush1.bf16.xpose.msra.mxu0 %v8647_v57  ;;  %v8669_v1 = vld [vmem:[#allocation117_spill] sm:$0xff] }
 0x19f   : > { %5140 = vmatprep.subr.bf16.mxu0 %v8650_v58 }
 0x1a1   : > { %1249 = vmatmul.mubr.f32.gmra.mrb[6].mxu0 %v6414_v34  ;;  %v8655_v34 = vld [vmem:[#allocation137_spill] sm:$0xff] }
 0x1a2   : > { %1318 = vmatprep.mubr.f32.mxu0 %v6128_v28  ;;  %v8656_v28 = vpack.c.bf16 %v6448_v61, %v8655_v34 }
 0x1a5   : > { %1319 = vmatmul.mubr.f32.vlgmr.msra.gmra.mrb[0].mxu0 %v8643_v11 }
 0x1a6   : > { %1323 = vmatprep.mubr.f32.mxu0 %v6214_v12  ;;  %5142 = vmatpush1.bf16.xpose.msra.mxu0 %v8653_v4  ;;  %v8657_v12 = vld [vmem:[#allocation126_spill] sm:$0xff] }
 0x1a7   : > { %5144 = vmatprep.subr.bf16.mxu0 %v8654_v46  ;;  %v8659_v49 = vpack.c.bf16 %v8657_v12, %v8658_v2  ;;  %v6755_v4 = vld [vmem:[%s6635_s26 + $0x18] sm:$0xff]  ;;  %v6782_v46 = vld [vmem:[%s6635_s26 + $0x40] sm:$0xff] }
 0x1a9   : > { %1324 = vmatmul.mubr.f32.gmra.mrb[2].mxu0 %v6218_v39  ;;  %v6639_v39 = vld [vmem:[%s6635_s26] sm:$0xff] }
 0x1aa   : > { %1328 = vmatprep.mubr.f32.mxu0 %v6328_v40  ;;  %v6642_v40 = vld [vmem:[%s6635_s26 + $0x8] sm:$0xff]  ;;  %5021 = vmatprep.mubr.msk.f32.mxu1 %vm1950_vm2, %v6639_v39 }
 0x1ab   : > { %5022 = vmatmul.mubr.msk.f32.vlgmr.msra.gmra.mrb[4].mxu1 %vm1950_vm2, %v6642_v40 }
 0x1ad   : > { %1329 = vmatmul.mubr.f32.gmra.mrb[4].mxu0 %v8646_v60  ;;  %v8683_v60 = vpack.c.bf16 %v8681_v16, %v8682_v22 }
 0x1ae   : > { %1333 = vmatprep.mubr.f32.mxu0 %v6420_v44  ;;  %5146 = vmatpush1.bf16.xpose.msra.mxu0 %v8656_v28  ;;  %v8661_v44 = vld [vmem:[#allocation115_spill] sm:$0xff]  ;;  %v6788_v28 = vld [vmem:[%s6635_s26 + $0x50] sm:$0xff] }
 0x1af   : > { %5148 = vmatprep.subr.bf16.mxu0 %v8659_v49 }
 0x1b1   : > { %1334 = vmatmul.mubr.f32.gmra.mrb[6].mxu0 %v6424_v45  ;;  %v8660_v45 = vld [vmem:[#allocation127_spill] sm:$0xff] }
 0x1b2   : > { %1403 = vmatprep.mubr.f32.mxu0 %v8649_v36  ;;  %v8662_v54 = vpack.c.bf16 %v8660_v45, %v8661_v44  ;;  %v8690_v36 = vld [vmem:[#allocation122_spill] sm:$0xff] }
 0x1b5   : > { %1404 = vmatmul.mubr.f32.vlgmr.msra.gmra.mrb[0].mxu0 %v8652_v0  ;;  %v6752_v0 = vld [vmem:[%s6635_s26 + $0x10] sm:$0xff] }
 0x1b6   : > { %1408 = vmatprep.mubr.f32.mxu0 %v8648_v42  ;;  %5150 = vmatpush1.bf16.xpose.msra.mxu0 %v8662_v54  ;;  %v8689_v42 = vld [vmem:[#allocation134_spill] sm:$0xff] }
 0x1b7   : > { %5152 = vmatprep.subr.bf16.mxu0 %v8663_v20  ;;  %v8691_v58 = vpack.c.bf16 %v8689_v42, %v8690_v36  ;;  %5024 = vmatprep.mubr.msk.f32.mxu1 %vm1950_vm2, %v6752_v0 }
 0x1b8   : > { %5025 = vmatmul.mubr.msk.f32.gmra.mrb[6].mxu1 %vm1950_vm2, %v6755_v4 }
 0x1b9   : > { %1409 = vmatmul.mubr.f32.gmra.mrb[2].mxu0 %v8651_v51 }
 0x1ba   : > { %1413 = vmatprep.mubr.f32.mxu0 %v6338_v8  ;;  %v8668_v8 = vld [vmem:[#allocation129_spill] sm:$0xff] }
 0x1bb   : > { %v8670_v30 = vpack.c.bf16 %v8668_v8, %v8669_v1 }
 0x1bd   : > { %1414 = vmatmul.mubr.f32.gmra.mrb[4].mxu0 %v8655_v34  ;;  %v6785_v34 = vld [vmem:[%s6635_s26 + $0x48] sm:$0xff] }
 0x1be   : > { %1418 = vmatprep.mubr.f32.mxu0 %v6444_v19  ;;  %5154 = vmatpush1.bf16.xpose.msra.mxu0 %v8664_v6  ;;  %v8671_v19 = vpack.c.bf16 %v6460_v10, %v6370_v9 }
 0x1bf   : > { %5156 = vmatprep.subr.bf16.mxu0 %v8667_v62 }
 0x1c1   : > { %1419 = vmatmul.mubr.f32.gmra.mrb[6].mxu0 %v6448_v61  ;;  %v8672_v61 = vpack.c.bf16 %v6464_v41, %v6374_v17 }
 0x1c2   : > { %1488 = vmatprep.mubr.f32.mxu0 %v8658_v2 }
 0x1c5   : > { %1489 = vmatmul.mubr.f32.vlgmr.msra.gmra.mrb[0].mxu0 %v8661_v44 }
 0x1c6   : > { %1493 = vmatprep.mubr.f32.mxu0 %v8657_v12  ;;  %5158 = vmatpush1.bf16.xpose.msra.mxu0 %v8670_v30  ;;  %v6797_v12 = vld [vmem:[%s6635_s26 + $0x58] sm:$0xff] }
 0x1c7   : > { %5160 = vmatprep.subr.bf16.mxu0 %v8671_v19 }
 0x1c9   : > { %1494 = vmatmul.mubr.f32.gmra.mrb[2].mxu0 %v8660_v45 }
 0x1ca   : > { %1498 = vmatprep.mubr.f32.mxu0 %v6346_v63  ;;  %v8676_v63 = vld [vmem:[#allocation131_spill] sm:$0xff] }
 0x1cd   : > { %1499 = vmatmul.mubr.f32.gmra.mrb[4].mxu0 %v6366_v21  ;;  %v8677_v21 = vld [vmem:[#allocation119_spill] sm:$0xff] }
 0x1ce   : > { %1503 = vmatprep.mubr.f32.mxu0 %v6452_v43  ;;  %5162 = vmatpush1.bf16.xpose.msra.mxu0 %v8672_v61  ;;  %v8678_v11 = vpack.c.bf16 %v8676_v63, %v8677_v21  ;;  %v8679_v43 = vpack.c.bf16 %v6472_v33, %v6378_v7 }
 0x1cf   : > { %5164 = vmatprep.subr.bf16.mxu0 %v8675_v50 }
 0x1d1   : > { %1504 = vmatmul.mubr.f32.gmra.mrb[6].mxu0 %v6456_v27  ;;  %v8680_v27 = vpack.c.bf16 %v6476_v24, %v6390_v13 }
 0x1d2   : > { %1573 = vmatprep.mubr.f32.mxu0 %v8666_v55 }
 0x1d5   : > { %1574 = vmatmul.mubr.f32.vlgmr.msra.gmra.mrb[0].mxu0 %v8669_v1 }
 0x1d6   : > { %1578 = vmatprep.mubr.f32.mxu0 %v8665_v25  ;;  %5166 = vmatpush1.bf16.xpose.msra.mxu0 %v8678_v11 }
 0x1d7   : > { %5168 = vmatprep.subr.bf16.mxu0 %v8679_v43 }
 0x1d9   : > { %1579 = vmatmul.mubr.f32.gmra.mrb[2].mxu0 %v8668_v8 }
 0x1da   : > { %1583 = vmatprep.mubr.f32.mxu0 %v6370_v9  ;;  %v8684_v9 = vld [vmem:[#allocation133_spill] sm:$0xff] }
 0x1dd   : > { %1584 = vmatmul.mubr.f32.gmra.mrb[4].mxu0 %v6374_v17  ;;  %v8685_v17 = vld [vmem:[#allocation121_spill] sm:$0xff] }
 0x1de   : > { %1588 = vmatprep.mubr.f32.mxu0 %v6460_v10  ;;  %5170 = vmatpush1.bf16.xpose.msra.mxu0 %v8680_v27  ;;  %v8686_v57 = vpack.c.bf16 %v8684_v9, %v8685_v17  ;;  %v8687_v10 = vpack.c.bf16 %v6492_v26, %v6396_v15 }
 0x1df   : > { %5172 = vmatprep.subr.bf16.mxu0 %v8683_v60 }
 0x1e1   : > { %1589 = vmatmul.mubr.f32.gmra.mrb[6].mxu0 %v6464_v41  ;;  %v8688_v41 = vpack.c.bf16 %v6496_v48, %v6400_v18 }
 0x1e2   : > { %1658 = vmatprep.mubr.f32.mxu0 %v8674_v53 }
 0x1e5   : > { %1659 = vmatmul.mubr.f32.vlgmr.msra.gmra.mrb[0].mxu0 %v8677_v21 }
 0x1e6   : > { %1663 = vmatprep.mubr.f32.mxu0 %v8673_v3  ;;  %5174 = vmatpush1.bf16.xpose.msra.mxu0 %v8686_v57 }
 0x1e7   : > { %5176 = vmatprep.subr.bf16.mxu0 %v8687_v10 }
 0x1e9   : > { %1664 = vmatmul.mubr.f32.gmra.mrb[2].mxu0 %v8676_v63 }
 0x1ea   : > { %1668 = vmatprep.mubr.f32.mxu0 %v6378_v7  ;;  %v8692_v7 = vld [vmem:[#allocation135_spill] sm:$0xff] }
 0x1ed   : > { %1669 = vmatmul.mubr.f32.gmra.mrb[4].mxu0 %v6390_v13  ;;  %v8693_v13 = vld [vmem:[#allocation123_spill] sm:$0xff] }
 0x1ee   : > { %1673 = vmatprep.mubr.f32.mxu0 %v6472_v33  ;;  %5178 = vmatpush1.bf16.xpose.msra.mxu0 %v8688_v41  ;;  %v8694_v51 = vpack.c.bf16 %v8692_v7, %v8693_v13  ;;  %v8695_v33 = vpack.c.bf16 %v6505_v35, %v6404_v29 }
 0x1ef   : > { %5180 = vmatprep.subr.bf16.mxu0 %v8691_v58 }
 0x1f1   : > { %1674 = vmatmul.mubr.f32.gmra.mrb[6].mxu0 %v6476_v24  ;;  %v8696_v24 = vpack.c.bf16 %v6509_v59, %v6428_v37 }
 0x1f2   : > { %1743 = vmatprep.mubr.f32.mxu0 %v8682_v22 }
 0x1f5   : > { %1744 = vmatmul.mubr.f32.vlgmr.msra.gmra.mrb[0].mxu0 %v8685_v17 }
 0x1f6   : > { %1748 = vmatprep.mubr.f32.mxu0 %v8681_v16  ;;  %5182 = vmatpush1.bf16.xpose.msra.mxu0 %v8694_v51 }
 0x1f7   : > { %5184 = vmatprep.subr.bf16.mxu0 %v8695_v33 }
 0x1f9   : > { %1749 = vmatmul.mubr.f32.gmra.mrb[2].mxu0 %v8684_v9 }
 0x1fa   : > { %1753 = vmatprep.mubr.f32.mxu0 %v6396_v15 }
 0x1fd   : > { %1754 = vmatmul.mubr.f32.gmra.mrb[4].mxu0 %v6400_v18 }
 0x1fe   : > { %1758 = vmatprep.mubr.f32.mxu0 %v6492_v26  ;;  %5186 = vmatpush1.bf16.xpose.msra.mxu0 %v8696_v24 }
 0x201   : > { %1759 = vmatmul.mubr.f32.gmra.mrb[6].mxu0 %v6496_v48 }
 0x202   : > { %1828 = vmatprep.mubr.f32.mxu0 %v8690_v36 }
 0x205   : > { %1829 = vmatmul.mubr.f32.vlgmr.msra.gmra.mrb[0].mxu0 %v8693_v13 }
 0x206   : > { %1833 = vmatprep.mubr.f32.mxu0 %v8689_v42 }
 0x209   : > { %1834 = vmatmul.mubr.f32.gmra.mrb[2].mxu0 %v8692_v7 }
 0x20a   : > { %1838 = vmatprep.mubr.f32.mxu0 %v6404_v29  ;;  %v6772_v29 = vld [vmem:[%s6635_s26 + $0x30] sm:$0xff] }
 0x20d   : > { %1839 = vmatmul.mubr.f32.gmra.mrb[4].mxu0 %v6428_v37  ;;  %v6762_v37 = vld [vmem:[%s6635_s26 + $0x20] sm:$0xff] }
 0x20e   : > { %1843 = vmatprep.mubr.f32.mxu0 %v6505_v35  ;;  %5027 = vmatprep.mubr.msk.f32.mxu1 %vm1950_vm2, %v6762_v37  ;;  %v6777_v35 = vld [vmem:[%s6635_s26 + $0x38] sm:$0xff] }
 0x211   : > { %1844 = vmatmul.mubr.f32.gmra.mrb[6].mxu0 %v6509_v59  ;;  %v6765_v59 = vld [vmem:[%s6635_s26 + $0x28] sm:$0xff]  ;;  %s5640_s26 = smov [#allocation7]  }
 0x212   : > { %5028 = vmatmul.mubr.msk.f32.gmra.mrb[8].mxu1 %vm1950_vm2, %v6765_v59  ;;  %s5566_s9 = sshll.u32 %s5640_s26, 4  ;;  %s5567_s9 = int_to_ptr.vmem [resolvable:$false] %s5566_s9 }
 0x213   : > { %5030 = vmatprep.mubr.msk.f32.mxu1 %vm1950_vm2, %v6772_v29  ;;  %s5568_s11 = scalar_lea.vmem %s5567_s9, 76800  ;;  %p5569_p4 = scmp.lt.s32.totalorder %s8189_s6, %s5567_s9 }
 0x214   : > { %p5570_p7 = scmp.lt.s32.totalorder %s5568_s11, %s5562_s25 }
 0x216   : > { %5031 = vmatmul.mubr.msk.f32.gmra.mrb[10].mxu1 %vm1950_vm2, %v6777_v35  ;;  %p5571_p8 = por %p5570_p7, %p5569_p4 }
 0x217   : > { %5033 = vmatprep.mubr.msk.f32.mxu1 %vm1950_vm2, %v6782_v46 }
 0x218   : > { %p5572_p11 = pnand %p5571_p8, %p5565_p3 }
 0x21a   : > { %5034 = vmatmul.mubr.msk.f32.gmra.mrb[12].mxu1 %vm1950_vm2, %v6785_v34 }
 0x21b   : > { %5036 = vmatprep.mubr.msk.f32.mxu1 %vm1950_vm2, %v6788_v28 }
 0x21e   : > { %5037 = vmatmul.mubr.msk.f32.gmra.mrb[14].mxu1 %vm1950_vm2, %v6797_v12 }
 0x21f   : > { %5047 = vmatprep.mubr.msk.f32.mxu1 %vm1950_vm2, %v6639_v39 }
 0x228   : > { %v5009_v15 = vpop.f32.mrb[0].mxu1 }
 0x229   : > { %v1915_v18 = vpop.f32.mrb[1].mxu1 }
 0x22c   : > { %v5012_v26 = vpop.f32.mrb[2].mxu1 }
 0x22d   : > { %v1925_v48 = vpop.f32.mrb[3].mxu1 }
 0x27e   : > { %v6803_v2 = vpop.f32.mrb[4].mxu1 }
 0x27f   : > { %v6805_v49 = vpop.f32.mrb[5].mxu1 }
 0x28b   : > { %v6829_v11 = vpop.f32.mrb[6].mxu1 }
 0x28c   : > { %v6831_v43 = vpop.f32.mrb[7].mxu1 }
 0x2d8   : > { %v1830_v45 = vpop.f32.mrb[0].mxu0 }
 0x2d9   : > { %v1916_v44 = vadd.f32 %v1915_v18, %v1830_v45  ;;  %v1832_v54 = vpop.f32.mrb[1].mxu0 }
 0x2db   : > { %v1934_v55 = vmul.f32 0.00031887754, %v1916_v44 }
 0x2dc   : > { %v1835_v20 = vpop.f32.mrb[2].mxu0 }
 0x2dd   : > { %v1921_v6 = vadd.f32 %v5009_v15, %v1835_v20  ;;  %v1837_v25 = vpop.f32.mrb[3].mxu0 }
 0x2df   : > { %v1935_v62 = vmul.f32 0.00031887754, %v1921_v6 }
 0x2e0   : > { %v1840_v8 = vpop.f32.mrb[4].mxu0 }
 0x2e1   : > { %v5207_v1 = vpack.c.bf16 %v1935_v62, %v1934_v55  ;;  %v1926_v30 = vadd.f32 %v1925_v48, %v1840_v8  ;;  %v1842_v19 = vpop.f32.mrb[5].mxu0 }
 0x2e3   : > { %5208 = vmatprep.subr.bf16.mxu1 %v5207_v1  ;;  %v1936_v50 = vmul.f32 0.00031887754, %v1926_v30 }
 0x2e4   : > { %v1845_v61 = vpop.f32.mrb[6].mxu0  ;;  %5210 = vmatpush3.bf16.msra.mxu1 %v5207_v1 }
 0x2e5   : > { %v1931_v3 = vadd.f32 %v5012_v26, %v1845_v61  ;;  %v1847_v53 = vpop.f32.mrb[7].mxu0  ;;  %v6833_v27 = vpop.f32.mrb[8].mxu1 }
 0x2e6   : > { %v6835_v16 = vpop.f32.mrb[9].mxu1 }
 0x2e7   : > { %v1937_v63 = vmul.f32 0.00031887754, %v1931_v3 }
 0x2e9   : > { %v5211_v21 = vpack.c.bf16 %v1937_v63, %v1936_v50  ;;  %v6837_v22 = vpop.f32.mrb[10].mxu1 }
 0x2ea   : > { %v6839_v60 = vpop.f32.mrb[11].mxu1 }
 0x2eb   : > { %5212 = vmatprep.subr.bf16.mxu1 %v5211_v21 }
 0x2ec   : > { %5214 = vmatpush3.bf16.msra.mxu1 %v5211_v21 }
 0x2ed   : > { %v6841_v9 = vpop.f32.mrb[12].mxu1 }
 0x2ee   : > { %v6843_v17 = vpop.f32.mrb[13].mxu1 }
 0x2ef   : > { %5048 = vmatmul.mubr.msk.f32.vlgmr.msra.gmra.mrb[16].mxu1 %vm1950_vm2, %v6642_v40 }
 0x2f0   : > { %5050 = vmatprep.mubr.msk.f32.mxu1 %vm1950_vm2, %v6752_v0 }
 0x2f1   : > { %v6845_v57 = vpop.f32.mrb[14].mxu1 }
 0x2f2   : > { %v6847_v10 = vpop.f32.mrb[15].mxu1 }
 0x2f3   : > { %5051 = vmatmul.mubr.msk.f32.gmra.mrb[18].mxu1 %vm1950_vm2, %v6755_v4 }
 0x2f4   : > { %5053 = vmatprep.mubr.msk.f32.mxu1 %vm1950_vm2, %v6762_v37 }
 0x2f7   : > { %5054 = vmatmul.mubr.msk.f32.gmra.mrb[20].mxu1 %vm1950_vm2, %v6765_v59 }
 0x2f8   : > { %5056 = vmatprep.mubr.msk.f32.mxu1 %vm1950_vm2, %v6772_v29 }
 0x2fb   : > { %5057 = vmatmul.mubr.msk.f32.gmra.mrb[22].mxu1 %vm1950_vm2, %v6777_v35 }
 0x2fc   : > { %5059 = vmatprep.mubr.msk.f32.mxu1 %vm1950_vm2, %v6782_v46 }
 0x2ff   : > { %5060 = vmatmul.mubr.msk.f32.gmra.mrb[24].mxu1 %vm1950_vm2, %v6785_v34 }
 0x300   : > { %5062 = vmatprep.mubr.msk.f32.mxu1 %vm1950_vm2, %v6788_v28 }
 0x303   : > { %5063 = vmatmul.mubr.msk.f32.gmra.mrb[26].mxu1 %vm1950_vm2, %v6797_v12 }
 0x3c2   : > { %v5049_v41 = vpop.f32.mrb[16].mxu1 }
 0x3c3   : > { %v2238_v42 = vmul.f32 %v5049_v41, %v6642_v40  ;;  %v2178_v36 = vpop.f32.mrb[17].mxu1 }
 0x3c4   : > { %v2237_v58 = vmul.f32 %v2178_v36, %v6639_v39 }
 0x3c5   : > { %v2252_v7 = vsel %vm1950_vm2, %v2238_v42, 0.0 }
 0x3c6   : > { %2253 = vadd.xlane.f32.xlu1 %v2252_v7  ;;  %v5052_v13 = vpop.f32.mrb[18].mxu1  ;;  %v2249_v51 = vsel %vm1950_vm2, %v2237_v58, 0.0 }
 0x3c7   : > { %v2240_v33 = vmul.f32 %v5052_v13, %v6755_v4  ;;  %2250 = vadd.xlane.f32.xlu0 %v2249_v51  ;;  %v2188_v24 = vpop.f32.mrb[19].mxu1  ;;  %v5638_v13 = vmov 0   ;;  %v8697_v51 = vld [vmem:[#allocation12_spill] sm:$0xff] }
 0x3c8   : > { %v2239_v15 = vmul.f32 %v2188_v24, %v6752_v0  ;;  %5481 = vset.pattern.permute.xlu1 %v5638_v13  ;;  %5480 = vset.pattern.permute.xlu0 %v5638_v13  ;;  %v2297_v13 = vld [vmem:[%s6905_s12] sm:$0xff] }
 0x3c9   : > { %v2258_v18 = vsel %vm1950_vm2, %v2240_v33, 0.0  ;;  %v8698_v33 = vld [vmem:[#allocation47_spill] sm:$0xff] }
 0x3ca   : > { %2259 = vadd.xlane.f32.xlu1 %v2258_v18  ;;  %v5055_v26 = vpop.f32.mrb[20].mxu1  ;;  %v2255_v48 = vsel %vm1950_vm2, %v2239_v15, 0.0  ;;  %v5215_v24 = vpack.c.bf16 %v8698_v33, %v8697_v51  ;;  %v8699_v15 = vld [vmem:[#allocation11_spill] sm:$0xff]  ;;  %v8700_v18 = vld [vmem:[#allocation46_spill] sm:$0xff] }
 0x3cb   : > { %v2242_v45 = vmul.f32 %v5055_v26, %v6765_v59  ;;  %2256 = vadd.xlane.f32.xlu0 %v2255_v48  ;;  %v2198_v44 = vpop.f32.mrb[21].mxu1  ;;  %v5217_v26 = vpack.c.bf16 %v8700_v18, %v8699_v15  ;;  %v8701_v48 = vld [vmem:[#allocation62_spill] sm:$0xff] }
 0x3cc   : > { %v2241_v54 = vmul.f32 %v2198_v44, %v6762_v37  ;;  %v6883_v44 = vpack.c.bf16 %v8631_v31, %v8634_v38  ;;  %5216 = vmatprep.subr.bf16.mxu1 %v5215_v24  ;;  %v6897_v38 = vpack.c.bf16 %v8636_v47, %v8635_v32 }
 0x3cd   : > { %v2264_v20 = vsel %vm1950_vm2, %v2242_v45, 0.0  ;;  %v6879_v45 = vpack.c.bf16 %v8701_v48, %v8630_v23  ;;  %5218 = vmatpush1.bf16.msra.mxu1 %v5217_v26  ;;  %v8705_v23 = vld [vmem:[#allocation67_spill] sm:$0xff] }
 0x3ce   : > { %2265 = vadd.xlane.f32.xlu1 %v2264_v20  ;;  %v5058_v6 = vpop.f32.mrb[22].mxu1  ;;  %v2261_v25 = vsel %vm1950_vm2, %v2241_v54, 0.0  ;;  %v8702_v54 = vld [vmem:[#allocation23_spill] sm:$0xff]  ;;  %v8703_v20 = vld [vmem:[#allocation68_spill] sm:$0xff] }
 0x3cf   : > { %v2244_v55 = vmul.f32 %v5058_v6, %v6777_v35  ;;  %2262 = vadd.xlane.f32.xlu0 %v2261_v25  ;;  %v2208_v62 = vpop.f32.mrb[23].mxu1  ;;  %v5219_v6 = vpack.c.bf16 %v8703_v20, %v8702_v54  ;;  %v6889_v25 = vpack.c.bf16 %v8633_v5, %v8632_v56  ;;  %5240 = vmatprep.subr.bf16.mxu0 %v6879_v45  ;;  %v2299_v20 = vld [vmem:[%s6905_s12 + $0x10] sm:$0xff] }
 0x3d0   : > { %v2243_v8 = vmul.f32 %v2208_v62, %v6772_v29  ;;  %5242 = vmatpush1.bf16.msra.mxu0 %v6883_v44 }
 0x3d1   : > { %v2270_v1 = vsel %vm1950_vm2, %v2244_v55, 0.0  ;;  %v8704_v55 = vld [vmem:[#allocation22_spill] sm:$0xff]  ;;  %5220 = vmatprep.subr.bf16.mxu1 %v5219_v6  ;;  %5244 = vmatprep.subr.bf16.mxu0 %v6889_v25 }
 0x3d2   : > { %2271 = vadd.xlane.f32.xlu1 %v2270_v1  ;;  %v5061_v30 = vpop.f32.mrb[24].mxu1  ;;  %v2267_v19 = vsel %vm1950_vm2, %v2243_v8, 0.0  ;;  %v5221_v62 = vpack.c.bf16 %v8705_v23, %v8704_v55 }
 0x3d3   : > { %v2246_v61 = vmul.f32 %v5061_v30, %v6785_v34  ;;  %2268 = vadd.xlane.f32.xlu0 %v2267_v19  ;;  %v2218_v3 = vpop.f32.mrb[25].mxu1 }
 0x3d4   : > { %v2245_v53 = vmul.f32 %v2218_v3, %v6782_v46  ;;  %5222 = vmatpush1.bf16.msra.mxu1 %v5221_v62  ;;  %5246 = vmatpush1.bf16.msra.mxu0 %v6897_v38 }
 0x3d5   : > { %v2276_v50 = vsel %vm1950_vm2, %v2246_v61, 0.0 }
 0x3d6   : > { %2277 = vadd.xlane.f32.xlu1 %v2276_v50  ;;  %v5064_v63 = vpop.f32.mrb[26].mxu1  ;;  %v2273_v21 = vsel %vm1950_vm2, %v2245_v53, 0.0 }
 0x3d7   : > { %v2248_v41 = vmul.f32 %v5064_v63, %v6797_v12  ;;  %2274 = vadd.xlane.f32.xlu0 %v2273_v21  ;;  %v2228_v42 = vpop.f32.mrb[27].mxu1 }
 0x3d8   : > { %v2247_v36 = vmul.f32 %v2228_v42, %v6788_v28 }
 0x3d9   : > { %v2282_v58 = vsel %vm1950_vm2, %v2248_v41, 0.0 }
 0x3da   : > { %2283 = vadd.xlane.f32.xlu1 %v2282_v58  ;;  %v2279_v7 = vsel %vm1950_vm2, %v2247_v36, 0.0 }
 0x3db   : > { %2280 = vadd.xlane.f32.xlu0 %v2279_v7  ;;  %v2298_v7 = vld [vmem:[%s6905_s12 + $0x8] sm:$0xff] }
 0x453   : > { %v2254_v5 = vpop.xlane.xlu1 %2253 }
 0x454   : > { %v2286_v31 = vmax.f32 %v2254_v5, 0.0  ;;  %v2251_v56 = vpop.xlane.xlu0 %2250 }
 0x455   : > { %v2285_v8 = vmax.f32 %v2251_v56, 0.0  ;;  %v5639_v56 = vmov 0.0  }
 0x456   : > { %v2310_v1 = vadd.f32 1e-05, %v2286_v31  ;;  %2613 = vmatprep.mubr.f32.mxu1 %v5639_v56  ;;  %3024 = vmatprep.mubr.f32.mxu0 %v5639_v56 }
 0x457   : > { %v2309_v30 = vadd.f32 1e-05, %v2285_v8  ;;  %v2260_v19 = vpop.xlane.xlu1 %2259 }
 0x458   : > { %5482 = vrsqrt.f32 %v2310_v1  ;;  %v2288_v61 = vmax.f32 %v2260_v19, 0.0  ;;  %v2257_v3 = vpop.xlane.xlu0 %2256  ;;  %v2300_v19 = vld [vmem:[%s6905_s12 + $0x18] sm:$0xff] }
 0x459   : > { %5484 = vrsqrt.f32 %v2309_v30  ;;  %v2287_v32 = vmax.f32 %v2257_v3, 0.0 }
 0x45a   : > { %v2312_v47 = vadd.f32 1e-05, %v2288_v61 }
 0x45b   : > { %v2311_v53 = vadd.f32 1e-05, %v2287_v32  ;;  %v2266_v50 = vpop.xlane.xlu1 %2265 }
 0x45c   : > { %v2263_v63 = vpop.xlane.xlu0 %2262  ;;  %v2290_v41 = vmax.f32 %v2266_v50, 0.0 }
 0x45d   : > { %5486 = vrsqrt.f32 %v2311_v53  ;;  %v2289_v21 = vmax.f32 %v2263_v63, 0.0  ;;  %v2301_v63 = vld [vmem:[%s6905_s12 + $0x20] sm:$0xff] }
 0x45e   : > { %5488 = vrsqrt.f32 %v2312_v47  ;;  %v2314_v24 = vadd.f32 1e-05, %v2290_v41 }
 0x45f   : > { %v2313_v42 = vadd.f32 1e-05, %v2289_v21  ;;  %v2272_v36 = vpop.xlane.xlu1 %2271 }
 0x460   : > { %v2269_v58 = vpop.xlane.xlu0 %2268  ;;  %v2292_v62 = vmax.f32 %v2272_v36, 0.0  ;;  %v2306_v36 = vld [vmem:[%s6905_s12 + $0x48] sm:$0xff] }
 0x461   : > { %5490 = vrsqrt.f32 %v2313_v42  ;;  %v2291_v15 = vmax.f32 %v2269_v58, 0.0 }
 0x462   : > { %v5483_v51 = vpop.eup %5482  ;;  %5492 = vrsqrt.f32 %v2314_v24  ;;  %v2316_v3 = vadd.f32 1e-05, %v2292_v62 }
 0x463   : > { %v5485_v33 = vpop.eup %5484  ;;  %v2278_v18 = vpop.xlane.xlu1 %2277  ;;  %v2334_v26 = vmul.f32 %v5483_v51, %v2298_v7  ;;  %v2315_v5 = vadd.f32 1e-05, %v2291_v15  ;;  %v2302_v7 = vld [vmem:[%s6905_s12 + $0x28] sm:$0xff]  ;;  %v2308_v15 = vld [vmem:[%s6905_s12 + $0x58] sm:$0xff] }
 0x464   : > { %v2294_v48 = vmax.f32 %v2278_v18, 0.0  ;;  %v6909_v54 = vmul.f32 %v5485_v33, %v2297_v13  ;;  %v2275_v55 = vpop.xlane.xlu0 %2274  ;;  %v8706_v18 = vld [vmem:[#allocation14_spill] sm:$0xff] }
 0x465   : > { %2352 = vperm.xlu1 %5481, %v2334_v26   ;;  %v2293_v32 = vmax.f32 %v2275_v55, 0.0  ;;  %v2303_v55 = vld [vmem:[%s6905_s12 + $0x30] sm:$0xff] }
 0x466   : > { %v2318_v6 = vadd.f32 1e-05, %v2294_v48  ;;  %2347 = vperm.xlu0 %5480, %v6909_v54   ;;  %v8707_v48 = vld [vmem:[#allocation54_spill] sm:$0xff] }
 0x467   : > { %v5487_v23 = vpop.eup %5486  ;;  %v2284_v31 = vpop.xlane.xlu1 %2283  ;;  %v2317_v21 = vadd.f32 1e-05, %v2293_v32 }
 0x468   : > { %5494 = vrsqrt.f32 %v2318_v6  ;;  %v2296_v8 = vmax.f32 %v2284_v31, 0.0  ;;  %v6915_v1 = vmul.f32 %v5487_v23, %v2299_v20  ;;  %v5489_v30 = vpop.eup %5488  ;;  %v2281_v47 = vpop.xlane.xlu0 %2280  ;;  %v5223_v20 = vpack.c.bf16 %v8707_v48, %v8706_v18  ;;  %v2426_v48 = vld [vmem:[%s6933_s15 + $0x48] sm:$0xff] }
 0x469   : > { %5496 = vrsqrt.f32 %v2315_v5  ;;  %v2336_v53 = vmul.f32 %v5489_v30, %v2300_v19  ;;  %v2295_v41 = vmax.f32 %v2281_v47, 0.0  ;;  %v2430_v5 = vmul.f32 %v6803_v2, %v2334_v26  ;;  %v2304_v19 = vld [vmem:[%s6905_s12 + $0x38] sm:$0xff] }
 0x46a   : > { %v2320_v61 = vadd.f32 1e-05, %v2296_v8  ;;  %2357 = vperm.xlu1 %5481, %v6915_v1   ;;  %5224 = vmatprep.subr.bf16.mxu1 %v5223_v20  ;;  %v2418_v8 = vld [vmem:[%s6933_s15 + $0x8] sm:$0xff]  ;;  %v2420_v47 = vld [vmem:[%s6933_s15 + $0x18] sm:$0xff]  ;;  %v2431_v20 = vmul.f32 %v6915_v1, %v6831_v43  ;;  %v2421_v43 = vld [vmem:[%s6933_s15 + $0x20] sm:$0xff] }
 0x46b   : > { %v5491_v50 = vpop.eup %5490  ;;  %v2319_v51 = vadd.f32 1e-05, %v2295_v41  ;;  %v2422_v41 = vld [vmem:[%s6933_s15 + $0x28] sm:$0xff] }
 0x46c   : > { %5498 = vrsqrt.f32 %v2320_v61  ;;  %v6920_v42 = vmul.f32 %v5491_v50, %v2301_v63  ;;  %v5493_v58 = vpop.eup %5492  ;;  %v2442_v61 = vsub.f32 %v2418_v8, %v2430_v5  ;;  %v2305_v63 = vld [vmem:[%s6905_s12 + $0x40] sm:$0xff]  ;;  %v2428_v8 = vld [vmem:[%s6933_s15 + $0x58] sm:$0xff] }
 0x46d   : > { %5500 = vrsqrt.f32 %v2316_v3  ;;  %v2338_v24 = vmul.f32 %v5493_v58, %v2302_v7  ;;  %v2432_v3 = vmul.f32 %v6829_v11, %v2336_v53  ;;  %v2307_v58 = vld [vmem:[%s6905_s12 + $0x50] sm:$0xff] }
 0x46e   : > { %2362 = vperm.xlu1 %5481, %v2336_v53   ;;  %5502 = vrsqrt.f32 %v2317_v21 }
 0x46f   : > { %5504 = vrsqrt.f32 %v2319_v51  ;;  %v2444_v2 = vsub.f32 %v2420_v47, %v2432_v3  ;;  %v2434_v26 = vmul.f32 %v6833_v27, %v2338_v24  ;;  %v2429_v51 = vmul.f32 %v6909_v54, %v6805_v49 }
 0x471   : > { %v2446_v11 = vsub.f32 %v2422_v41, %v2434_v26  ;;  %v8712_v26 = vld [vmem:[#allocation21_spill] sm:$0xff]  ;;  %v8713_v41 = vld [vmem:[#allocation70_spill] sm:$0xff] }
 0x472   : > { %v5495_v13 = vpop.eup %5494  ;;  %2367 = vperm.xlu1 %5481, %v6920_v42  }
 0x473   : > { %v2342_v33 = vmul.f32 %v5495_v13, %v2306_v36  ;;  %v5497_v6 = vpop.eup %5496  ;;  %v2424_v13 = vld [vmem:[%s6933_s15 + $0x38] sm:$0xff] }
 0x474   : > { %v2339_v31 = vmul.f32 %v5497_v6, %v2303_v55  ;;  %v8708_v6 = vld [vmem:[#allocation25_spill] sm:$0xff] }
 0x475   : > { %2392 = vperm.xlu0 %5480, %v2342_v33  }
 0x476   : > { %v5499_v23 = vpop.eup %5498  ;;  %2372 = vperm.xlu1 %5481, %v2338_v24   ;;  %v2438_v24 = vmul.f32 %v6841_v9, %v2342_v33  ;;  %v2433_v9 = vmul.f32 %v6920_v42, %v6835_v16  ;;  %v2427_v16 = vld [vmem:[%s6933_s15 + $0x50] sm:$0xff] }
 0x477   : > { %v2344_v62 = vmul.f32 %v5499_v23, %v2308_v15  ;;  %v5501_v30 = vpop.eup %5500  ;;  %v2417_v15 = vld [vmem:[%s6933_s15] sm:$0xff]  ;;  %v2419_v23 = vld [vmem:[%s6933_s15 + $0x10] sm:$0xff] }
 0x478   : > { %v2340_v32 = vmul.f32 %v5501_v30, %v2304_v19  ;;  %v5503_v50 = vpop.eup %5502  ;;  %v2441_v18 = vsub.f32 %v2417_v15, %v2429_v51  ;;  %v2450_v49 = vsub.f32 %v2426_v48, %v2438_v24  ;;  %v2443_v5 = vsub.f32 %v2419_v23, %v2431_v20  ;;  %v2423_v19 = vld [vmem:[%s6933_s15 + $0x30] sm:$0xff]  ;;  %v8719_v51 = vld [vmem:[#allocation71_spill] sm:$0xff]  ;;  %v8721_v24 = vld [vmem:[#allocation90_spill] sm:$0xff] }
 0x479   : > { %2402 = vperm.xlu0 %5480, %v2344_v62   ;;  %v2341_v21 = vmul.f32 %v5503_v50, %v2305_v63  ;;  %v5505_v36 = vpop.eup %5504  ;;  %v2440_v54 = vmul.f32 %v6845_v57, %v2344_v62  ;;  %v2445_v33 = vsub.f32 %v2421_v43, %v2433_v9  ;;  %v2435_v30 = vmul.f32 %v2339_v31, %v6839_v60  ;;  %v2425_v57 = vld [vmem:[%s6933_s15 + $0x40] sm:$0xff]  ;;  %v8710_v60 = vld [vmem:[#allocation13_spill] sm:$0xff]  ;;  %v8722_v48 = vld [vmem:[#allocation16_spill] sm:$0xff] }
 0x47a   : > { %2377 = vperm.xlu1 %5481, %v2339_v31   ;;  %v2436_v53 = vmul.f32 %v6837_v22, %v2340_v32  ;;  %v2343_v7 = vmul.f32 %v5505_v36, %v2307_v58  ;;  %v8709_v22 = vld [vmem:[#allocation74_spill] sm:$0xff]  ;;  %v8715_v36 = vld [vmem:[#allocation75_spill] sm:$0xff] }
 0x47b   : > { %v5255_v55 = vpack.c.bf16 %v8709_v22, %v8708_v6  ;;  %v2452_v1 = vsub.f32 %v2428_v8, %v2440_v54  ;;  %v2437_v3 = vmul.f32 %v2341_v21, %v6843_v17  ;;  %v8711_v31 = vld [vmem:[#allocation50_spill] sm:$0xff]  ;;  %v5257_v17 = vpack.c.bf16 %v8713_v41, %v8712_v26  ;;  %v8724_v22 = vld [vmem:[#allocation33_spill] sm:$0xff] }
 0x47c   : > { %v2448_v27 = vsub.f32 %v2424_v13, %v2436_v53  ;;  %v8718_v13 = vld [vmem:[#allocation24_spill] sm:$0xff]  ;;  %v8723_v20 = vld [vmem:[#allocation58_spill] sm:$0xff] }
 0x47d   : > { %2460 = vperm.xlu0 %5480, %v2442_v61   ;;  %5256 = vmatprep.subr.bf16.mxu0 %v5255_v55  ;;  %v2447_v61 = vsub.f32 %v2423_v19, %v2435_v30  ;;  %v2449_v62 = vsub.f32 %v2425_v57, %v2437_v3  ;;  %v5229_v15 = vpack.c.bf16 %v8719_v51, %v8718_v13  ;;  %v8725_v55 = vld [vmem:[#allocation83_spill] sm:$0xff]  ;;  %v8736_v41 = vld [vmem:[#allocation30_spill] sm:$0xff]  ;;  %v8743_v13 = vld [vmem:[#allocation105_spill] sm:$0xff] }
 0x47e   : > { %2382 = vperm.xlu1 %5481, %v2340_v32   ;;  %v2439_v32 = vmul.f32 %v2343_v7, %v6847_v10  ;;  %v8717_v10 = vld [vmem:[#allocation92_spill] sm:$0xff]  ;;  %v5231_v6 = vpack.c.bf16 %v8723_v20, %v8722_v48  ;;  %v5271_v23 = vpack.c.bf16 %v8725_v55, %v8724_v22  ;;  %v8726_v19 = vld [vmem:[#allocation31_spill] sm:$0xff]  ;;  %v8749_v22 = vld [vmem:[#allocation66_spill] sm:$0xff] }
 0x47f   : > { %v8747_v48 = vld [vmem:[#allocation100_spill] sm:$0xff] }
 0x480   : > { %v2451_v42 = vsub.f32 %v2427_v16, %v2439_v32  ;;  %v8730_v16 = vld [vmem:[#allocation52_spill] sm:$0xff] }
 0x481   : > { %2470 = vperm.xlu0 %5480, %v2444_v2   ;;  %v5225_v2 = vpack.c.bf16 %v8711_v31, %v8710_v60  ;;  %v8733_v60 = vld [vmem:[#allocation91_spill] sm:$0xff] }
 0x482   : > { %2387 = vperm.xlu1 %5481, %v2341_v21   ;;  %v8714_v21 = vld [vmem:[#allocation26_spill] sm:$0xff] }
 0x483   : > { %v5227_v58 = vpack.c.bf16 %v8715_v36, %v8714_v21  ;;  %v8738_v36 = vld [vmem:[#allocation28_spill] sm:$0xff] }
 0x485   : > { %2480 = vperm.xlu0 %5480, %v2446_v11   ;;  %v8716_v11 = vld [vmem:[#allocation42_spill] sm:$0xff] }
 0x486   : > { %2397 = vperm.xlu1 %5481, %v2343_v7   ;;  %v5259_v53 = vpack.c.bf16 %v8717_v10, %v8716_v11  ;;  %v8741_v10 = vld [vmem:[#allocation89_spill] sm:$0xff] }
 0x489   : > { %2490 = vperm.xlu0 %5480, %v2448_v27   ;;  %v8720_v27 = vld [vmem:[#allocation40_spill] sm:$0xff] }
 0x48a   : > { %2455 = vperm.xlu1 %5481, %v2441_v18   ;;  %v5261_v18 = vpack.c.bf16 %v8721_v24, %v8720_v27  ;;  %v8745_v27 = vld [vmem:[#allocation104_spill] sm:$0xff] }
 0x48d   : > { %2500 = vperm.xlu0 %5480, %v2450_v49  }
 0x48e   : > { %2465 = vperm.xlu1 %5481, %v2443_v5  }
 0x491   : > { %2510 = vperm.xlu0 %5480, %v2452_v1  }
 0x492   : > { %2475 = vperm.xlu1 %5481, %v2445_v33  }
 0x496   : > { %2485 = vperm.xlu1 %5481, %v2447_v61   ;;  %v8727_v61 = vld [vmem:[#allocation81_spill] sm:$0xff] }
 0x497   : > { %v5273_v3 = vpack.c.bf16 %v8727_v61, %v8726_v19  ;;  %v5251_v19 = vpack.c.bf16 %v8639_v52, %v8638_v14  ;;  %v8758_v61 = vld [vmem:[#allocation36_spill] sm:$0xff]  ;;  %v8762_v14 = vld [vmem:[#allocation27_spill] sm:$0xff]  ;;  %v8763_v52 = vld [vmem:[#allocation77_spill] sm:$0xff] }
 0x49a   : > { %2495 = vperm.xlu1 %5481, %v2449_v62   ;;  %v8729_v62 = vld [vmem:[#allocation101_spill] sm:$0xff] }
 0x49e   : > { %2505 = vperm.xlu1 %5481, %v2451_v42   ;;  %v8731_v42 = vld [vmem:[#allocation98_spill] sm:$0xff] }
 0x4e4   : > { %v2353_v47 = vpop.permute.xlu1 %2352 }
 0x4e5   : > { %v2348_v50 = vpop.permute.xlu0 %2347  ;;  %v6985_v7 = vmul.f32 %v2353_v47, %v6642_v40  ;;  %v5277_v47 = vpack.c.bf16 %v8731_v42, %v8730_v16  ;;  %v5265_v16 = vpack.c.bf16 %v8763_v52, %v8762_v14  ;;  %v8764_v42 = vld [vmem:[#allocation48_spill] sm:$0xff] }
 0x4e6   : > { %v6968_v63 = vmul.f32 %v2348_v50, %v6639_v39  ;;  %v8732_v50 = vld [vmem:[#allocation41_spill] sm:$0xff] }
 0x4e7   : > { %v5287_v31 = vpack.c.bf16 %v8733_v60, %v8732_v50  ;;  %v8766_v60 = vld [vmem:[#allocation44_spill] sm:$0xff] }
 0x4e8   : > { %4784 = vmatmul.mubr.msk.f32.vlgmr.msra.gmra.mrb[28].mxu1 %vm1950_vm2, %v6968_v63  ;;  %4820 = vmatmul.mubr.msk.f32.vlgmr.msra.gmra.mrb[8].mxu0 %vm1950_vm2, %v6968_v63 }
 0x4e9   : > { %v2358_v39 = vpop.permute.xlu1 %2357  ;;  %2619 = vmatprep.mubr.f32.mxu1 %v5639_v56  ;;  %3030 = vmatprep.mubr.f32.mxu0 %v5639_v56 }
 0x4ea   : > { %5226 = vmatpush1.bf16.msra.mxu1 %v5225_v2  ;;  %5258 = vmatpush1.bf16.msra.mxu0 %v5257_v17  ;;  %v7002_v49 = vmul.f32 %v2358_v39, %v6752_v0  ;;  %v8735_v2 = vld [vmem:[#allocation56_spill] sm:$0xff]  ;;  %v8742_v39 = vld [vmem:[#allocation63_spill] sm:$0xff] }
 0x4eb   : > { %5228 = vmatprep.subr.bf16.mxu1 %v5227_v58  ;;  %5260 = vmatprep.subr.bf16.mxu0 %v5259_v53  ;;  %v8737_v17 = vld [vmem:[#allocation80_spill] sm:$0xff]  ;;  %v8739_v58 = vld [vmem:[#allocation78_spill] sm:$0xff]  ;;  %v5291_v51 = vpack.c.bf16 %v8743_v13, %v8742_v39  ;;  %v8776_v13 = vld [vmem:[#allocation45_spill] sm:$0xff] }
 0x4ec   : > { %4785 = vmatmul.mubr.msk.f32.gmra.mrb[30].mxu1 %vm1950_vm2, %v6985_v7  ;;  %4821 = vmatmul.mubr.msk.f32.gmra.mrb[10].mxu0 %vm1950_vm2, %v6985_v7  ;;  %v5235_v21 = vpack.c.bf16 %v8737_v17, %v8736_v41  ;;  %v5237_v11 = vpack.c.bf16 %v8739_v58, %v8738_v36  ;;  %v8770_v17 = vld [vmem:[#allocation35_spill] sm:$0xff] }
 0x4ed   : > { %v2363_v40 = vpop.permute.xlu1 %2362  ;;  %2625 = vmatprep.mubr.f32.mxu1 %v5639_v56  ;;  %3036 = vmatprep.mubr.f32.mxu0 %v5639_v56  ;;  %v8772_v58 = vld [vmem:[#allocation59_spill] sm:$0xff] }
 0x4ee   : > { %5230 = vmatpush1.bf16.msra.mxu1 %v5229_v15  ;;  %5262 = vmatpush1.bf16.msra.mxu0 %v5261_v18  ;;  %v7011_v5 = vmul.f32 %v2363_v40, %v6755_v4  ;;  %v8744_v15 = vld [vmem:[#allocation61_spill] sm:$0xff]  ;;  %v8753_v40 = vld [vmem:[#allocation110_spill] sm:$0xff] }
 0x4ef   : > { %5232 = vmatprep.subr.bf16.mxu1 %v5231_v6  ;;  %5272 = vmatprep.subr.bf16.mxu0 %v5271_v23  ;;  %v5293_v24 = vpack.c.bf16 %v8745_v27, %v8744_v15  ;;  %v8746_v18 = vld [vmem:[#allocation53_spill] sm:$0xff]  ;;  %v8748_v6 = vld [vmem:[#allocation20_spill] sm:$0xff] }
 0x4f0   : > { %4786 = vmatmul.mubr.msk.f32.gmra.mrb[32].mxu1 %vm1950_vm2, %v7002_v49  ;;  %4822 = vmatmul.mubr.msk.f32.gmra.mrb[12].mxu0 %vm1950_vm2, %v7002_v49  ;;  %v5303_v20 = vpack.c.bf16 %v8747_v48, %v8746_v18  ;;  %v5247_v55 = vpack.c.bf16 %v8749_v22, %v8748_v6  ;;  %v8752_v23 = vld [vmem:[#allocation76_spill] sm:$0xff] }
 0x4f1   : > { %v2368_v54 = vpop.permute.xlu1 %2367  ;;  %2631 = vmatprep.mubr.f32.mxu1 %v5639_v56  ;;  %3042 = vmatprep.mubr.f32.mxu0 %v5639_v56 }
 0x4f2   : > { %v7020_v8 = vmul.f32 %v2368_v54, %v6762_v37  ;;  %v5307_v54 = vpack.c.bf16 %v8753_v40, %v8752_v23 }
 0x4f4   : > { %4787 = vmatmul.mubr.msk.f32.gmra.mrb[34].mxu1 %vm1950_vm2, %v7011_v5  ;;  %4823 = vmatmul.mubr.msk.f32.gmra.mrb[14].mxu0 %vm1950_vm2, %v7011_v5  ;;  %v2393_v33 = vpop.permute.xlu0 %2392 }
 0x4f5   : > { %v2373_v0 = vpop.permute.xlu1 %2372  ;;  %2637 = vmatprep.mubr.f32.mxu1 %v5639_v56  ;;  %3048 = vmatprep.mubr.f32.mxu0 %v5639_v56 }
 0x4f6   : > { %v7029_v9 = vmul.f32 %v2373_v0, %v6765_v59  ;;  %v8754_v0 = vld [vmem:[#allocation72_spill] sm:$0xff] }
 0x4f8   : > { %4788 = vmatmul.mubr.msk.f32.gmra.mrb[36].mxu1 %vm1950_vm2, %v7020_v8  ;;  %4824 = vmatmul.mubr.msk.f32.gmra.mrb[16].mxu0 %vm1950_vm2, %v7020_v8  ;;  %v2403_v57 = vpop.permute.xlu0 %2402 }
 0x4f9   : > { %v2378_v4 = vpop.permute.xlu1 %2377  ;;  %2643 = vmatprep.mubr.f32.mxu1 %v5639_v56  ;;  %3054 = vmatprep.mubr.f32.mxu0 %v5639_v56 }
 0x4fa   : > { %v7038_v43 = vmul.f32 %v2378_v4, %v6772_v29  ;;  %v8755_v4 = vld [vmem:[#allocation108_spill] sm:$0xff] }
 0x4fc   : > { %4789 = vmatmul.mubr.msk.f32.gmra.mrb[38].mxu1 %vm1950_vm2, %v7029_v9  ;;  %4825 = vmatmul.mubr.msk.f32.gmra.mrb[18].mxu0 %vm1950_vm2, %v7029_v9 }
 0x4fd   : > { %v2383_v37 = vpop.permute.xlu1 %2382  ;;  %2649 = vmatprep.mubr.f32.mxu1 %v5639_v56  ;;  %3060 = vmatprep.mubr.f32.mxu0 %v5639_v56 }
 0x4fe   : > { %v7047_v59 = vmul.f32 %v2383_v37, %v6777_v35  ;;  %v7065_v35 = vmul.f32 %v2393_v33, %v6785_v34  ;;  %v8728_v34 = vld [vmem:[#allocation55_spill] sm:$0xff]  ;;  %v5309_v37 = vpack.c.bf16 %v8755_v4, %v8754_v0  ;;  %v8757_v33 = vld [vmem:[#allocation64_spill] sm:$0xff] }
 0x4ff   : > { %v5275_v32 = vpack.c.bf16 %v8729_v62, %v8728_v34  ;;  %v8760_v34 = vld [vmem:[#allocation29_spill] sm:$0xff]  ;;  %v8761_v62 = vld [vmem:[#allocation79_spill] sm:$0xff] }
 0x500   : > { %4790 = vmatmul.mubr.msk.f32.gmra.mrb[40].mxu1 %vm1950_vm2, %v7038_v43  ;;  %4826 = vmatmul.mubr.msk.f32.gmra.mrb[20].mxu0 %vm1950_vm2, %v7038_v43 }
 0x501   : > { %2655 = vmatprep.mubr.f32.mxu1 %v5639_v56  ;;  %3066 = vmatprep.mubr.f32.mxu0 %v5639_v56  ;;  %v2388_v1 = vpop.permute.xlu1 %2387 }
 0x502   : > { %v7056_v29 = vmul.f32 %v2388_v1, %v6782_v46  ;;  %v8756_v1 = vld [vmem:[#allocation19_spill] sm:$0xff] }
 0x504   : > { %4791 = vmatmul.mubr.msk.f32.gmra.mrb[42].mxu1 %vm1950_vm2, %v7047_v59  ;;  %4827 = vmatmul.mubr.msk.f32.gmra.mrb[22].mxu0 %vm1950_vm2, %v7047_v59 }
 0x505   : > { %2661 = vmatprep.mubr.f32.mxu1 %v5639_v56  ;;  %3072 = vmatprep.mubr.f32.mxu0 %v5639_v56  ;;  %v2398_v30 = vpop.permute.xlu1 %2397 }
 0x506   : > { %v7074_v46 = vmul.f32 %v2398_v30, %v6788_v28  ;;  %v7087_v28 = vmul.f32 %v2403_v57, %v6797_v12  ;;  %v8734_v12 = vld [vmem:[#allocation15_spill] sm:$0xff]  ;;  %v5249_v30 = vpack.c.bf16 %v8757_v33, %v8756_v1 }
 0x507   : > { %v5233_v26 = vpack.c.bf16 %v8735_v2, %v8734_v12  ;;  %v8768_v2 = vld [vmem:[#allocation37_spill] sm:$0xff] }
 0x508   : > { %4792 = vmatmul.mubr.msk.f32.gmra.mrb[44].mxu1 %vm1950_vm2, %v7056_v29  ;;  %4828 = vmatmul.mubr.msk.f32.gmra.mrb[24].mxu0 %vm1950_vm2, %v7056_v29 }
 0x509   : > { %2667 = vmatprep.mubr.f32.mxu1 %v5639_v56  ;;  %3078 = vmatprep.mubr.f32.mxu0 %v5639_v56  ;;  %v7398_v27 = vpop.permute.xlu1 %2455 }
 0x50c   : > { %4793 = vmatmul.mubr.msk.f32.gmra.mrb[46].mxu1 %vm1950_vm2, %v7065_v35  ;;  %4829 = vmatmul.mubr.msk.f32.gmra.mrb[26].mxu0 %vm1950_vm2, %v7065_v35 }
 0x50d   : > { %2673 = vmatprep.mubr.f32.mxu1 %v5639_v56  ;;  %3298 = vmatprep.mubr.f32.mxu0 %v5639_v56  ;;  %v7428_v33 = vpop.permute.xlu1 %2465 }
 0x510   : > { %4794 = vmatmul.mubr.msk.f32.gmra.mrb[48].mxu1 %vm1950_vm2, %v7074_v46  ;;  %4844 = vmatmul.mubr.msk.f32.vlgmr.msra.gmra.mrb[28].mxu0 %vm1950_vm2, %v6968_v63 }
 0x511   : > { %2679 = vmatprep.mubr.f32.mxu1 %v5639_v56  ;;  %3304 = vmatprep.mubr.f32.mxu0 %v5639_v56 }
 0x512   : > { %5274 = vmatpush1.bf16.msra.mxu0 %v5273_v3  ;;  %v8759_v3 = vld [vmem:[#allocation86_spill] sm:$0xff] }
 0x513   : > { %5276 = vmatprep.subr.bf16.mxu0 %v5275_v32  ;;  %v5253_v57 = vpack.c.bf16 %v8759_v3, %v8758_v61  ;;  %v5263_v32 = vpack.c.bf16 %v8761_v62, %v8760_v34 }
 0x514   : > { %4795 = vmatmul.mubr.msk.f32.gmra.mrb[50].mxu1 %vm1950_vm2, %v7087_v28  ;;  %4845 = vmatmul.mubr.msk.f32.gmra.mrb[30].mxu0 %vm1950_vm2, %v6985_v7 }
 0x515   : > { %2750 = vmatprep.mubr.f32.mxu1 %v5639_v56  ;;  %3310 = vmatprep.mubr.f32.mxu0 %v5639_v56 }
 0x516   : > { %5278 = vmatpush1.bf16.msra.mxu0 %v5277_v47  ;;  %v8765_v47 = vld [vmem:[#allocation96_spill] sm:$0xff] }
 0x517   : > { %5288 = vmatprep.subr.bf16.mxu0 %v5287_v31  ;;  %v5267_v50 = vpack.c.bf16 %v8765_v47, %v8764_v42  ;;  %v8767_v31 = vld [vmem:[#allocation94_spill] sm:$0xff] }
 0x518   : > { %4796 = vmatmul.mubr.msk.f32.vlgmr.msra.gmra.mrb[52].mxu1 %vm1950_vm2, %v6968_v63  ;;  %4846 = vmatmul.mubr.msk.f32.gmra.mrb[32].mxu0 %vm1950_vm2, %v7002_v49  ;;  %v5269_v12 = vpack.c.bf16 %v8767_v31, %v8766_v60 }
 0x519   : > { %2756 = vmatprep.mubr.f32.mxu1 %v5639_v56  ;;  %3316 = vmatprep.mubr.f32.mxu0 %v5639_v56 }
 0x51a   : > { %5234 = vmatpush1.bf16.msra.mxu1 %v5233_v26  ;;  %v8769_v26 = vld [vmem:[#allocation87_spill] sm:$0xff] }
 0x51b   : > { %5236 = vmatprep.subr.bf16.mxu1 %v5235_v21  ;;  %v5279_v41 = vpack.c.bf16 %v8769_v26, %v8768_v2  ;;  %v8771_v21 = vld [vmem:[#allocation85_spill] sm:$0xff]  ;;  %v7460_v2 = vpop.permute.xlu1 %2475 }
 0x51c   : > { %4797 = vmatmul.mubr.msk.f32.gmra.mrb[54].mxu1 %vm1950_vm2, %v6985_v7  ;;  %4847 = vmatmul.mubr.msk.f32.gmra.mrb[34].mxu0 %vm1950_vm2, %v7011_v5  ;;  %v5281_v36 = vpack.c.bf16 %v8771_v21, %v8770_v17 }
 0x51d   : > { %2762 = vmatprep.mubr.f32.mxu1 %v5639_v56  ;;  %3322 = vmatprep.mubr.f32.mxu0 %v5639_v56 }
 0x51e   : > { %5238 = vmatpush1.bf16.msra.mxu1 %v5237_v11  ;;  %v8773_v11 = vld [vmem:[#allocation103_spill] sm:$0xff] }
 0x51f   : > { %5319 = vmatprep.subr.bf16.mxu1 %v6879_v45  ;;  %v8740_v45 = vld [vmem:[#allocation39_spill] sm:$0xff] }
 0x520   : > { %4798 = vmatmul.mubr.msk.f32.gmra.mrb[56].mxu1 %vm1950_vm2, %v7002_v49  ;;  %4848 = vmatmul.mubr.msk.f32.gmra.mrb[36].mxu0 %vm1950_vm2, %v7020_v8  ;;  %v5289_v53 = vpack.c.bf16 %v8741_v10, %v8740_v45  ;;  %v5283_v45 = vpack.c.bf16 %v8773_v11, %v8772_v58  ;;  %v8774_v10 = vld [vmem:[#allocation57_spill] sm:$0xff] }
 0x521   : > { %2768 = vmatprep.mubr.f32.mxu1 %v5639_v56  ;;  %3328 = vmatprep.mubr.f32.mxu0 %v5639_v56 }
 0x524   : > { %4799 = vmatmul.mubr.msk.f32.gmra.mrb[58].mxu1 %vm1950_vm2, %v7011_v5  ;;  %4849 = vmatmul.mubr.msk.f32.gmra.mrb[38].mxu0 %vm1950_vm2, %v7029_v9 }
 0x525   : > { %2774 = vmatprep.mubr.f32.mxu1 %v5639_v56  ;;  %3334 = vmatprep.mubr.f32.mxu0 %v5639_v56 }
 0x528   : > { %4800 = vmatmul.mubr.msk.f32.gmra.mrb[60].mxu1 %vm1950_vm2, %v7020_v8  ;;  %4850 = vmatmul.mubr.msk.f32.gmra.mrb[40].mxu0 %vm1950_vm2, %v7038_v43 }
 0x529   : > { %2780 = vmatprep.mubr.f32.mxu1 %v5639_v56  ;;  %3340 = vmatprep.mubr.f32.mxu0 %v5639_v56 }
 0x52c   : > { %4801 = vmatmul.mubr.msk.f32.gmra.mrb[62].mxu1 %vm1950_vm2, %v7029_v9  ;;  %4851 = vmatmul.mubr.msk.f32.gmra.mrb[42].mxu0 %vm1950_vm2, %v7047_v59 }
 0x52d   : > { %2786 = vmatprep.mubr.f32.mxu1 %v5639_v56  ;;  %3346 = vmatprep.mubr.f32.mxu0 %v5639_v56 }
 0x530   : > { %4802 = vmatmul.mubr.msk.f32.gmra.mrb[64].mxu1 %vm1950_vm2, %v7038_v43  ;;  %4852 = vmatmul.mubr.msk.f32.gmra.mrb[44].mxu0 %vm1950_vm2, %v7056_v29 }
 0x531   : > { %2792 = vmatprep.mubr.f32.mxu1 %v5639_v56  ;;  %3352 = vmatprep.mubr.f32.mxu0 %v5639_v56 }
 0x534   : > { %4803 = vmatmul.mubr.msk.f32.gmra.mrb[66].mxu1 %vm1950_vm2, %v7047_v59  ;;  %4853 = vmatmul.mubr.msk.f32.gmra.mrb[46].mxu0 %vm1950_vm2, %v7065_v35 }
 0x535   : > { %2798 = vmatprep.mubr.f32.mxu1 %v5639_v56  ;;  %3358 = vmatprep.mubr.f32.mxu0 %v5639_v56 }
 0x538   : > { %4804 = vmatmul.mubr.msk.f32.gmra.mrb[68].mxu1 %vm1950_vm2, %v7056_v29  ;;  %4854 = vmatmul.mubr.msk.f32.gmra.mrb[48].mxu0 %vm1950_vm2, %v7074_v46 }
 0x539   : > { %2804 = vmatprep.mubr.f32.mxu1 %v5639_v56  ;;  %3364 = vmatprep.mubr.f32.mxu0 %v5639_v56 }
 0x53c   : > { %4805 = vmatmul.mubr.msk.f32.gmra.mrb[70].mxu1 %vm1950_vm2, %v7065_v35  ;;  %4855 = vmatmul.mubr.msk.f32.gmra.mrb[50].mxu0 %vm1950_vm2, %v7087_v28 }
 0x53d   : > { %2810 = vmatprep.mubr.f32.mxu1 %v5639_v56  ;;  %3572 = vmatprep.mubr.f32.mxu0 %v5639_v56 }
 0x540   : > { %4806 = vmatmul.mubr.msk.f32.gmra.mrb[72].mxu1 %vm1950_vm2, %v7074_v46  ;;  %4868 = vmatmul.mubr.msk.f32.vlgmr.msra.gmra.mrb[52].mxu0 %vm1950_vm2, %v6968_v63 }
 0x541   : > { %2816 = vmatprep.mubr.f32.mxu1 %v5639_v56  ;;  %3578 = vmatprep.mubr.f32.mxu0 %v5639_v56 }
 0x542   : > { %5290 = vmatpush1.bf16.msra.mxu0 %v5289_v53  ;;  %v8775_v53 = vld [vmem:[#allocation102_spill] sm:$0xff] }
 0x543   : > { %5292 = vmatprep.subr.bf16.mxu0 %v5291_v51  ;;  %v5285_v39 = vpack.c.bf16 %v8775_v53, %v8774_v10  ;;  %v8777_v51 = vld [vmem:[#allocation95_spill] sm:$0xff] }
 0x544   : > { %4807 = vmatmul.mubr.msk.f32.gmra.mrb[74].mxu1 %vm1950_vm2, %v7087_v28  ;;  %4869 = vmatmul.mubr.msk.f32.gmra.mrb[54].mxu0 %vm1950_vm2, %v6985_v7  ;;  %v5295_v15 = vpack.c.bf16 %v8777_v51, %v8776_v13 }
 0x545   : > { %2887 = vmatprep.mubr.f32.mxu1 %v5639_v56  ;;  %3584 = vmatprep.mubr.f32.mxu0 %v5639_v56 }
 0x546   : > { %5294 = vmatpush1.bf16.msra.mxu0 %v5293_v24 }
 0x547   : > { %5304 = vmatprep.subr.bf16.mxu0 %v5303_v20 }
 0x548   : > { %4808 = vmatmul.mubr.msk.f32.vlgmr.msra.gmra.mrb[76].mxu1 %vm1950_vm2, %v6968_v63  ;;  %4870 = vmatmul.mubr.msk.f32.gmra.mrb[56].mxu0 %vm1950_vm2, %v7002_v49 }
 0x549   : > { %2893 = vmatprep.mubr.f32.mxu1 %v5639_v56  ;;  %3590 = vmatprep.mubr.f32.mxu0 %v5639_v56 }
 0x54a   : > { %5321 = vmatpush1.bf16.msra.mxu1 %v6883_v44  ;;  %v8750_v44 = vld [vmem:[#allocation49_spill] sm:$0xff] }
 0x54b   : > { %5320 = vmatprep.subr.bf16.mxu1 %v6889_v25  ;;  %v8751_v25 = vld [vmem:[#allocation97_spill] sm:$0xff] }
 0x54c   : > { %4809 = vmatmul.mubr.msk.f32.gmra.mrb[78].mxu1 %vm1950_vm2, %v6985_v7  ;;  %4871 = vmatmul.mubr.msk.f32.gmra.mrb[58].mxu0 %vm1950_vm2, %v7011_v5 }
 0x54d   : > { %2899 = vmatprep.mubr.f32.mxu1 %v5639_v56  ;;  %3596 = vmatprep.mubr.f32.mxu0 %v5639_v56 }
 0x54e   : > { %5322 = vmatpush1.bf16.msra.mxu1 %v6897_v38  ;;  %v5305_v38 = vpack.c.bf16 %v8751_v25, %v8750_v44  ;;  %v7410_v25 = vpop.permute.xlu0 %2460 }
 0x54f   : > { %5248 = vmatprep.subr.bf16.mxu1 %v5247_v55 }
 0x550   : > { %4810 = vmatmul.mubr.msk.f32.gmra.mrb[80].mxu1 %vm1950_vm2, %v7002_v49  ;;  %4872 = vmatmul.mubr.msk.f32.gmra.mrb[60].mxu0 %vm1950_vm2, %v7020_v8 }
 0x551   : > { %2905 = vmatprep.mubr.f32.mxu1 %v5639_v56  ;;  %3602 = vmatprep.mubr.f32.mxu0 %v5639_v56 }
 0x552   : > { %v7444_v14 = vpop.permute.xlu0 %2470 }
 0x554   : > { %4811 = vmatmul.mubr.msk.f32.gmra.mrb[82].mxu1 %vm1950_vm2, %v7011_v5  ;;  %4873 = vmatmul.mubr.msk.f32.gmra.mrb[62].mxu0 %vm1950_vm2, %v7029_v9 }
 0x555   : > { %2911 = vmatprep.mubr.f32.mxu1 %v5639_v56  ;;  %3608 = vmatprep.mubr.f32.mxu0 %v5639_v56 }
 0x556   : > { %v7475_v10 = vpop.permute.xlu0 %2480 }
 0x558   : > { %4812 = vmatmul.mubr.msk.f32.gmra.mrb[84].mxu1 %vm1950_vm2, %v7020_v8  ;;  %4874 = vmatmul.mubr.msk.f32.gmra.mrb[64].mxu0 %vm1950_vm2, %v7038_v43 }
 0x559   : > { %2917 = vmatprep.mubr.f32.mxu1 %v5639_v56  ;;  %3614 = vmatprep.mubr.f32.mxu0 %v5639_v56 }
 0x55c   : > { %4813 = vmatmul.mubr.msk.f32.gmra.mrb[86].mxu1 %vm1950_vm2, %v7029_v9  ;;  %4875 = vmatmul.mubr.msk.f32.gmra.mrb[66].mxu0 %vm1950_vm2, %v7047_v59 }
 0x55d   : > { %2923 = vmatprep.mubr.f32.mxu1 %v5639_v56  ;;  %3620 = vmatprep.mubr.f32.mxu0 %v5639_v56 }
 0x560   : > { %4814 = vmatmul.mubr.msk.f32.gmra.mrb[88].mxu1 %vm1950_vm2, %v7038_v43  ;;  %4876 = vmatmul.mubr.msk.f32.gmra.mrb[68].mxu0 %vm1950_vm2, %v7056_v29 }
 0x561   : > { %2929 = vmatprep.mubr.f32.mxu1 %v5639_v56  ;;  %3626 = vmatprep.mubr.f32.mxu0 %v5639_v56 }
 0x564   : > { %4815 = vmatmul.mubr.msk.f32.gmra.mrb[90].mxu1 %vm1950_vm2, %v7047_v59  ;;  %4877 = vmatmul.mubr.msk.f32.gmra.mrb[70].mxu0 %vm1950_vm2, %v7065_v35 }
 0x565   : > { %2935 = vmatprep.mubr.f32.mxu1 %v5639_v56  ;;  %3632 = vmatprep.mubr.f32.mxu0 %v5639_v56 }
 0x568   : > { %4816 = vmatmul.mubr.msk.f32.gmra.mrb[92].mxu1 %vm1950_vm2, %v7056_v29  ;;  %4878 = vmatmul.mubr.msk.f32.gmra.mrb[72].mxu0 %vm1950_vm2, %v7074_v46 }
 0x569   : > { %2941 = vmatprep.mubr.f32.mxu1 %v5639_v56  ;;  %3638 = vmatprep.mubr.f32.mxu0 %v5639_v56 }
 0x56c   : > { %4817 = vmatmul.mubr.msk.f32.gmra.mrb[94].mxu1 %vm1950_vm2, %v7065_v35  ;;  %4879 = vmatmul.mubr.msk.f32.gmra.mrb[74].mxu0 %vm1950_vm2, %v7087_v28 }
 0x56d   : > { %2947 = vmatprep.mubr.f32.mxu1 %v5639_v56  ;;  %3846 = vmatprep.mubr.f32.mxu0 %v5639_v56 }
 0x570   : > { %4818 = vmatmul.mubr.msk.f32.gmra.mrb[96].mxu1 %vm1950_vm2, %v7074_v46  ;;  %4892 = vmatmul.mubr.msk.f32.vlgmr.msra.gmra.mrb[76].mxu0 %vm1950_vm2, %v6968_v63 }
 0x571   : > { %2953 = vmatprep.mubr.f32.mxu1 %v5639_v56  ;;  %3852 = vmatprep.mubr.f32.mxu0 %v5639_v56 }
 0x572   : > { %5306 = vmatpush1.bf16.msra.mxu0 %v5305_v38 }
 0x573   : > { %5308 = vmatprep.subr.bf16.mxu0 %v5307_v54 }
 0x574   : > { %4819 = vmatmul.mubr.msk.f32.gmra.mrb[98].mxu1 %vm1950_vm2, %v7087_v28  ;;  %4893 = vmatmul.mubr.msk.f32.gmra.mrb[78].mxu0 %vm1950_vm2, %v6985_v7 }
 0x575   : > { %3084 = vmatprep.mubr.f32.mxu1 %v5639_v56  ;;  %3858 = vmatprep.mubr.f32.mxu0 %v5639_v56 }
 0x576   : > { %5310 = vmatpush1.bf16.msra.mxu0 %v5309_v37 }
 0x578   : > { %4830 = vmatmul.mubr.msk.f32.vlgmr.msra.gmra.mrb[100].mxu1 %vm1950_vm2, %v7074_v46  ;;  %4894 = vmatmul.mubr.msk.f32.gmra.mrb[80].mxu0 %vm1950_vm2, %v7002_v49 }
 0x579   : > { %5250 = vmatpush1.bf16.msra.mxu1 %v5249_v30  ;;  %3090 = vmatprep.mubr.f32.mxu1 %v5639_v56 }
 0x57a   : > { %3864 = vmatprep.mubr.f32.mxu0 %v5639_v56  ;;  %5252 = vmatprep.subr.bf16.mxu1 %v5251_v19 }
 0x57c   : > { %4831 = vmatmul.mubr.msk.f32.gmra.mrb[102].mxu1 %vm1950_vm2, %v7087_v28  ;;  %4895 = vmatmul.mubr.msk.f32.gmra.mrb[82].mxu0 %vm1950_vm2, %v7011_v5 }
 0x57d   : > { %5254 = vmatpush1.bf16.msra.mxu1 %v5253_v57  ;;  %3161 = vmatprep.mubr.f32.mxu1 %v5639_v56 }
 0x57e   : > { %3870 = vmatprep.mubr.f32.mxu0 %v5639_v56  ;;  %5264 = vmatprep.subr.bf16.mxu1 %v5263_v32 }
 0x580   : > { %4832 = vmatmul.mubr.msk.f32.vlgmr.msra.gmra.mrb[104].mxu1 %vm1950_vm2, %v6968_v63  ;;  %4896 = vmatmul.mubr.msk.f32.gmra.mrb[84].mxu0 %vm1950_vm2, %v7020_v8 }
 0x581   : > { %3167 = vmatprep.mubr.f32.mxu1 %v5639_v56  ;;  %3876 = vmatprep.mubr.f32.mxu0 %v5639_v56 }
 0x582   : > { %5266 = vmatpush1.bf16.msra.mxu1 %v5265_v16 }
 0x583   : > { %5268 = vmatprep.subr.bf16.mxu1 %v5267_v50 }
 0x584   : > { %4833 = vmatmul.mubr.msk.f32.gmra.mrb[106].mxu1 %vm1950_vm2, %v6985_v7  ;;  %4897 = vmatmul.mubr.msk.f32.gmra.mrb[86].mxu0 %vm1950_vm2, %v7029_v9 }
 0x585   : > { %3173 = vmatprep.mubr.f32.mxu1 %v5639_v56  ;;  %3882 = vmatprep.mubr.f32.mxu0 %v5639_v56 }
 0x586   : > { %5270 = vmatpush1.bf16.msra.mxu1 %v5269_v12 }
 0x587   : > { %5280 = vmatprep.subr.bf16.mxu1 %v5279_v41 }
 0x588   : > { %4834 = vmatmul.mubr.msk.f32.gmra.mrb[108].mxu1 %vm1950_vm2, %v7002_v49  ;;  %4898 = vmatmul.mubr.msk.f32.gmra.mrb[88].mxu0 %vm1950_vm2, %v7038_v43 }
 0x589   : > { %3179 = vmatprep.mubr.f32.mxu1 %v5639_v56  ;;  %3888 = vmatprep.mubr.f32.mxu0 %v5639_v56 }
 0x58c   : > { %4835 = vmatmul.mubr.msk.f32.gmra.mrb[110].mxu1 %vm1950_vm2, %v7011_v5  ;;  %4899 = vmatmul.mubr.msk.f32.gmra.mrb[90].mxu0 %vm1950_vm2, %v7047_v59 }
 0x58d   : > { %3185 = vmatprep.mubr.f32.mxu1 %v5639_v56  ;;  %3894 = vmatprep.mubr.f32.mxu0 %v5639_v56 }
 0x590   : > { %4836 = vmatmul.mubr.msk.f32.gmra.mrb[112].mxu1 %vm1950_vm2, %v7020_v8  ;;  %4900 = vmatmul.mubr.msk.f32.gmra.mrb[92].mxu0 %vm1950_vm2, %v7056_v29 }
 0x591   : > { %3191 = vmatprep.mubr.f32.mxu1 %v5639_v56  ;;  %3900 = vmatprep.mubr.f32.mxu0 %v5639_v56 }
 0x594   : > { %4837 = vmatmul.mubr.msk.f32.gmra.mrb[114].mxu1 %vm1950_vm2, %v7029_v9  ;;  %4901 = vmatmul.mubr.msk.f32.gmra.mrb[94].mxu0 %vm1950_vm2, %v7065_v35 }
 0x595   : > { %3197 = vmatprep.mubr.f32.mxu1 %v5639_v56  ;;  %3906 = vmatprep.mubr.f32.mxu0 %v5639_v56 }
 0x598   : > { %4838 = vmatmul.mubr.msk.f32.gmra.mrb[116].mxu1 %vm1950_vm2, %v7038_v43  ;;  %4902 = vmatmul.mubr.msk.f32.gmra.mrb[96].mxu0 %vm1950_vm2, %v7074_v46 }
 0x599   : > { %3203 = vmatprep.mubr.f32.mxu1 %v5639_v56  ;;  %3912 = vmatprep.mubr.f32.mxu0 %v5639_v56 }
 0x59c   : > { %4839 = vmatmul.mubr.msk.f32.gmra.mrb[118].mxu1 %vm1950_vm2, %v7047_v59  ;;  %4903 = vmatmul.mubr.msk.f32.gmra.mrb[98].mxu0 %vm1950_vm2, %v7087_v28 }
 0x59d   : > { %3209 = vmatprep.mubr.f32.mxu1 %v5639_v56  ;;  %4120 = vmatprep.mubr.f32.mxu0 %v5639_v56 }
 0x5a0   : > { %4840 = vmatmul.mubr.msk.f32.gmra.mrb[120].mxu1 %vm1950_vm2, %v7056_v29  ;;  %4916 = vmatmul.mubr.msk.f32.vlgmr.msra.gmra.mrb[100].mxu0 %vm1950_vm2, %v6968_v63 }
 0x5a1   : > { %3215 = vmatprep.mubr.f32.mxu1 %v5639_v56  ;;  %4126 = vmatprep.mubr.f32.mxu0 %v5639_v56 }
 0x5a4   : > { %4841 = vmatmul.mubr.msk.f32.gmra.mrb[122].mxu1 %vm1950_vm2, %v7065_v35  ;;  %4917 = vmatmul.mubr.msk.f32.gmra.mrb[102].mxu0 %vm1950_vm2, %v6985_v7 }
 0x5a5   : > { %3221 = vmatprep.mubr.f32.mxu1 %v5639_v56  ;;  %4132 = vmatprep.mubr.f32.mxu0 %v5639_v56 }
 0x5a8   : > { %4842 = vmatmul.mubr.msk.f32.gmra.mrb[124].mxu1 %vm1950_vm2, %v7074_v46  ;;  %4918 = vmatmul.mubr.msk.f32.gmra.mrb[104].mxu0 %vm1950_vm2, %v7002_v49 }
 0x5a9   : > { %3227 = vmatprep.mubr.f32.mxu1 %v5639_v56  ;;  %4138 = vmatprep.mubr.f32.mxu0 %v5639_v56 }
 0x5ac   : > { %4843 = vmatmul.mubr.msk.f32.gmra.mrb[126].mxu1 %vm1950_vm2, %v7087_v28  ;;  %4919 = vmatmul.mubr.msk.f32.gmra.mrb[106].mxu0 %vm1950_vm2, %v7011_v5 }
 0x5ad   : > { %3435 = vmatprep.mubr.f32.mxu1 %v5639_v56  ;;  %4144 = vmatprep.mubr.f32.mxu0 %v5639_v56 }
 0x5b0   : > { %4856 = vmatmul.mubr.msk.f32.vlgmr.msra.gmra.mrb[128].mxu1 %vm1950_vm2, %v6968_v63  ;;  %4920 = vmatmul.mubr.msk.f32.gmra.mrb[108].mxu0 %vm1950_vm2, %v7020_v8 }
 0x5b1   : > { %3441 = vmatprep.mubr.f32.mxu1 %v5639_v56  ;;  %4150 = vmatprep.mubr.f32.mxu0 %v5639_v56 }
 0x5b2   : > { %5282 = vmatpush1.bf16.msra.mxu1 %v5281_v36 }
 0x5b3   : > { %5284 = vmatprep.subr.bf16.mxu1 %v5283_v45 }
 0x5b4   : > { %4857 = vmatmul.mubr.msk.f32.gmra.mrb[130].mxu1 %vm1950_vm2, %v6985_v7  ;;  %4921 = vmatmul.mubr.msk.f32.gmra.mrb[110].mxu0 %vm1950_vm2, %v7029_v9 }
 0x5b5   : > { %3447 = vmatprep.mubr.f32.mxu1 %v5639_v56  ;;  %4156 = vmatprep.mubr.f32.mxu0 %v5639_v56 }
 0x5b6   : > { %5286 = vmatpush1.bf16.msra.mxu1 %v5285_v39 }
 0x5b7   : > { %5296 = vmatprep.subr.bf16.mxu1 %v5295_v15 }
 0x5b8   : > { %4858 = vmatmul.mubr.msk.f32.gmra.mrb[132].mxu1 %vm1950_vm2, %v7002_v49  ;;  %4922 = vmatmul.mubr.msk.f32.gmra.mrb[112].mxu0 %vm1950_vm2, %v7038_v43 }
 0x5b9   : > { %3453 = vmatprep.mubr.f32.mxu1 %v5639_v56  ;;  %4162 = vmatprep.mubr.f32.mxu0 %v5639_v56 }
 0x5bb   : > { %v2615_v24 = vpop.f32.mrb[28].mxu1  ;;  %v3026_v18 = vpop.f32.mrb[8].mxu0 }
 0x5bc   : > { %v2616_v48 = vadd.f32 %v2615_v24, %v7398_v27  ;;  %v3027_v20 = vadd.f32 %v3026_v18, %v7398_v27  ;;  %v2617_v6 = vpop.f32.mrb[29].mxu1  ;;  %v3028_v22 = vpop.f32.mrb[9].mxu0  ;;  %4859 = vmatmul.mubr.msk.f32.gmra.mrb[134].mxu1 %vm1950_vm2, %v7011_v5  ;;  %4923 = vmatmul.mubr.msk.f32.gmra.mrb[114].mxu0 %vm1950_vm2, %v7047_v59 }
 0x5bd   : > { %v2618_v55 = vadd.f32 %v2617_v6, %v7398_v27  ;;  %v3029_v44 = vadd.f32 %v3028_v22, %v7398_v27  ;;  %3459 = vmatprep.mubr.f32.mxu1 %v5639_v56  ;;  %4168 = vmatprep.mubr.f32.mxu0 %v5639_v56 }
 0x5be   : > { %4318 = vst [vmem:[%s7412_s7] sm:$0xff] %v2616_v48  ;;  %4324 = vst [vmem:[%s7412_s7 + $0x30] sm:$0xff] %v3027_v20  ;;  %v7488_v20 = vpop.permute.xlu1 %2485 }
 0x5bf   : > { %4319 = vst [vmem:[%s7412_s7 + $0x8] sm:$0xff] %v2618_v55  ;;  %4325 = vst [vmem:[%s7412_s7 + $0x38] sm:$0xff] %v3029_v44  ;;  %v2621_v38 = vpop.f32.mrb[30].mxu1  ;;  %v3032_v23 = vpop.f32.mrb[10].mxu0 }
 0x5c0   : > { %v2622_v40 = vadd.f32 %v2621_v38, %v7410_v25  ;;  %v3033_v54 = vadd.f32 %v3032_v23, %v7410_v25  ;;  %v2623_v0 = vpop.f32.mrb[31].mxu1  ;;  %v3034_v4 = vpop.f32.mrb[11].mxu0  ;;  %4860 = vmatmul.mubr.msk.f32.gmra.mrb[136].mxu1 %vm1950_vm2, %v7020_v8  ;;  %4924 = vmatmul.mubr.msk.f32.gmra.mrb[116].mxu0 %vm1950_vm2, %v7056_v29 }
 0x5c1   : > { %v2624_v37 = vadd.f32 %v2623_v0, %v7410_v25  ;;  %v3035_v1 = vadd.f32 %v3034_v4, %v7410_v25  ;;  %3465 = vmatprep.mubr.f32.mxu1 %v5639_v56  ;;  %4174 = vmatprep.mubr.f32.mxu0 %v5639_v56  ;;  %v7501_v0 = vpop.permute.xlu0 %2490 }
 0x5c2   : > { %4343 = vst [vmem:[%s7412_s7 + $0xc8] sm:$0xff] %v2622_v40  ;;  %4349 = vst [vmem:[%s7412_s7 + $0xf8] sm:$0xff] %v3033_v54 }
 0x5c3   : > { %4344 = vst [vmem:[%s7412_s7 + $0xd0] sm:$0xff] %v2624_v37  ;;  %4350 = vst [vmem:[%s7412_s7 + $0x100] sm:$0xff] %v3035_v1  ;;  %v2627_v30 = vpop.f32.mrb[32].mxu1  ;;  %v3038_v19 = vpop.f32.mrb[12].mxu0 }
 0x5c4   : > { %v2628_v61 = vadd.f32 %v2627_v30, %v7428_v33  ;;  %v3039_v3 = vadd.f32 %v3038_v19, %v7428_v33  ;;  %v2629_v57 = vpop.f32.mrb[33].mxu1  ;;  %v3040_v34 = vpop.f32.mrb[13].mxu0  ;;  %4861 = vmatmul.mubr.msk.f32.gmra.mrb[138].mxu1 %vm1950_vm2, %v7029_v9  ;;  %4925 = vmatmul.mubr.msk.f32.gmra.mrb[118].mxu0 %vm1950_vm2, %v7065_v35 }
 0x5c5   : > { %v2630_v62 = vadd.f32 %v2629_v57, %v7428_v33  ;;  %v3041_v32 = vadd.f32 %v3040_v34, %v7428_v33  ;;  %3471 = vmatprep.mubr.f32.mxu1 %v5639_v56  ;;  %4180 = vmatprep.mubr.f32.mxu0 %v5639_v56  ;;  %v7514_v34 = vpop.permute.xlu1 %2495 }
 0x5c6   : > { %4368 = vst [vmem:[%s7412_s7 + $0x190] sm:$0xff] %v2628_v61  ;;  %4374 = vst [vmem:[%s7412_s7 + $0x1c0] sm:$0xff] %v3039_v3 }
 0x5c7   : > { %4369 = vst [vmem:[%s7412_s7 + $0x198] sm:$0xff] %v2630_v62  ;;  %4375 = vst [vmem:[%s7412_s7 + $0x1c8] sm:$0xff] %v3041_v32  ;;  %v2633_v52 = vpop.f32.mrb[34].mxu1  ;;  %v3044_v16 = vpop.f32.mrb[14].mxu0 }
 0x5c8   : > { %v2634_v42 = vadd.f32 %v2633_v52, %v7444_v14  ;;  %v3045_v47 = vadd.f32 %v3044_v16, %v7444_v14  ;;  %v2635_v50 = vpop.f32.mrb[35].mxu1  ;;  %v3046_v60 = vpop.f32.mrb[15].mxu0  ;;  %4862 = vmatmul.mubr.msk.f32.gmra.mrb[140].mxu1 %vm1950_vm2, %v7038_v43  ;;  %4926 = vmatmul.mubr.msk.f32.gmra.mrb[120].mxu0 %vm1950_vm2, %v7074_v46 }
 0x5c9   : > { %v2636_v31 = vadd.f32 %v2635_v50, %v7444_v14  ;;  %v3047_v12 = vadd.f32 %v3046_v60, %v7444_v14  ;;  %3477 = vmatprep.mubr.f32.mxu1 %v5639_v56  ;;  %4186 = vmatprep.mubr.f32.mxu0 %v5639_v56 }
 0x5ca   : > { %4393 = vst [vmem:[%s7412_s7 + $0x258] sm:$0xff] %v2634_v42  ;;  %4399 = vst [vmem:[%s7412_s7 + $0x288] sm:$0xff] %v3045_v47 }
 0x5cb   : > { %4394 = vst [vmem:[%s7412_s7 + $0x260] sm:$0xff] %v2636_v31  ;;  %4400 = vst [vmem:[%s7412_s7 + $0x290] sm:$0xff] %v3047_v12  ;;  %v2639_v26 = vpop.f32.mrb[36].mxu1  ;;  %v3050_v41 = vpop.f32.mrb[16].mxu0  ;;  %v8778_v31 = vld [vmem:[#allocation43_spill] sm:$0xff]  ;;  %v8779_v12 = vld [vmem:[#allocation93_spill] sm:$0xff] }
 0x5cc   : > { %v2640_v17 = vadd.f32 %v2639_v26, %v7460_v2  ;;  %v3051_v21 = vadd.f32 %v3050_v41, %v7460_v2  ;;  %v2641_v36 = vpop.f32.mrb[37].mxu1  ;;  %v3052_v58 = vpop.f32.mrb[17].mxu0  ;;  %4863 = vmatmul.mubr.msk.f32.gmra.mrb[142].mxu1 %vm1950_vm2, %v7047_v59  ;;  %4927 = vmatmul.mubr.msk.f32.gmra.mrb[122].mxu0 %vm1950_vm2, %v7087_v28  ;;  %v5297_v26 = vpack.c.bf16 %v8779_v12, %v8778_v31 }
 0x5cd   : > { %v2642_v11 = vadd.f32 %v2641_v36, %v7460_v2  ;;  %v3053_v45 = vadd.f32 %v3052_v58, %v7460_v2  ;;  %3483 = vmatprep.mubr.f32.mxu1 %v5639_v56  ;;  %v7529_v41 = vpop.permute.xlu0 %2500 }
 0x5ce   : > { %4418 = vst [vmem:[%s7412_s7 + $0x320] sm:$0xff] %v2640_v17  ;;  %4424 = vst [vmem:[%s7412_s7 + $0x350] sm:$0xff] %v3051_v21  ;;  %v8780_v17 = vld [vmem:[#allocation69_spill] sm:$0xff]  ;;  %v8781_v21 = vld [vmem:[#allocation107_spill] sm:$0xff] }
 0x5cf   : > { %4419 = vst [vmem:[%s7412_s7 + $0x328] sm:$0xff] %v2642_v11  ;;  %4425 = vst [vmem:[%s7412_s7 + $0x358] sm:$0xff] %v3053_v45  ;;  %v2645_v53 = vpop.f32.mrb[38].mxu1  ;;  %v3056_v39 = vpop.f32.mrb[18].mxu0  ;;  %v5299_v36 = vpack.c.bf16 %v8781_v21, %v8780_v17 }
 0x5d0   : > { %v2646_v13 = vadd.f32 %v2645_v53, %v7475_v10  ;;  %v3057_v51 = vadd.f32 %v3056_v39, %v7475_v10  ;;  %v2647_v15 = vpop.f32.mrb[39].mxu1  ;;  %v3058_v24 = vpop.f32.mrb[19].mxu0  ;;  %4864 = vmatmul.mubr.msk.f32.gmra.mrb[144].mxu1 %vm1950_vm2, %v7056_v29 }
 0x5d1   : > { %v2648_v18 = vadd.f32 %v2647_v15, %v7475_v10  ;;  %v3059_v48 = vadd.f32 %v3058_v24, %v7475_v10  ;;  %3489 = vmatprep.mubr.f32.mxu1 %v5639_v56  ;;  %v8782_v24 = vld [vmem:[#allocation65_spill] sm:$0xff] }
 0x5d2   : > { %4443 = vst [vmem:[%s7412_s7 + $0x3e8] sm:$0xff] %v2646_v13  ;;  %4449 = vst [vmem:[%s7412_s7 + $0x418] sm:$0xff] %v3057_v51 }
 0x5d3   : > { %4444 = vst [vmem:[%s7412_s7 + $0x3f0] sm:$0xff] %v2648_v18  ;;  %4450 = vst [vmem:[%s7412_s7 + $0x420] sm:$0xff] %v3059_v48  ;;  %v2651_v6 = vpop.f32.mrb[40].mxu1  ;;  %v3062_v22 = vpop.f32.mrb[20].mxu0  ;;  %v8783_v18 = vld [vmem:[#allocation106_spill] sm:$0xff] }
 0x5d4   : > { %v2652_v55 = vadd.f32 %v2651_v6, %v7488_v20  ;;  %v3063_v44 = vadd.f32 %v3062_v22, %v7488_v20  ;;  %v2653_v38 = vpop.f32.mrb[41].mxu1  ;;  %v3064_v23 = vpop.f32.mrb[21].mxu0  ;;  %4865 = vmatmul.mubr.msk.f32.gmra.mrb[146].mxu1 %vm1950_vm2, %v7065_v35  ;;  %v5301_v48 = vpack.c.bf16 %v8783_v18, %v8782_v24  ;;  %v8784_v22 = vld [vmem:[#allocation51_spill] sm:$0xff] }
 0x5d5   : > { %v2654_v40 = vadd.f32 %v2653_v38, %v7488_v20  ;;  %v3065_v54 = vadd.f32 %v3064_v23, %v7488_v20  ;;  %3495 = vmatprep.mubr.f32.mxu1 %v5639_v56  ;;  %v7546_v6 = vpop.permute.xlu1 %2505 }
 0x5d6   : > { %4468 = vst [vmem:[%s7412_s7 + $0x4b0] sm:$0xff] %v2652_v55  ;;  %4474 = vst [vmem:[%s7412_s7 + $0x4e0] sm:$0xff] %v3063_v44  ;;  %v8785_v55 = vld [vmem:[#allocation99_spill] sm:$0xff] }
 0x5d7   : > { %4469 = vst [vmem:[%s7412_s7 + $0x4b8] sm:$0xff] %v2654_v40  ;;  %4475 = vst [vmem:[%s7412_s7 + $0x4e8] sm:$0xff] %v3065_v54  ;;  %v2657_v4 = vpop.f32.mrb[42].mxu1  ;;  %v3068_v37 = vpop.f32.mrb[22].mxu0  ;;  %v7552_v44 = vpack.c.bf16 %v8785_v55, %v8784_v22 }
 0x5d8   : > { %v2658_v1 = vadd.f32 %v2657_v4, %v7501_v0  ;;  %v3069_v30 = vadd.f32 %v3068_v37, %v7501_v0  ;;  %v2659_v19 = vpop.f32.mrb[43].mxu1  ;;  %v3070_v61 = vpop.f32.mrb[23].mxu0  ;;  %4866 = vmatmul.mubr.msk.f32.gmra.mrb[148].mxu1 %vm1950_vm2, %v7074_v46 }
 0x5d9   : > { %v2660_v3 = vadd.f32 %v2659_v19, %v7501_v0  ;;  %v3071_v57 = vadd.f32 %v3070_v61, %v7501_v0  ;;  %3501 = vmatprep.mubr.f32.mxu1 %v5639_v56  ;;  %v7563_v19 = vpop.permute.xlu0 %2510 }
 0x5da   : > { %4493 = vst [vmem:[%s7412_s7 + $0x578] sm:$0xff] %v2658_v1  ;;  %4499 = vst [vmem:[%s7412_s7 + $0x5a8] sm:$0xff] %v3069_v30 }
 0x5db   : > { %4494 = vst [vmem:[%s7412_s7 + $0x580] sm:$0xff] %v2660_v3  ;;  %4500 = vst [vmem:[%s7412_s7 + $0x5b0] sm:$0xff] %v3071_v57  ;;  %v2663_v62 = vpop.f32.mrb[44].mxu1  ;;  %v3074_v32 = vpop.f32.mrb[24].mxu0 }
 0x5dc   : > { %v2664_v52 = vadd.f32 %v2663_v62, %v7514_v34  ;;  %v3075_v16 = vadd.f32 %v3074_v32, %v7514_v34  ;;  %v2665_v42 = vpop.f32.mrb[45].mxu1  ;;  %v3076_v47 = vpop.f32.mrb[25].mxu0  ;;  %4867 = vmatmul.mubr.msk.f32.gmra.mrb[150].mxu1 %vm1950_vm2, %v7087_v28 }
 0x5dd   : > { %v2666_v50 = vadd.f32 %v2665_v42, %v7514_v34  ;;  %v3077_v60 = vadd.f32 %v3076_v47, %v7514_v34  ;;  %3709 = vmatprep.mubr.f32.mxu1 %v5639_v56 }
 0x5de   : > { %4518 = vst [vmem:[%s7412_s7 + $0x640] sm:$0xff] %v2664_v52  ;;  %4524 = vst [vmem:[%s7412_s7 + $0x670] sm:$0xff] %v3075_v16 }
 0x5df   : > { %4519 = vst [vmem:[%s7412_s7 + $0x648] sm:$0xff] %v2666_v50  ;;  %4525 = vst [vmem:[%s7412_s7 + $0x678] sm:$0xff] %v3077_v60  ;;  %v2669_v58 = vpop.f32.mrb[46].mxu1  ;;  %v3080_v11 = vpop.f32.mrb[26].mxu0 }
 0x5e0   : > { %v2670_v45 = vadd.f32 %v2669_v58, %v7529_v41  ;;  %v3081_v53 = vadd.f32 %v3080_v11, %v7529_v41  ;;  %v2671_v39 = vpop.f32.mrb[47].mxu1  ;;  %v3082_v13 = vpop.f32.mrb[27].mxu0  ;;  %4880 = vmatmul.mubr.msk.f32.vlgmr.msra.gmra.mrb[152].mxu1 %vm1950_vm2, %v6968_v63 }
 0x5e1   : > { %v2672_v51 = vadd.f32 %v2671_v39, %v7529_v41  ;;  %v3083_v15 = vadd.f32 %v3082_v13, %v7529_v41  ;;  %3715 = vmatprep.mubr.f32.mxu1 %v5639_v56  ;;  %5298 = vmatpush1.bf16.msra.mxu1 %v5297_v26 }
 0x5e2   : > { %4543 = vst [vmem:[%s7412_s7 + $0x708] sm:$0xff] %v2670_v45  ;;  %4549 = vst [vmem:[%s7412_s7 + $0x738] sm:$0xff] %v3081_v53  ;;  %5300 = vmatprep.subr.bf16.mxu1 %v5299_v36 }
 0x5e3   : > { %4544 = vst [vmem:[%s7412_s7 + $0x710] sm:$0xff] %v2672_v51  ;;  %4550 = vst [vmem:[%s7412_s7 + $0x740] sm:$0xff] %v3083_v15  ;;  %v2675_v38 = vpop.f32.mrb[48].mxu1  ;;  %v3300_v23 = vpop.f32.mrb[28].mxu0 }
 0x5e4   : > { %v2676_v40 = vadd.f32 %v2675_v38, %v7546_v6  ;;  %v3301_v54 = vadd.f32 %v3300_v23, %v7398_v27  ;;  %v2677_v4 = vpop.f32.mrb[49].mxu1  ;;  %v3302_v37 = vpop.f32.mrb[29].mxu0  ;;  %4881 = vmatmul.mubr.msk.f32.gmra.mrb[154].mxu1 %vm1950_vm2, %v6985_v7 }
 0x5e5   : > { %v2678_v1 = vadd.f32 %v2677_v4, %v7546_v6  ;;  %v3303_v30 = vadd.f32 %v3302_v37, %v7398_v27  ;;  %3721 = vmatprep.mubr.f32.mxu1 %v5639_v56  ;;  %5302 = vmatpush1.bf16.msra.mxu1 %v5301_v48 }
 0x5e6   : > { %4568 = vst [vmem:[%s7412_s7 + $0x7d0] sm:$0xff] %v2676_v40  ;;  %4328 = vst [vmem:[%s7412_s7 + $0x50] sm:$0xff] %v3301_v54  ;;  %5312 = vmatprep.subr.bf16.mxu1 %v7552_v44 }
 0x5e7   : > { %4569 = vst [vmem:[%s7412_s7 + $0x7d8] sm:$0xff] %v2678_v1  ;;  %4329 = vst [vmem:[%s7412_s7 + $0x58] sm:$0xff] %v3303_v30  ;;  %v2681_v61 = vpop.f32.mrb[50].mxu1  ;;  %v3306_v3 = vpop.f32.mrb[30].mxu0 }
 0x5e8   : > { %v2682_v57 = vadd.f32 %v2681_v61, %v7563_v19  ;;  %v3307_v62 = vadd.f32 %v3306_v3, %v7410_v25  ;;  %v2683_v32 = vpop.f32.mrb[51].mxu1  ;;  %v3308_v52 = vpop.f32.mrb[31].mxu0  ;;  %4882 = vmatmul.mubr.msk.f32.gmra.mrb[156].mxu1 %vm1950_vm2, %v7002_v49 }
 0x5e9   : > { %v2684_v16 = vadd.f32 %v2683_v32, %v7563_v19  ;;  %v3309_v42 = vadd.f32 %v3308_v52, %v7410_v25  ;;  %3727 = vmatprep.mubr.f32.mxu1 %v5639_v56 }
 0x5ea   : > { %4593 = vst [vmem:[%s7412_s7 + $0x898] sm:$0xff] %v2682_v57  ;;  %4353 = vst [vmem:[%s7412_s7 + $0x118] sm:$0xff] %v3307_v62 }
 0x5eb   : > { %4594 = vst [vmem:[%s7412_s7 + $0x8a0] sm:$0xff] %v2684_v16  ;;  %4354 = vst [vmem:[%s7412_s7 + $0x120] sm:$0xff] %v3309_v42  ;;  %v2752_v47 = vpop.f32.mrb[52].mxu1  ;;  %v3312_v50 = vpop.f32.mrb[32].mxu0 }
 0x5ec   : > { %v2753_v60 = vadd.f32 %v2752_v47, %v7398_v27  ;;  %v3313_v31 = vadd.f32 %v3312_v50, %v7428_v33  ;;  %v2754_v12 = vpop.f32.mrb[53].mxu1  ;;  %v3314_v26 = vpop.f32.mrb[33].mxu0  ;;  %4883 = vmatmul.mubr.msk.f32.gmra.mrb[158].mxu1 %vm1950_vm2, %v7011_v5 }
 0x5ed   : > { %v2755_v17 = vadd.f32 %v2754_v12, %v7398_v27  ;;  %v3315_v21 = vadd.f32 %v3314_v26, %v7428_v33  ;;  %3733 = vmatprep.mubr.f32.mxu1 %v5639_v56 }
 0x5ee   : > { %4320 = vst [vmem:[%s7412_s7 + $0x10] sm:$0xff] %v2753_v60  ;;  %4378 = vst [vmem:[%s7412_s7 + $0x1e0] sm:$0xff] %v3313_v31 }
 0x5ef   : > { %4321 = vst [vmem:[%s7412_s7 + $0x18] sm:$0xff] %v2755_v17  ;;  %4379 = vst [vmem:[%s7412_s7 + $0x1e8] sm:$0xff] %v3315_v21  ;;  %v2758_v36 = vpop.f32.mrb[54].mxu1  ;;  %v3318_v58 = vpop.f32.mrb[34].mxu0 }
 0x5f0   : > { %v2759_v11 = vadd.f32 %v2758_v36, %v7410_v25  ;;  %v3319_v45 = vadd.f32 %v3318_v58, %v7444_v14  ;;  %v2760_v53 = vpop.f32.mrb[55].mxu1  ;;  %v3320_v39 = vpop.f32.mrb[35].mxu0  ;;  %4884 = vmatmul.mubr.msk.f32.gmra.mrb[160].mxu1 %vm1950_vm2, %v7020_v8 }
 0x5f1   : > { %v2761_v13 = vadd.f32 %v2760_v53, %v7410_v25  ;;  %v3321_v51 = vadd.f32 %v3320_v39, %v7444_v14  ;;  %3739 = vmatprep.mubr.f32.mxu1 %v5639_v56 }
 0x5f2   : > { %4345 = vst [vmem:[%s7412_s7 + $0xd8] sm:$0xff] %v2759_v11  ;;  %4403 = vst [vmem:[%s7412_s7 + $0x2a8] sm:$0xff] %v3319_v45 }
 0x5f3   : > { %4346 = vst [vmem:[%s7412_s7 + $0xe0] sm:$0xff] %v2761_v13  ;;  %4404 = vst [vmem:[%s7412_s7 + $0x2b0] sm:$0xff] %v3321_v51  ;;  %v2764_v15 = vpop.f32.mrb[56].mxu1  ;;  %v3324_v24 = vpop.f32.mrb[36].mxu0 }
 0x5f4   : > { %v2765_v18 = vadd.f32 %v2764_v15, %v7428_v33  ;;  %v3325_v48 = vadd.f32 %v3324_v24, %v7460_v2  ;;  %v2766_v22 = vpop.f32.mrb[57].mxu1  ;;  %v3326_v55 = vpop.f32.mrb[37].mxu0  ;;  %4885 = vmatmul.mubr.msk.f32.gmra.mrb[162].mxu1 %vm1950_vm2, %v7029_v9 }
 0x5f5   : > { %v2767_v38 = vadd.f32 %v2766_v22, %v7428_v33  ;;  %v3327_v23 = vadd.f32 %v3326_v55, %v7460_v2  ;;  %3745 = vmatprep.mubr.f32.mxu1 %v5639_v56 }
 0x5f6   : > { %4370 = vst [vmem:[%s7412_s7 + $0x1a0] sm:$0xff] %v2765_v18  ;;  %4428 = vst [vmem:[%s7412_s7 + $0x370] sm:$0xff] %v3325_v48 }
 0x5f7   : > { %4371 = vst [vmem:[%s7412_s7 + $0x1a8] sm:$0xff] %v2767_v38  ;;  %4429 = vst [vmem:[%s7412_s7 + $0x378] sm:$0xff] %v3327_v23  ;;  %v2770_v40 = vpop.f32.mrb[58].mxu1  ;;  %v3330_v54 = vpop.f32.mrb[38].mxu0 }
 0x5f8   : > { %v2771_v4 = vadd.f32 %v2770_v40, %v7444_v14  ;;  %v3331_v37 = vadd.f32 %v3330_v54, %v7475_v10  ;;  %v2772_v1 = vpop.f32.mrb[59].mxu1  ;;  %v3332_v30 = vpop.f32.mrb[39].mxu0  ;;  %4886 = vmatmul.mubr.msk.f32.gmra.mrb[164].mxu1 %vm1950_vm2, %v7038_v43 }
 0x5f9   : > { %v2773_v61 = vadd.f32 %v2772_v1, %v7444_v14  ;;  %v3333_v3 = vadd.f32 %v3332_v30, %v7475_v10  ;;  %3751 = vmatprep.mubr.f32.mxu1 %v5639_v56 }
 0x5fa   : > { %4395 = vst [vmem:[%s7412_s7 + $0x268] sm:$0xff] %v2771_v4  ;;  %4453 = vst [vmem:[%s7412_s7 + $0x438] sm:$0xff] %v3331_v37 }
 0x5fb   : > { %4396 = vst [vmem:[%s7412_s7 + $0x270] sm:$0xff] %v2773_v61  ;;  %4454 = vst [vmem:[%s7412_s7 + $0x440] sm:$0xff] %v3333_v3  ;;  %v2776_v57 = vpop.f32.mrb[60].mxu1  ;;  %v3336_v62 = vpop.f32.mrb[40].mxu0 }
 0x5fc   : > { %v2777_v32 = vadd.f32 %v2776_v57, %v7460_v2  ;;  %v3337_v52 = vadd.f32 %v3336_v62, %v7488_v20  ;;  %v2778_v16 = vpop.f32.mrb[61].mxu1  ;;  %v3338_v42 = vpop.f32.mrb[41].mxu0  ;;  %4887 = vmatmul.mubr.msk.f32.gmra.mrb[166].mxu1 %vm1950_vm2, %v7047_v59 }
 0x5fd   : > { %v2779_v47 = vadd.f32 %v2778_v16, %v7460_v2  ;;  %v3339_v50 = vadd.f32 %v3338_v42, %v7488_v20  ;;  %3757 = vmatprep.mubr.f32.mxu1 %v5639_v56 }
 0x5fe   : > { %4420 = vst [vmem:[%s7412_s7 + $0x330] sm:$0xff] %v2777_v32  ;;  %4478 = vst [vmem:[%s7412_s7 + $0x500] sm:$0xff] %v3337_v52  ;;  %v8786_v32 = vld [vmem:[#allocation73_spill] sm:$0xff] }
 0x5ff   : > { %4421 = vst [vmem:[%s7412_s7 + $0x338] sm:$0xff] %v2779_v47  ;;  %4479 = vst [vmem:[%s7412_s7 + $0x508] sm:$0xff] %v3339_v50  ;;  %v2782_v60 = vpop.f32.mrb[62].mxu1  ;;  %v3342_v31 = vpop.f32.mrb[42].mxu0  ;;  %v8787_v52 = vld [vmem:[#allocation109_spill] sm:$0xff] }
 0x600   : > { %v2783_v12 = vadd.f32 %v2782_v60, %v7475_v10  ;;  %v3343_v26 = vadd.f32 %v3342_v31, %v7501_v0  ;;  %v2784_v17 = vpop.f32.mrb[63].mxu1  ;;  %v3344_v21 = vpop.f32.mrb[43].mxu0  ;;  %4888 = vmatmul.mubr.msk.f32.gmra.mrb[168].mxu1 %vm1950_vm2, %v7056_v29  ;;  %v5315_v16 = vpack.c.bf16 %v8787_v52, %v8786_v32 }
 0x601   : > { %v2785_v36 = vadd.f32 %v2784_v17, %v7475_v10  ;;  %v3345_v58 = vadd.f32 %v3344_v21, %v7501_v0  ;;  %3763 = vmatprep.mubr.f32.mxu1 %v5639_v56 }
 0x602   : > { %4445 = vst [vmem:[%s7412_s7 + $0x3f8] sm:$0xff] %v2783_v12  ;;  %4503 = vst [vmem:[%s7412_s7 + $0x5c8] sm:$0xff] %v3343_v26 }
 0x603   : > { %4446 = vst [vmem:[%s7412_s7 + $0x400] sm:$0xff] %v2785_v36  ;;  %4504 = vst [vmem:[%s7412_s7 + $0x5d0] sm:$0xff] %v3345_v58  ;;  %v2788_v11 = vpop.f32.mrb[64].mxu1  ;;  %v3348_v45 = vpop.f32.mrb[44].mxu0 }
 0x604   : > { %v2789_v53 = vadd.f32 %v2788_v11, %v7488_v20  ;;  %v3349_v39 = vadd.f32 %v3348_v45, %v7514_v34  ;;  %v2790_v13 = vpop.f32.mrb[65].mxu1  ;;  %v3350_v51 = vpop.f32.mrb[45].mxu0  ;;  %4889 = vmatmul.mubr.msk.f32.gmra.mrb[170].mxu1 %vm1950_vm2, %v7065_v35 }
 0x605   : > { %v2791_v15 = vadd.f32 %v2790_v13, %v7488_v20  ;;  %v3351_v24 = vadd.f32 %v3350_v51, %v7514_v34  ;;  %3769 = vmatprep.mubr.f32.mxu1 %v5639_v56 }
 0x606   : > { %4470 = vst [vmem:[%s7412_s7 + $0x4c0] sm:$0xff] %v2789_v53  ;;  %4528 = vst [vmem:[%s7412_s7 + $0x690] sm:$0xff] %v3349_v39 }
 0x607   : > { %4471 = vst [vmem:[%s7412_s7 + $0x4c8] sm:$0xff] %v2791_v15  ;;  %4529 = vst [vmem:[%s7412_s7 + $0x698] sm:$0xff] %v3351_v24  ;;  %v2794_v18 = vpop.f32.mrb[66].mxu1  ;;  %v3354_v48 = vpop.f32.mrb[46].mxu0 }
 0x608   : > { %v2795_v22 = vadd.f32 %v2794_v18, %v7501_v0  ;;  %v3355_v55 = vadd.f32 %v3354_v48, %v7529_v41  ;;  %v2796_v38 = vpop.f32.mrb[67].mxu1  ;;  %v3356_v23 = vpop.f32.mrb[47].mxu0  ;;  %4890 = vmatmul.mubr.msk.f32.gmra.mrb[172].mxu1 %vm1950_vm2, %v7074_v46 }
 0x609   : > { %v2797_v40 = vadd.f32 %v2796_v38, %v7501_v0  ;;  %v3357_v54 = vadd.f32 %v3356_v23, %v7529_v41  ;;  %3775 = vmatprep.mubr.f32.mxu1 %v5639_v56 }
 0x60a   : > { %4495 = vst [vmem:[%s7412_s7 + $0x588] sm:$0xff] %v2795_v22  ;;  %4553 = vst [vmem:[%s7412_s7 + $0x758] sm:$0xff] %v3355_v55 }
 0x60b   : > { %4496 = vst [vmem:[%s7412_s7 + $0x590] sm:$0xff] %v2797_v40  ;;  %4554 = vst [vmem:[%s7412_s7 + $0x760] sm:$0xff] %v3357_v54  ;;  %v2800_v4 = vpop.f32.mrb[68].mxu1  ;;  %v3360_v37 = vpop.f32.mrb[48].mxu0 }
 0x60c   : > { %v2801_v1 = vadd.f32 %v2800_v4, %v7514_v34  ;;  %v3361_v30 = vadd.f32 %v3360_v37, %v7546_v6  ;;  %v2802_v61 = vpop.f32.mrb[69].mxu1  ;;  %v3362_v3 = vpop.f32.mrb[49].mxu0  ;;  %4891 = vmatmul.mubr.msk.f32.gmra.mrb[174].mxu1 %vm1950_vm2, %v7087_v28 }
 0x60d   : > { %v2803_v57 = vadd.f32 %v2802_v61, %v7514_v34  ;;  %v3363_v62 = vadd.f32 %v3362_v3, %v7546_v6  ;;  %3983 = vmatprep.mubr.f32.mxu1 %v5639_v56 }
 0x60e   : > { %4520 = vst [vmem:[%s7412_s7 + $0x650] sm:$0xff] %v2801_v1  ;;  %4578 = vst [vmem:[%s7412_s7 + $0x820] sm:$0xff] %v3361_v30 }
 0x60f   : > { %4521 = vst [vmem:[%s7412_s7 + $0x658] sm:$0xff] %v2803_v57  ;;  %4579 = vst [vmem:[%s7412_s7 + $0x828] sm:$0xff] %v3363_v62  ;;  %v2806_v42 = vpop.f32.mrb[70].mxu1  ;;  %v3366_v47 = vpop.f32.mrb[50].mxu0 }
 0x610   : > { %v2807_v50 = vadd.f32 %v2806_v42, %v7529_v41  ;;  %v3367_v60 = vadd.f32 %v3366_v47, %v7563_v19  ;;  %v2808_v31 = vpop.f32.mrb[71].mxu1  ;;  %v3368_v12 = vpop.f32.mrb[51].mxu0  ;;  %4904 = vmatmul.mubr.msk.f32.vlgmr.msra.gmra.mrb[176].mxu1 %vm1950_vm2, %v6968_v63 }
 0x611   : > { %v2809_v26 = vadd.f32 %v2808_v31, %v7529_v41  ;;  %v3369_v17 = vadd.f32 %v3368_v12, %v7563_v19  ;;  %3989 = vmatprep.mubr.f32.mxu1 %v5639_v56  ;;  %5314 = vmatpush3.bf16.msra.mxu1 %v7552_v44 }
 0x612   : > { %4545 = vst [vmem:[%s7412_s7 + $0x718] sm:$0xff] %v2807_v50  ;;  %4603 = vst [vmem:[%s7412_s7 + $0x8e8] sm:$0xff] %v3367_v60  ;;  %5316 = vmatprep.subr.bf16.mxu1 %v5315_v16 }
 0x613   : > { %4546 = vst [vmem:[%s7412_s7 + $0x720] sm:$0xff] %v2809_v26  ;;  %4604 = vst [vmem:[%s7412_s7 + $0x8f0] sm:$0xff] %v3369_v17  ;;  %v2812_v21 = vpop.f32.mrb[72].mxu1  ;;  %v3574_v36 = vpop.f32.mrb[52].mxu0 }
 0x614   : > { %v2813_v58 = vadd.f32 %v2812_v21, %v7546_v6  ;;  %v3575_v11 = vadd.f32 %v3574_v36, %v7398_v27  ;;  %v2814_v45 = vpop.f32.mrb[73].mxu1  ;;  %v3576_v53 = vpop.f32.mrb[53].mxu0  ;;  %4905 = vmatmul.mubr.msk.f32.gmra.mrb[178].mxu1 %vm1950_vm2, %v6985_v7 }
 0x615   : > { %v2815_v44 = vadd.f32 %v2814_v45, %v7546_v6  ;;  %v3577_v39 = vadd.f32 %v3576_v53, %v7398_v27  ;;  %3995 = vmatprep.mubr.f32.mxu1 %v5639_v56  ;;  %5318 = vmatpush3.bf16.msra.mxu1 %v5315_v16 }
 0x616   : > { %4570 = vst [vmem:[%s7412_s7 + $0x7e0] sm:$0xff] %v2813_v58  ;;  %4332 = vst [vmem:[%s7412_s7 + $0x70] sm:$0xff] %v3575_v11 }
 0x617   : > { %4571 = vst [vmem:[%s7412_s7 + $0x7e8] sm:$0xff] %v2815_v44  ;;  %4333 = vst [vmem:[%s7412_s7 + $0x78] sm:$0xff] %v3577_v39  ;;  %v2818_v13 = vpop.f32.mrb[74].mxu1  ;;  %v3580_v51 = vpop.f32.mrb[54].mxu0 }
 0x618   : > { %v2819_v15 = vadd.f32 %v2818_v13, %v7563_v19  ;;  %v3581_v24 = vadd.f32 %v3580_v51, %v7410_v25  ;;  %v2820_v18 = vpop.f32.mrb[75].mxu1  ;;  %v3582_v48 = vpop.f32.mrb[55].mxu0  ;;  %4906 = vmatmul.mubr.msk.f32.gmra.mrb[180].mxu1 %vm1950_vm2, %v7002_v49 }
 0x619   : > { %v2821_v22 = vadd.f32 %v2820_v18, %v7563_v19  ;;  %v3583_v55 = vadd.f32 %v3582_v48, %v7410_v25  ;;  %4001 = vmatprep.mubr.f32.mxu1 %v5639_v56 }
 0x61a   : > { %4595 = vst [vmem:[%s7412_s7 + $0x8a8] sm:$0xff] %v2819_v15  ;;  %4357 = vst [vmem:[%s7412_s7 + $0x138] sm:$0xff] %v3581_v24 }
 0x61b   : > { %4596 = vst [vmem:[%s7412_s7 + $0x8b0] sm:$0xff] %v2821_v22  ;;  %4358 = vst [vmem:[%s7412_s7 + $0x140] sm:$0xff] %v3583_v55  ;;  %v2889_v38 = vpop.f32.mrb[76].mxu1  ;;  %v3586_v23 = vpop.f32.mrb[56].mxu0 }
 0x61c   : > { %v2890_v40 = vadd.f32 %v2889_v38, %v7398_v27  ;;  %v3587_v54 = vadd.f32 %v3586_v23, %v7428_v33  ;;  %v2891_v4 = vpop.f32.mrb[77].mxu1  ;;  %v3588_v37 = vpop.f32.mrb[57].mxu0  ;;  %4907 = vmatmul.mubr.msk.f32.gmra.mrb[182].mxu1 %vm1950_vm2, %v7011_v5 }
 0x61d   : > { %v2892_v1 = vadd.f32 %v2891_v4, %v7398_v27  ;;  %v3589_v30 = vadd.f32 %v3588_v37, %v7428_v33  ;;  %4007 = vmatprep.mubr.f32.mxu1 %v5639_v56 }
 0x61e   : > { %4322 = vst [vmem:[%s7412_s7 + $0x20] sm:$0xff] %v2890_v40  ;;  %4382 = vst [vmem:[%s7412_s7 + $0x200] sm:$0xff] %v3587_v54 }
 0x61f   : > { %4323 = vst [vmem:[%s7412_s7 + $0x28] sm:$0xff] %v2892_v1  ;;  %4383 = vst [vmem:[%s7412_s7 + $0x208] sm:$0xff] %v3589_v30  ;;  %v2895_v61 = vpop.f32.mrb[78].mxu1  ;;  %v3592_v3 = vpop.f32.mrb[58].mxu0 }
 0x620   : > { %v2896_v57 = vadd.f32 %v2895_v61, %v7410_v25  ;;  %v3593_v62 = vadd.f32 %v3592_v3, %v7444_v14  ;;  %v2897_v32 = vpop.f32.mrb[79].mxu1  ;;  %v3594_v52 = vpop.f32.mrb[59].mxu0  ;;  %4908 = vmatmul.mubr.msk.f32.gmra.mrb[184].mxu1 %vm1950_vm2, %v7020_v8 }
 0x621   : > { %v2898_v16 = vadd.f32 %v2897_v32, %v7410_v25  ;;  %v3595_v42 = vadd.f32 %v3594_v52, %v7444_v14  ;;  %4013 = vmatprep.mubr.f32.mxu1 %v5639_v56 }
 0x622   : > { %4347 = vst [vmem:[%s7412_s7 + $0xe8] sm:$0xff] %v2896_v57  ;;  %4407 = vst [vmem:[%s7412_s7 + $0x2c8] sm:$0xff] %v3593_v62 }
 0x623   : > { %4348 = vst [vmem:[%s7412_s7 + $0xf0] sm:$0xff] %v2898_v16  ;;  %4408 = vst [vmem:[%s7412_s7 + $0x2d0] sm:$0xff] %v3595_v42  ;;  %v2901_v47 = vpop.f32.mrb[80].mxu1  ;;  %v3598_v50 = vpop.f32.mrb[60].mxu0 }
 0x624   : > { %v2902_v60 = vadd.f32 %v2901_v47, %v7428_v33  ;;  %v3599_v31 = vadd.f32 %v3598_v50, %v7460_v2  ;;  %v2903_v12 = vpop.f32.mrb[81].mxu1  ;;  %v3600_v26 = vpop.f32.mrb[61].mxu0  ;;  %4909 = vmatmul.mubr.msk.f32.gmra.mrb[186].mxu1 %vm1950_vm2, %v7029_v9 }
 0x625   : > { %v2904_v17 = vadd.f32 %v2903_v12, %v7428_v33  ;;  %v3601_v21 = vadd.f32 %v3600_v26, %v7460_v2  ;;  %4019 = vmatprep.mubr.f32.mxu1 %v5639_v56 }
 0x626   : > { %4372 = vst [vmem:[%s7412_s7 + $0x1b0] sm:$0xff] %v2902_v60  ;;  %4432 = vst [vmem:[%s7412_s7 + $0x390] sm:$0xff] %v3599_v31 }
 0x627   : > { %4373 = vst [vmem:[%s7412_s7 + $0x1b8] sm:$0xff] %v2904_v17  ;;  %4433 = vst [vmem:[%s7412_s7 + $0x398] sm:$0xff] %v3601_v21  ;;  %v2907_v36 = vpop.f32.mrb[82].mxu1  ;;  %v3604_v58 = vpop.f32.mrb[62].mxu0 }
 0x628   : > { %v2908_v11 = vadd.f32 %v2907_v36, %v7444_v14  ;;  %v3605_v45 = vadd.f32 %v3604_v58, %v7475_v10  ;;  %v2909_v53 = vpop.f32.mrb[83].mxu1  ;;  %v3606_v44 = vpop.f32.mrb[63].mxu0  ;;  %4910 = vmatmul.mubr.msk.f32.gmra.mrb[188].mxu1 %vm1950_vm2, %v7038_v43 }
 0x629   : > { %v2910_v39 = vadd.f32 %v2909_v53, %v7444_v14  ;;  %v3607_v13 = vadd.f32 %v3606_v44, %v7475_v10  ;;  %4025 = vmatprep.mubr.f32.mxu1 %v5639_v56 }
 0x62a   : > { %4397 = vst [vmem:[%s7412_s7 + $0x278] sm:$0xff] %v2908_v11  ;;  %4457 = vst [vmem:[%s7412_s7 + $0x458] sm:$0xff] %v3605_v45 }
 0x62b   : > { %4398 = vst [vmem:[%s7412_s7 + $0x280] sm:$0xff] %v2910_v39  ;;  %4458 = vst [vmem:[%s7412_s7 + $0x460] sm:$0xff] %v3607_v13  ;;  %v2913_v51 = vpop.f32.mrb[84].mxu1  ;;  %v3610_v15 = vpop.f32.mrb[64].mxu0 }
 0x62c   : > { %v2914_v24 = vadd.f32 %v2913_v51, %v7460_v2  ;;  %v3611_v18 = vadd.f32 %v3610_v15, %v7488_v20  ;;  %v2915_v48 = vpop.f32.mrb[85].mxu1  ;;  %v3612_v22 = vpop.f32.mrb[65].mxu0  ;;  %4911 = vmatmul.mubr.msk.f32.gmra.mrb[190].mxu1 %vm1950_vm2, %v7047_v59 }
 0x62d   : > { %v2916_v55 = vadd.f32 %v2915_v48, %v7460_v2  ;;  %v3613_v38 = vadd.f32 %v3612_v22, %v7488_v20  ;;  %4031 = vmatprep.mubr.f32.mxu1 %v5639_v56 }
 0x62e   : > { %4422 = vst [vmem:[%s7412_s7 + $0x340] sm:$0xff] %v2914_v24  ;;  %4482 = vst [vmem:[%s7412_s7 + $0x520] sm:$0xff] %v3611_v18 }
 0x62f   : > { %4423 = vst [vmem:[%s7412_s7 + $0x348] sm:$0xff] %v2916_v55  ;;  %4483 = vst [vmem:[%s7412_s7 + $0x528] sm:$0xff] %v3613_v38  ;;  %v2919_v23 = vpop.f32.mrb[86].mxu1  ;;  %v3616_v40 = vpop.f32.mrb[66].mxu0 }
 0x630   : > { %v2920_v54 = vadd.f32 %v2919_v23, %v7475_v10  ;;  %v3617_v4 = vadd.f32 %v3616_v40, %v7501_v0  ;;  %v2921_v37 = vpop.f32.mrb[87].mxu1  ;;  %v3618_v1 = vpop.f32.mrb[67].mxu0  ;;  %4912 = vmatmul.mubr.msk.f32.gmra.mrb[192].mxu1 %vm1950_vm2, %v7056_v29 }
 0x631   : > { %v2922_v30 = vadd.f32 %v2921_v37, %v7475_v10  ;;  %v3619_v61 = vadd.f32 %v3618_v1, %v7501_v0  ;;  %4037 = vmatprep.mubr.f32.mxu1 %v5639_v56 }
 0x632   : > { %4447 = vst [vmem:[%s7412_s7 + $0x408] sm:$0xff] %v2920_v54  ;;  %4507 = vst [vmem:[%s7412_s7 + $0x5e8] sm:$0xff] %v3617_v4 }
 0x633   : > { %4448 = vst [vmem:[%s7412_s7 + $0x410] sm:$0xff] %v2922_v30  ;;  %4508 = vst [vmem:[%s7412_s7 + $0x5f0] sm:$0xff] %v3619_v61  ;;  %v2925_v3 = vpop.f32.mrb[88].mxu1  ;;  %v3622_v57 = vpop.f32.mrb[68].mxu0 }
 0x634   : > { %v2926_v62 = vadd.f32 %v2925_v3, %v7488_v20  ;;  %v3623_v32 = vadd.f32 %v3622_v57, %v7514_v34  ;;  %v2927_v52 = vpop.f32.mrb[89].mxu1  ;;  %v3624_v16 = vpop.f32.mrb[69].mxu0  ;;  %4913 = vmatmul.mubr.msk.f32.gmra.mrb[194].mxu1 %vm1950_vm2, %v7065_v35 }
 0x635   : > { %v2928_v42 = vadd.f32 %v2927_v52, %v7488_v20  ;;  %v3625_v47 = vadd.f32 %v3624_v16, %v7514_v34  ;;  %4043 = vmatprep.mubr.f32.mxu1 %v5639_v56 }
 0x636   : > { %4472 = vst [vmem:[%s7412_s7 + $0x4d0] sm:$0xff] %v2926_v62  ;;  %4532 = vst [vmem:[%s7412_s7 + $0x6b0] sm:$0xff] %v3623_v32 }
 0x637   : > { %4473 = vst [vmem:[%s7412_s7 + $0x4d8] sm:$0xff] %v2928_v42  ;;  %4533 = vst [vmem:[%s7412_s7 + $0x6b8] sm:$0xff] %v3625_v47  ;;  %v2931_v50 = vpop.f32.mrb[90].mxu1  ;;  %v3628_v60 = vpop.f32.mrb[70].mxu0 }
 0x638   : > { %v2932_v31 = vadd.f32 %v2931_v50, %v7501_v0  ;;  %v3629_v12 = vadd.f32 %v3628_v60, %v7529_v41  ;;  %v2933_v26 = vpop.f32.mrb[91].mxu1  ;;  %v3630_v17 = vpop.f32.mrb[71].mxu0  ;;  %4914 = vmatmul.mubr.msk.f32.gmra.mrb[196].mxu1 %vm1950_vm2, %v7074_v46 }
 0x639   : > { %v2934_v21 = vadd.f32 %v2933_v26, %v7501_v0  ;;  %v3631_v36 = vadd.f32 %v3630_v17, %v7529_v41  ;;  %4049 = vmatprep.mubr.f32.mxu1 %v5639_v56 }
 0x63a   : > { %4497 = vst [vmem:[%s7412_s7 + $0x598] sm:$0xff] %v2932_v31  ;;  %4557 = vst [vmem:[%s7412_s7 + $0x778] sm:$0xff] %v3629_v12 }
 0x63b   : > { %4498 = vst [vmem:[%s7412_s7 + $0x5a0] sm:$0xff] %v2934_v21  ;;  %4558 = vst [vmem:[%s7412_s7 + $0x780] sm:$0xff] %v3631_v36  ;;  %v2937_v58 = vpop.f32.mrb[92].mxu1  ;;  %v3634_v11 = vpop.f32.mrb[72].mxu0 }
 0x63c   : > { %v2938_v45 = vadd.f32 %v2937_v58, %v7514_v34  ;;  %v3635_v53 = vadd.f32 %v3634_v11, %v7546_v6  ;;  %v2939_v44 = vpop.f32.mrb[93].mxu1  ;;  %v3636_v39 = vpop.f32.mrb[73].mxu0  ;;  %4915 = vmatmul.mubr.msk.f32.gmra.mrb[198].mxu1 %vm1950_vm2, %v7087_v28 }
 0x63d   : > { %v2940_v56 = vadd.f32 %v2939_v44, %v7514_v34  ;;  %v3637_v13 = vadd.f32 %v3636_v39, %v7546_v6  ;;  %5073 = vmatprep.mubr.msk.f32.mxu1 %vm1950_vm2, %v6968_v63 }
 0x63e   : > { %4522 = vst [vmem:[%s7412_s7 + $0x660] sm:$0xff] %v2938_v45  ;;  %4582 = vst [vmem:[%s7412_s7 + $0x840] sm:$0xff] %v3635_v53 }
 0x63f   : > { %4523 = vst [vmem:[%s7412_s7 + $0x668] sm:$0xff] %v2940_v56  ;;  %4583 = vst [vmem:[%s7412_s7 + $0x848] sm:$0xff] %v3637_v13  ;;  %v2943_v51 = vpop.f32.mrb[94].mxu1  ;;  %v3640_v15 = vpop.f32.mrb[74].mxu0 }
 0x640   : > { %v2944_v24 = vadd.f32 %v2943_v51, %v7529_v41  ;;  %v3641_v18 = vadd.f32 %v3640_v15, %v7563_v19  ;;  %v2945_v48 = vpop.f32.mrb[95].mxu1  ;;  %v3642_v22 = vpop.f32.mrb[75].mxu0  ;;  %5074 = vmatmul.mubr.msk.f32.vlgmr.msra.gmra.mrb[200].mxu1 %vm1950_vm2, %v6985_v7 }
 0x641   : > { %v2946_v63 = vadd.f32 %v2945_v48, %v7529_v41  ;;  %v3643_v55 = vadd.f32 %v3642_v22, %v7563_v19  ;;  %5076 = vmatprep.mubr.msk.f32.mxu1 %vm1950_vm2, %v7002_v49 }
 0x642   : > { %4547 = vst [vmem:[%s7412_s7 + $0x728] sm:$0xff] %v2944_v24  ;;  %4607 = vst [vmem:[%s7412_s7 + $0x908] sm:$0xff] %v3641_v18 }
 0x643   : > { %4548 = vst [vmem:[%s7412_s7 + $0x730] sm:$0xff] %v2946_v63  ;;  %4608 = vst [vmem:[%s7412_s7 + $0x910] sm:$0xff] %v3643_v55  ;;  %v2949_v38 = vpop.f32.mrb[96].mxu1  ;;  %v3848_v23 = vpop.f32.mrb[76].mxu0 }
 0x644   : > { %v2950_v40 = vadd.f32 %v2949_v38, %v7546_v6  ;;  %v3849_v7 = vadd.f32 %v3848_v23, %v7398_v27  ;;  %v2951_v54 = vpop.f32.mrb[97].mxu1  ;;  %v3850_v4 = vpop.f32.mrb[77].mxu0  ;;  %5077 = vmatmul.mubr.msk.f32.gmra.mrb[202].mxu1 %vm1950_vm2, %v7011_v5 }
 0x645   : > { %v2952_v49 = vadd.f32 %v2951_v54, %v7546_v6  ;;  %v3851_v37 = vadd.f32 %v3850_v4, %v7398_v27  ;;  %5079 = vmatprep.mubr.msk.f32.mxu1 %vm1950_vm2, %v7020_v8 }
 0x646   : > { %4572 = vst [vmem:[%s7412_s7 + $0x7f0] sm:$0xff] %v2950_v40  ;;  %4336 = vst [vmem:[%s7412_s7 + $0x90] sm:$0xff] %v3849_v7 }
 0x647   : > { %4573 = vst [vmem:[%s7412_s7 + $0x7f8] sm:$0xff] %v2952_v49  ;;  %4337 = vst [vmem:[%s7412_s7 + $0x98] sm:$0xff] %v3851_v37  ;;  %v2955_v1 = vpop.f32.mrb[98].mxu1  ;;  %v3854_v30 = vpop.f32.mrb[78].mxu0 }
 0x648   : > { %v2956_v61 = vadd.f32 %v2955_v1, %v7563_v19  ;;  %v3855_v5 = vadd.f32 %v3854_v30, %v7410_v25  ;;  %v2957_v3 = vpop.f32.mrb[99].mxu1  ;;  %v3856_v57 = vpop.f32.mrb[79].mxu0  ;;  %5080 = vmatmul.mubr.msk.f32.gmra.mrb[204].mxu1 %vm1950_vm2, %v7029_v9 }
 0x649   : > { %v2958_v8 = vadd.f32 %v2957_v3, %v7563_v19  ;;  %v3857_v62 = vadd.f32 %v3856_v57, %v7410_v25  ;;  %5082 = vmatprep.mubr.msk.f32.mxu1 %vm1950_vm2, %v7038_v43 }
 0x64a   : > { %4597 = vst [vmem:[%s7412_s7 + $0x8b8] sm:$0xff] %v2956_v61  ;;  %4361 = vst [vmem:[%s7412_s7 + $0x158] sm:$0xff] %v3855_v5 }
 0x64b   : > { %4598 = vst [vmem:[%s7412_s7 + $0x8c0] sm:$0xff] %v2958_v8  ;;  %4362 = vst [vmem:[%s7412_s7 + $0x160] sm:$0xff] %v3857_v62  ;;  %v3086_v32 = vpop.f32.mrb[100].mxu1  ;;  %v3860_v52 = vpop.f32.mrb[80].mxu0 }
 0x64c   : > { %v3087_v16 = vadd.f32 %v3086_v32, %v7546_v6  ;;  %v3861_v9 = vadd.f32 %v3860_v52, %v7428_v33  ;;  %v3088_v42 = vpop.f32.mrb[101].mxu1  ;;  %v3862_v47 = vpop.f32.mrb[81].mxu0  ;;  %5083 = vmatmul.mubr.msk.f32.gmra.mrb[206].mxu1 %vm1950_vm2, %v7047_v59 }
 0x64d   : > { %v3089_v43 = vadd.f32 %v3088_v42, %v7546_v6  ;;  %v3863_v50 = vadd.f32 %v3862_v47, %v7428_v33  ;;  %5085 = vmatprep.mubr.msk.f32.mxu1 %vm1950_vm2, %v7056_v29 }
 0x64e   : > { %4574 = vst [vmem:[%s7412_s7 + $0x800] sm:$0xff] %v3087_v16  ;;  %4386 = vst [vmem:[%s7412_s7 + $0x220] sm:$0xff] %v3861_v9 }
 0x64f   : > { %4575 = vst [vmem:[%s7412_s7 + $0x808] sm:$0xff] %v3089_v43  ;;  %4387 = vst [vmem:[%s7412_s7 + $0x228] sm:$0xff] %v3863_v50  ;;  %v3092_v60 = vpop.f32.mrb[102].mxu1  ;;  %v3866_v31 = vpop.f32.mrb[82].mxu0 }
 0x650   : > { %v3093_v12 = vadd.f32 %v3092_v60, %v7563_v19  ;;  %v3867_v59 = vadd.f32 %v3866_v31, %v7444_v14  ;;  %v3094_v26 = vpop.f32.mrb[103].mxu1  ;;  %v3868_v17 = vpop.f32.mrb[83].mxu0  ;;  %5086 = vmatmul.mubr.msk.f32.gmra.mrb[208].mxu1 %vm1950_vm2, %v7065_v35 }
 0x651   : > { %v3095_v29 = vadd.f32 %v3094_v26, %v7563_v19  ;;  %v3869_v21 = vadd.f32 %v3868_v17, %v7444_v14  ;;  %5088 = vmatprep.mubr.msk.f32.mxu1 %vm1950_vm2, %v7074_v46 }
 0x652   : > { %4599 = vst [vmem:[%s7412_s7 + $0x8c8] sm:$0xff] %v3093_v12  ;;  %4411 = vst [vmem:[%s7412_s7 + $0x2e8] sm:$0xff] %v3867_v59 }
 0x653   : > { %4600 = vst [vmem:[%s7412_s7 + $0x8d0] sm:$0xff] %v3095_v29  ;;  %4412 = vst [vmem:[%s7412_s7 + $0x2f0] sm:$0xff] %v3869_v21  ;;  %v3163_v36 = vpop.f32.mrb[104].mxu1  ;;  %v3872_v58 = vpop.f32.mrb[84].mxu0 }
 0x654   : > { %v3164_v11 = vadd.f32 %v3163_v36, %v7398_v27  ;;  %v3873_v35 = vadd.f32 %v3872_v58, %v7460_v2  ;;  %v3165_v45 = vpop.f32.mrb[105].mxu1  ;;  %v3874_v53 = vpop.f32.mrb[85].mxu0  ;;  %5089 = vmatmul.mubr.msk.f32.gmra.mrb[210].mxu1 %vm1950_vm2, %v7087_v28 }
 0x655   : > { %v3166_v46 = vadd.f32 %v3165_v45, %v7398_v27  ;;  %v3875_v44 = vadd.f32 %v3874_v53, %v7460_v2 }
 0x656   : > { %4326 = vst [vmem:[%s7412_s7 + $0x40] sm:$0xff] %v3164_v11  ;;  %4436 = vst [vmem:[%s7412_s7 + $0x3b0] sm:$0xff] %v3873_v35 }
 0x657   : > { %4327 = vst [vmem:[%s7412_s7 + $0x48] sm:$0xff] %v3166_v46  ;;  %4437 = vst [vmem:[%s7412_s7 + $0x3b8] sm:$0xff] %v3875_v44  ;;  %v3169_v39 = vpop.f32.mrb[106].mxu1  ;;  %v3878_v56 = vpop.f32.mrb[86].mxu0 }
 0x658   : > { %v3170_v13 = vadd.f32 %v3169_v39, %v7410_v25  ;;  %v3879_v51 = vadd.f32 %v3878_v56, %v7475_v10  ;;  %v3171_v15 = vpop.f32.mrb[107].mxu1  ;;  %v3880_v28 = vpop.f32.mrb[87].mxu0 }
 0x659   : > { %v3172_v24 = vadd.f32 %v3171_v15, %v7410_v25  ;;  %v3881_v18 = vadd.f32 %v3880_v28, %v7475_v10 }
 0x65a   : > { %4351 = vst [vmem:[%s7412_s7 + $0x108] sm:$0xff] %v3170_v13  ;;  %4461 = vst [vmem:[%s7412_s7 + $0x478] sm:$0xff] %v3879_v51 }
 0x65b   : > { %4352 = vst [vmem:[%s7412_s7 + $0x110] sm:$0xff] %v3172_v24  ;;  %4462 = vst [vmem:[%s7412_s7 + $0x480] sm:$0xff] %v3881_v18  ;;  %v3175_v48 = vpop.f32.mrb[108].mxu1  ;;  %v3884_v22 = vpop.f32.mrb[88].mxu0 }
 0x65c   : > { %v3176_v63 = vadd.f32 %v3175_v48, %v7428_v33  ;;  %v3885_v55 = vadd.f32 %v3884_v22, %v7488_v20  ;;  %v3177_v38 = vpop.f32.mrb[109].mxu1  ;;  %v3886_v23 = vpop.f32.mrb[89].mxu0 }
 0x65d   : > { %v3178_v40 = vadd.f32 %v3177_v38, %v7428_v33  ;;  %v3887_v7 = vadd.f32 %v3886_v23, %v7488_v20 }
 0x65e   : > { %4376 = vst [vmem:[%s7412_s7 + $0x1d0] sm:$0xff] %v3176_v63  ;;  %4486 = vst [vmem:[%s7412_s7 + $0x540] sm:$0xff] %v3885_v55 }
 0x65f   : > { %4377 = vst [vmem:[%s7412_s7 + $0x1d8] sm:$0xff] %v3178_v40  ;;  %4487 = vst [vmem:[%s7412_s7 + $0x548] sm:$0xff] %v3887_v7  ;;  %v3181_v54 = vpop.f32.mrb[110].mxu1  ;;  %v3890_v4 = vpop.f32.mrb[90].mxu0 }
 0x660   : > { %v3182_v49 = vadd.f32 %v3181_v54, %v7444_v14  ;;  %v3891_v37 = vadd.f32 %v3890_v4, %v7501_v0  ;;  %v3183_v1 = vpop.f32.mrb[111].mxu1  ;;  %v3892_v30 = vpop.f32.mrb[91].mxu0 }
 0x661   : > { %v3184_v61 = vadd.f32 %v3183_v1, %v7444_v14  ;;  %v3893_v5 = vadd.f32 %v3892_v30, %v7501_v0 }
 0x662   : > { %4401 = vst [vmem:[%s7412_s7 + $0x298] sm:$0xff] %v3182_v49  ;;  %4511 = vst [vmem:[%s7412_s7 + $0x608] sm:$0xff] %v3891_v37 }
 0x663   : > { %4402 = vst [vmem:[%s7412_s7 + $0x2a0] sm:$0xff] %v3184_v61  ;;  %4512 = vst [vmem:[%s7412_s7 + $0x610] sm:$0xff] %v3893_v5  ;;  %v3187_v3 = vpop.f32.mrb[112].mxu1  ;;  %v3896_v57 = vpop.f32.mrb[92].mxu0 }
 0x664   : > { %v3188_v8 = vadd.f32 %v3187_v3, %v7460_v2  ;;  %v3897_v62 = vadd.f32 %v3896_v57, %v7514_v34  ;;  %v3189_v32 = vpop.f32.mrb[113].mxu1  ;;  %v3898_v52 = vpop.f32.mrb[93].mxu0 }
 0x665   : > { %v3190_v16 = vadd.f32 %v3189_v32, %v7460_v2  ;;  %v3899_v9 = vadd.f32 %v3898_v52, %v7514_v34 }
 0x666   : > { %4426 = vst [vmem:[%s7412_s7 + $0x360] sm:$0xff] %v3188_v8  ;;  %4536 = vst [vmem:[%s7412_s7 + $0x6d0] sm:$0xff] %v3897_v62 }
 0x667   : > { %4427 = vst [vmem:[%s7412_s7 + $0x368] sm:$0xff] %v3190_v16  ;;  %4537 = vst [vmem:[%s7412_s7 + $0x6d8] sm:$0xff] %v3899_v9  ;;  %v3193_v42 = vpop.f32.mrb[114].mxu1  ;;  %v3902_v47 = vpop.f32.mrb[94].mxu0 }
 0x668   : > { %v3194_v43 = vadd.f32 %v3193_v42, %v7475_v10  ;;  %v3903_v50 = vadd.f32 %v3902_v47, %v7529_v41  ;;  %v3195_v60 = vpop.f32.mrb[115].mxu1  ;;  %v3904_v31 = vpop.f32.mrb[95].mxu0 }
 0x669   : > { %v3196_v12 = vadd.f32 %v3195_v60, %v7475_v10  ;;  %v3905_v59 = vadd.f32 %v3904_v31, %v7529_v41 }
 0x66a   : > { %4451 = vst [vmem:[%s7412_s7 + $0x428] sm:$0xff] %v3194_v43  ;;  %4561 = vst [vmem:[%s7412_s7 + $0x798] sm:$0xff] %v3903_v50 }
 0x66b   : > { %4452 = vst [vmem:[%s7412_s7 + $0x430] sm:$0xff] %v3196_v12  ;;  %4562 = vst [vmem:[%s7412_s7 + $0x7a0] sm:$0xff] %v3905_v59  ;;  %v3199_v26 = vpop.f32.mrb[116].mxu1  ;;  %v3908_v17 = vpop.f32.mrb[96].mxu0 }
 0x66c   : > { %v3200_v29 = vadd.f32 %v3199_v26, %v7488_v20  ;;  %v3909_v21 = vadd.f32 %v3908_v17, %v7546_v6  ;;  %v3201_v36 = vpop.f32.mrb[117].mxu1  ;;  %v3910_v58 = vpop.f32.mrb[97].mxu0 }
 0x66d   : > { %v3202_v11 = vadd.f32 %v3201_v36, %v7488_v20  ;;  %v3911_v35 = vadd.f32 %v3910_v58, %v7546_v6 }
 0x66e   : > { %4476 = vst [vmem:[%s7412_s7 + $0x4f0] sm:$0xff] %v3200_v29  ;;  %4586 = vst [vmem:[%s7412_s7 + $0x860] sm:$0xff] %v3909_v21 }
 0x66f   : > { %4477 = vst [vmem:[%s7412_s7 + $0x4f8] sm:$0xff] %v3202_v11  ;;  %4587 = vst [vmem:[%s7412_s7 + $0x868] sm:$0xff] %v3911_v35  ;;  %v3205_v45 = vpop.f32.mrb[118].mxu1  ;;  %v3914_v53 = vpop.f32.mrb[98].mxu0 }
 0x670   : > { %v3206_v46 = vadd.f32 %v3205_v45, %v7501_v0  ;;  %v3915_v44 = vadd.f32 %v3914_v53, %v7563_v19  ;;  %v3207_v39 = vpop.f32.mrb[119].mxu1  ;;  %v3916_v56 = vpop.f32.mrb[99].mxu0 }
 0x671   : > { %v3208_v13 = vadd.f32 %v3207_v39, %v7501_v0  ;;  %v3917_v51 = vadd.f32 %v3916_v56, %v7563_v19 }
 0x672   : > { %4501 = vst [vmem:[%s7412_s7 + $0x5b8] sm:$0xff] %v3206_v46  ;;  %4611 = vst [vmem:[%s7412_s7 + $0x928] sm:$0xff] %v3915_v44 }
 0x673   : > { %4502 = vst [vmem:[%s7412_s7 + $0x5c0] sm:$0xff] %v3208_v13  ;;  %4612 = vst [vmem:[%s7412_s7 + $0x930] sm:$0xff] %v3917_v51  ;;  %v3211_v15 = vpop.f32.mrb[120].mxu1  ;;  %v4122_v28 = vpop.f32.mrb[100].mxu0 }
 0x674   : > { %v3212_v24 = vadd.f32 %v3211_v15, %v7514_v34  ;;  %v4123_v18 = vadd.f32 %v4122_v28, %v7398_v27  ;;  %v3213_v48 = vpop.f32.mrb[121].mxu1  ;;  %v4124_v22 = vpop.f32.mrb[101].mxu0 }
 0x675   : > { %v3214_v63 = vadd.f32 %v3213_v48, %v7514_v34  ;;  %v4125_v55 = vadd.f32 %v4124_v22, %v7398_v27 }
 0x676   : > { %4526 = vst [vmem:[%s7412_s7 + $0x680] sm:$0xff] %v3212_v24  ;;  %4340 = vst [vmem:[%s7412_s7 + $0xb0] sm:$0xff] %v4123_v18 }
 0x677   : > { %4527 = vst [vmem:[%s7412_s7 + $0x688] sm:$0xff] %v3214_v63  ;;  %4341 = vst [vmem:[%s7412_s7 + $0xb8] sm:$0xff] %v4125_v55  ;;  %v3217_v38 = vpop.f32.mrb[122].mxu1  ;;  %v4128_v23 = vpop.f32.mrb[102].mxu0 }
 0x678   : > { %v3218_v40 = vadd.f32 %v3217_v38, %v7529_v41  ;;  %v4129_v7 = vadd.f32 %v4128_v23, %v7410_v25  ;;  %v3219_v54 = vpop.f32.mrb[123].mxu1  ;;  %v4130_v4 = vpop.f32.mrb[103].mxu0 }
 0x679   : > { %v3220_v49 = vadd.f32 %v3219_v54, %v7529_v41  ;;  %v4131_v37 = vadd.f32 %v4130_v4, %v7410_v25 }
 0x67a   : > { %4551 = vst [vmem:[%s7412_s7 + $0x748] sm:$0xff] %v3218_v40  ;;  %4365 = vst [vmem:[%s7412_s7 + $0x178] sm:$0xff] %v4129_v7 }
 0x67b   : > { %4552 = vst [vmem:[%s7412_s7 + $0x750] sm:$0xff] %v3220_v49  ;;  %4366 = vst [vmem:[%s7412_s7 + $0x180] sm:$0xff] %v4131_v37  ;;  %v3223_v1 = vpop.f32.mrb[124].mxu1  ;;  %v4134_v30 = vpop.f32.mrb[104].mxu0 }
 0x67c   : > { %v3224_v61 = vadd.f32 %v3223_v1, %v7546_v6  ;;  %v4135_v5 = vadd.f32 %v4134_v30, %v7428_v33  ;;  %v3225_v3 = vpop.f32.mrb[125].mxu1  ;;  %v4136_v57 = vpop.f32.mrb[105].mxu0 }
 0x67d   : > { %v3226_v8 = vadd.f32 %v3225_v3, %v7546_v6  ;;  %v4137_v62 = vadd.f32 %v4136_v57, %v7428_v33 }
 0x67e   : > { %4576 = vst [vmem:[%s7412_s7 + $0x810] sm:$0xff] %v3224_v61  ;;  %4390 = vst [vmem:[%s7412_s7 + $0x240] sm:$0xff] %v4135_v5 }
 0x67f   : > { %4577 = vst [vmem:[%s7412_s7 + $0x818] sm:$0xff] %v3226_v8  ;;  %4391 = vst [vmem:[%s7412_s7 + $0x248] sm:$0xff] %v4137_v62  ;;  %v3229_v32 = vpop.f32.mrb[126].mxu1  ;;  %v4140_v52 = vpop.f32.mrb[106].mxu0 }
 0x680   : > { %v3230_v16 = vadd.f32 %v3229_v32, %v7563_v19  ;;  %v4141_v9 = vadd.f32 %v4140_v52, %v7444_v14  ;;  %v3231_v42 = vpop.f32.mrb[127].mxu1  ;;  %v4142_v47 = vpop.f32.mrb[107].mxu0 }
 0x681   : > { %v3232_v43 = vadd.f32 %v3231_v42, %v7563_v19  ;;  %v4143_v50 = vadd.f32 %v4142_v47, %v7444_v14 }
 0x682   : > { %4601 = vst [vmem:[%s7412_s7 + $0x8d8] sm:$0xff] %v3230_v16  ;;  %4415 = vst [vmem:[%s7412_s7 + $0x308] sm:$0xff] %v4141_v9 }
 0x683   : > { %4602 = vst [vmem:[%s7412_s7 + $0x8e0] sm:$0xff] %v3232_v43  ;;  %4416 = vst [vmem:[%s7412_s7 + $0x310] sm:$0xff] %v4143_v50  ;;  %v3437_v60 = vpop.f32.mrb[128].mxu1  ;;  %v4146_v31 = vpop.f32.mrb[108].mxu0 }
 0x684   : > { %v3438_v12 = vadd.f32 %v3437_v60, %v7398_v27  ;;  %v4147_v59 = vadd.f32 %v4146_v31, %v7460_v2  ;;  %v3439_v26 = vpop.f32.mrb[129].mxu1  ;;  %v4148_v17 = vpop.f32.mrb[109].mxu0 }
 0x685   : > { %v3440_v29 = vadd.f32 %v3439_v26, %v7398_v27  ;;  %v4149_v21 = vadd.f32 %v4148_v17, %v7460_v2 }
 0x686   : > { %4330 = vst [vmem:[%s7412_s7 + $0x60] sm:$0xff] %v3438_v12  ;;  %4440 = vst [vmem:[%s7412_s7 + $0x3d0] sm:$0xff] %v4147_v59 }
 0x687   : > { %4331 = vst [vmem:[%s7412_s7 + $0x68] sm:$0xff] %v3440_v29  ;;  %4441 = vst [vmem:[%s7412_s7 + $0x3d8] sm:$0xff] %v4149_v21  ;;  %v3443_v36 = vpop.f32.mrb[130].mxu1  ;;  %v4152_v58 = vpop.f32.mrb[110].mxu0 }
 0x688   : > { %v3444_v11 = vadd.f32 %v3443_v36, %v7410_v25  ;;  %v4153_v35 = vadd.f32 %v4152_v58, %v7475_v10  ;;  %v3445_v45 = vpop.f32.mrb[131].mxu1  ;;  %v4154_v53 = vpop.f32.mrb[111].mxu0 }
 0x689   : > { %v3446_v46 = vadd.f32 %v3445_v45, %v7410_v25  ;;  %v4155_v44 = vadd.f32 %v4154_v53, %v7475_v10 }
 0x68a   : > { %4355 = vst [vmem:[%s7412_s7 + $0x128] sm:$0xff] %v3444_v11  ;;  %4465 = vst [vmem:[%s7412_s7 + $0x498] sm:$0xff] %v4153_v35 }
 0x68b   : > { %4356 = vst [vmem:[%s7412_s7 + $0x130] sm:$0xff] %v3446_v46  ;;  %4466 = vst [vmem:[%s7412_s7 + $0x4a0] sm:$0xff] %v4155_v44  ;;  %v3449_v39 = vpop.f32.mrb[132].mxu1  ;;  %v4158_v56 = vpop.f32.mrb[112].mxu0 }
 0x68c   : > { %v3450_v13 = vadd.f32 %v3449_v39, %v7428_v33  ;;  %v4159_v51 = vadd.f32 %v4158_v56, %v7488_v20  ;;  %v3451_v15 = vpop.f32.mrb[133].mxu1  ;;  %v4160_v28 = vpop.f32.mrb[113].mxu0 }
 0x68d   : > { %v3452_v24 = vadd.f32 %v3451_v15, %v7428_v33  ;;  %v4161_v18 = vadd.f32 %v4160_v28, %v7488_v20 }
 0x68e   : > { %4380 = vst [vmem:[%s7412_s7 + $0x1f0] sm:$0xff] %v3450_v13  ;;  %4490 = vst [vmem:[%s7412_s7 + $0x560] sm:$0xff] %v4159_v51 }
 0x68f   : > { %4381 = vst [vmem:[%s7412_s7 + $0x1f8] sm:$0xff] %v3452_v24  ;;  %4491 = vst [vmem:[%s7412_s7 + $0x568] sm:$0xff] %v4161_v18  ;;  %v3455_v48 = vpop.f32.mrb[134].mxu1  ;;  %v4164_v22 = vpop.f32.mrb[114].mxu0 }
 0x690   : > { %v3456_v63 = vadd.f32 %v3455_v48, %v7444_v14  ;;  %v4165_v55 = vadd.f32 %v4164_v22, %v7501_v0  ;;  %v3457_v38 = vpop.f32.mrb[135].mxu1  ;;  %v4166_v23 = vpop.f32.mrb[115].mxu0 }
 0x691   : > { %v3458_v40 = vadd.f32 %v3457_v38, %v7444_v14  ;;  %v4167_v7 = vadd.f32 %v4166_v23, %v7501_v0 }
 0x692   : > { %4405 = vst [vmem:[%s7412_s7 + $0x2b8] sm:$0xff] %v3456_v63  ;;  %4515 = vst [vmem:[%s7412_s7 + $0x628] sm:$0xff] %v4165_v55 }
 0x693   : > { %4406 = vst [vmem:[%s7412_s7 + $0x2c0] sm:$0xff] %v3458_v40  ;;  %4516 = vst [vmem:[%s7412_s7 + $0x630] sm:$0xff] %v4167_v7  ;;  %v3461_v54 = vpop.f32.mrb[136].mxu1  ;;  %v4170_v4 = vpop.f32.mrb[116].mxu0 }
 0x694   : > { %v3462_v49 = vadd.f32 %v3461_v54, %v7460_v2  ;;  %v4171_v37 = vadd.f32 %v4170_v4, %v7514_v34  ;;  %v3463_v1 = vpop.f32.mrb[137].mxu1  ;;  %v4172_v30 = vpop.f32.mrb[117].mxu0 }
 0x695   : > { %v3464_v61 = vadd.f32 %v3463_v1, %v7460_v2  ;;  %v4173_v5 = vadd.f32 %v4172_v30, %v7514_v34 }
 0x696   : > { %4430 = vst [vmem:[%s7412_s7 + $0x380] sm:$0xff] %v3462_v49  ;;  %4540 = vst [vmem:[%s7412_s7 + $0x6f0] sm:$0xff] %v4171_v37 }
 0x697   : > { %4431 = vst [vmem:[%s7412_s7 + $0x388] sm:$0xff] %v3464_v61  ;;  %4541 = vst [vmem:[%s7412_s7 + $0x6f8] sm:$0xff] %v4173_v5  ;;  %v3467_v3 = vpop.f32.mrb[138].mxu1  ;;  %v4176_v57 = vpop.f32.mrb[118].mxu0 }
 0x698   : > { %v3468_v8 = vadd.f32 %v3467_v3, %v7475_v10  ;;  %v4177_v62 = vadd.f32 %v4176_v57, %v7529_v41  ;;  %v3469_v32 = vpop.f32.mrb[139].mxu1  ;;  %v4178_v52 = vpop.f32.mrb[119].mxu0 }
 0x699   : > { %v3470_v16 = vadd.f32 %v3469_v32, %v7475_v10  ;;  %v4179_v9 = vadd.f32 %v4178_v52, %v7529_v41 }
 0x69a   : > { %4455 = vst [vmem:[%s7412_s7 + $0x448] sm:$0xff] %v3468_v8  ;;  %4565 = vst [vmem:[%s7412_s7 + $0x7b8] sm:$0xff] %v4177_v62 }
 0x69b   : > { %4456 = vst [vmem:[%s7412_s7 + $0x450] sm:$0xff] %v3470_v16  ;;  %4566 = vst [vmem:[%s7412_s7 + $0x7c0] sm:$0xff] %v4179_v9  ;;  %v3473_v42 = vpop.f32.mrb[140].mxu1  ;;  %v4182_v47 = vpop.f32.mrb[120].mxu0 }
 0x69c   : > { %v3474_v43 = vadd.f32 %v3473_v42, %v7488_v20  ;;  %v4183_v50 = vadd.f32 %v4182_v47, %v7546_v6  ;;  %v3475_v60 = vpop.f32.mrb[141].mxu1  ;;  %v4184_v31 = vpop.f32.mrb[121].mxu0 }
 0x69d   : > { %v3476_v12 = vadd.f32 %v3475_v60, %v7488_v20  ;;  %v4185_v59 = vadd.f32 %v4184_v31, %v7546_v6 }
 0x69e   : > { %4480 = vst [vmem:[%s7412_s7 + $0x510] sm:$0xff] %v3474_v43  ;;  %4590 = vst [vmem:[%s7412_s7 + $0x880] sm:$0xff] %v4183_v50 }
 0x69f   : > { %4481 = vst [vmem:[%s7412_s7 + $0x518] sm:$0xff] %v3476_v12  ;;  %4591 = vst [vmem:[%s7412_s7 + $0x888] sm:$0xff] %v4185_v59  ;;  %v3479_v26 = vpop.f32.mrb[142].mxu1  ;;  %v4188_v17 = vpop.f32.mrb[122].mxu0 }
 0x6a0   : > { %v3480_v29 = vadd.f32 %v3479_v26, %v7501_v0  ;;  %v4189_v21 = vadd.f32 %v4188_v17, %v7563_v19  ;;  %v3481_v36 = vpop.f32.mrb[143].mxu1  ;;  %v4190_v58 = vpop.f32.mrb[123].mxu0 }
 0x6a1   : > { %v3482_v11 = vadd.f32 %v3481_v36, %v7501_v0  ;;  %v4191_v35 = vadd.f32 %v4190_v58, %v7563_v19 }
 0x6a2   : > { %4505 = vst [vmem:[%s7412_s7 + $0x5d8] sm:$0xff] %v3480_v29  ;;  %4615 = vst [vmem:[%s7412_s7 + $0x948] sm:$0xff] %v4189_v21 }
 0x6a3   : > { %4506 = vst [vmem:[%s7412_s7 + $0x5e0] sm:$0xff] %v3482_v11  ;;  %4616 = vst [vmem:[%s7412_s7 + $0x950] sm:$0xff] %v4191_v35  ;;  %v3485_v45 = vpop.f32.mrb[144].mxu1 }
 0x6a4   : > { %v3486_v53 = vadd.f32 %v3485_v45, %v7514_v34  ;;  %v3487_v46 = vpop.f32.mrb[145].mxu1 }
 0x6a5   : > { %v3488_v44 = vadd.f32 %v3487_v46, %v7514_v34 }
 0x6a6   : > { %4530 = vst [vmem:[%s7412_s7 + $0x6a0] sm:$0xff] %v3486_v53 }
 0x6a7   : > { %4531 = vst [vmem:[%s7412_s7 + $0x6a8] sm:$0xff] %v3488_v44  ;;  %v3491_v39 = vpop.f32.mrb[146].mxu1 }
 0x6a8   : > { %v3492_v56 = vadd.f32 %v3491_v39, %v7529_v41  ;;  %v3493_v13 = vpop.f32.mrb[147].mxu1 }
 0x6a9   : > { %v3494_v51 = vadd.f32 %v3493_v13, %v7529_v41 }
 0x6aa   : > { %4555 = vst [vmem:[%s7412_s7 + $0x768] sm:$0xff] %v3492_v56 }
 0x6ab   : > { %4556 = vst [vmem:[%s7412_s7 + $0x770] sm:$0xff] %v3494_v51  ;;  %v3497_v15 = vpop.f32.mrb[148].mxu1 }
 0x6ac   : > { %v3498_v28 = vadd.f32 %v3497_v15, %v7546_v6  ;;  %v3499_v24 = vpop.f32.mrb[149].mxu1 }
 0x6ad   : > { %v3500_v18 = vadd.f32 %v3499_v24, %v7546_v6 }
 0x6ae   : > { %4580 = vst [vmem:[%s7412_s7 + $0x830] sm:$0xff] %v3498_v28 }
 0x6af   : > { %4581 = vst [vmem:[%s7412_s7 + $0x838] sm:$0xff] %v3500_v18  ;;  %v3503_v48 = vpop.f32.mrb[150].mxu1 }
 0x6b0   : > { %v3504_v22 = vadd.f32 %v3503_v48, %v7563_v19  ;;  %v3505_v63 = vpop.f32.mrb[151].mxu1 }
 0x6b1   : > { %v3506_v55 = vadd.f32 %v3505_v63, %v7563_v19 }
 0x6b2   : > { %4605 = vst [vmem:[%s7412_s7 + $0x8f8] sm:$0xff] %v3504_v22 }
 0x6b3   : > { %4606 = vst [vmem:[%s7412_s7 + $0x900] sm:$0xff] %v3506_v55  ;;  %v3711_v38 = vpop.f32.mrb[152].mxu1 }
 0x6b4   : > { %v3712_v23 = vadd.f32 %v3711_v38, %v7398_v27  ;;  %v3713_v40 = vpop.f32.mrb[153].mxu1 }
 0x6b5   : > { %v3714_v7 = vadd.f32 %v3713_v40, %v7398_v27 }
 0x6b6   : > { %4334 = vst [vmem:[%s7412_s7 + $0x80] sm:$0xff] %v3712_v23 }
 0x6b7   : > { %4335 = vst [vmem:[%s7412_s7 + $0x88] sm:$0xff] %v3714_v7  ;;  %v3717_v54 = vpop.f32.mrb[154].mxu1 }
 0x6b8   : > { %v3718_v4 = vadd.f32 %v3717_v54, %v7410_v25  ;;  %v3719_v49 = vpop.f32.mrb[155].mxu1 }
 0x6b9   : > { %v3720_v37 = vadd.f32 %v3719_v49, %v7410_v25 }
 0x6ba   : > { %4359 = vst [vmem:[%s7412_s7 + $0x148] sm:$0xff] %v3718_v4 }
 0x6bb   : > { %4360 = vst [vmem:[%s7412_s7 + $0x150] sm:$0xff] %v3720_v37  ;;  %v3723_v1 = vpop.f32.mrb[156].mxu1 }
 0x6bc   : > { %v3724_v30 = vadd.f32 %v3723_v1, %v7428_v33  ;;  %v3725_v61 = vpop.f32.mrb[157].mxu1 }
 0x6bd   : > { %v3726_v5 = vadd.f32 %v3725_v61, %v7428_v33 }
 0x6be   : > { %4384 = vst [vmem:[%s7412_s7 + $0x210] sm:$0xff] %v3724_v30 }
 0x6bf   : > { %4385 = vst [vmem:[%s7412_s7 + $0x218] sm:$0xff] %v3726_v5  ;;  %v3729_v3 = vpop.f32.mrb[158].mxu1 }
 0x6c0   : > { %v3730_v57 = vadd.f32 %v3729_v3, %v7444_v14  ;;  %v3731_v8 = vpop.f32.mrb[159].mxu1 }
 0x6c1   : > { %v3732_v62 = vadd.f32 %v3731_v8, %v7444_v14 }
 0x6c2   : > { %4409 = vst [vmem:[%s7412_s7 + $0x2d8] sm:$0xff] %v3730_v57 }
 0x6c3   : > { %4410 = vst [vmem:[%s7412_s7 + $0x2e0] sm:$0xff] %v3732_v62  ;;  %v3735_v32 = vpop.f32.mrb[160].mxu1 }
 0x6c4   : > { %v3736_v52 = vadd.f32 %v3735_v32, %v7460_v2  ;;  %v3737_v16 = vpop.f32.mrb[161].mxu1 }
 0x6c5   : > { %v3738_v9 = vadd.f32 %v3737_v16, %v7460_v2 }
 0x6c6   : > { %4434 = vst [vmem:[%s7412_s7 + $0x3a0] sm:$0xff] %v3736_v52 }
 0x6c7   : > { %4435 = vst [vmem:[%s7412_s7 + $0x3a8] sm:$0xff] %v3738_v9  ;;  %v3741_v42 = vpop.f32.mrb[162].mxu1 }
 0x6c8   : > { %v3742_v47 = vadd.f32 %v3741_v42, %v7475_v10  ;;  %v3743_v43 = vpop.f32.mrb[163].mxu1 }
 0x6c9   : > { %v3744_v50 = vadd.f32 %v3743_v43, %v7475_v10 }
 0x6ca   : > { %4459 = vst [vmem:[%s7412_s7 + $0x468] sm:$0xff] %v3742_v47 }
 0x6cb   : > { %4460 = vst [vmem:[%s7412_s7 + $0x470] sm:$0xff] %v3744_v50  ;;  %v3747_v60 = vpop.f32.mrb[164].mxu1 }
 0x6cc   : > { %v3748_v31 = vadd.f32 %v3747_v60, %v7488_v20  ;;  %v3749_v12 = vpop.f32.mrb[165].mxu1 }
 0x6cd   : > { %v3750_v59 = vadd.f32 %v3749_v12, %v7488_v20 }
 0x6ce   : > { %4484 = vst [vmem:[%s7412_s7 + $0x530] sm:$0xff] %v3748_v31 }
 0x6cf   : > { %4485 = vst [vmem:[%s7412_s7 + $0x538] sm:$0xff] %v3750_v59  ;;  %v3753_v26 = vpop.f32.mrb[166].mxu1 }
 0x6d0   : > { %v3754_v17 = vadd.f32 %v3753_v26, %v7501_v0  ;;  %v3755_v29 = vpop.f32.mrb[167].mxu1 }
 0x6d1   : > { %v3756_v21 = vadd.f32 %v3755_v29, %v7501_v0 }
 0x6d2   : > { %4509 = vst [vmem:[%s7412_s7 + $0x5f8] sm:$0xff] %v3754_v17 }
 0x6d3   : > { %4510 = vst [vmem:[%s7412_s7 + $0x600] sm:$0xff] %v3756_v21  ;;  %v3759_v36 = vpop.f32.mrb[168].mxu1 }
 0x6d4   : > { %v3760_v58 = vadd.f32 %v3759_v36, %v7514_v34  ;;  %v3761_v11 = vpop.f32.mrb[169].mxu1 }
 0x6d5   : > { %v3762_v35 = vadd.f32 %v3761_v11, %v7514_v34 }
 0x6d6   : > { %4534 = vst [vmem:[%s7412_s7 + $0x6c0] sm:$0xff] %v3760_v58 }
 0x6d7   : > { %4535 = vst [vmem:[%s7412_s7 + $0x6c8] sm:$0xff] %v3762_v35  ;;  %v3765_v45 = vpop.f32.mrb[170].mxu1 }
 0x6d8   : > { %v3766_v53 = vadd.f32 %v3765_v45, %v7529_v41  ;;  %v3767_v46 = vpop.f32.mrb[171].mxu1 }
 0x6d9   : > { %v3768_v44 = vadd.f32 %v3767_v46, %v7529_v41 }
 0x6da   : > { %4559 = vst [vmem:[%s7412_s7 + $0x788] sm:$0xff] %v3766_v53 }
 0x6db   : > { %4560 = vst [vmem:[%s7412_s7 + $0x790] sm:$0xff] %v3768_v44  ;;  %v3771_v39 = vpop.f32.mrb[172].mxu1 }
 0x6dc   : > { %v3772_v56 = vadd.f32 %v3771_v39, %v7546_v6  ;;  %v3773_v13 = vpop.f32.mrb[173].mxu1 }
 0x6dd   : > { %v3774_v51 = vadd.f32 %v3773_v13, %v7546_v6 }
 0x6de   : > { %4584 = vst [vmem:[%s7412_s7 + $0x850] sm:$0xff] %v3772_v56 }
 0x6df   : > { %4585 = vst [vmem:[%s7412_s7 + $0x858] sm:$0xff] %v3774_v51  ;;  %v3777_v15 = vpop.f32.mrb[174].mxu1 }
 0x6e0   : > { %v3778_v28 = vadd.f32 %v3777_v15, %v7563_v19  ;;  %v3779_v24 = vpop.f32.mrb[175].mxu1 }
 0x6e1   : > { %v3780_v18 = vadd.f32 %v3779_v24, %v7563_v19 }
 0x6e2   : > { %4609 = vst [vmem:[%s7412_s7 + $0x918] sm:$0xff] %v3778_v28 }
 0x6e3   : > { %4610 = vst [vmem:[%s7412_s7 + $0x920] sm:$0xff] %v3780_v18  ;;  %v3985_v48 = vpop.f32.mrb[176].mxu1 }
 0x6e4   : > { %v3986_v22 = vadd.f32 %v3985_v48, %v7398_v27  ;;  %v3987_v63 = vpop.f32.mrb[177].mxu1 }
 0x6e5   : > { %v3988_v55 = vadd.f32 %v3987_v63, %v7398_v27 }
 0x6e6   : > { %4338 = vst [vmem:[%s7412_s7 + $0xa0] sm:$0xff] %v3986_v22 }
 0x6e7   : > { %4339 = vst [vmem:[%s7412_s7 + $0xa8] sm:$0xff] %v3988_v55  ;;  %v3991_v38 = vpop.f32.mrb[178].mxu1 }
 0x6e8   : > { %v3992_v23 = vadd.f32 %v3991_v38, %v7410_v25  ;;  %v3993_v40 = vpop.f32.mrb[179].mxu1 }
 0x6e9   : > { %v3994_v7 = vadd.f32 %v3993_v40, %v7410_v25 }
 0x6ea   : > { %4363 = vst [vmem:[%s7412_s7 + $0x168] sm:$0xff] %v3992_v23 }
 0x6eb   : > { %4364 = vst [vmem:[%s7412_s7 + $0x170] sm:$0xff] %v3994_v7  ;;  %v3997_v54 = vpop.f32.mrb[180].mxu1 }
 0x6ec   : > { %v3998_v4 = vadd.f32 %v3997_v54, %v7428_v33  ;;  %v3999_v49 = vpop.f32.mrb[181].mxu1 }
 0x6ed   : > { %v4000_v37 = vadd.f32 %v3999_v49, %v7428_v33 }
 0x6ee   : > { %4388 = vst [vmem:[%s7412_s7 + $0x230] sm:$0xff] %v3998_v4 }
 0x6ef   : > { %4389 = vst [vmem:[%s7412_s7 + $0x238] sm:$0xff] %v4000_v37  ;;  %v4003_v1 = vpop.f32.mrb[182].mxu1 }
 0x6f0   : > { %v4004_v30 = vadd.f32 %v4003_v1, %v7444_v14  ;;  %v4005_v61 = vpop.f32.mrb[183].mxu1 }
 0x6f1   : > { %v4006_v5 = vadd.f32 %v4005_v61, %v7444_v14 }
 0x6f2   : > { %4413 = vst [vmem:[%s7412_s7 + $0x2f8] sm:$0xff] %v4004_v30 }
 0x6f3   : > { %4414 = vst [vmem:[%s7412_s7 + $0x300] sm:$0xff] %v4006_v5  ;;  %v4009_v3 = vpop.f32.mrb[184].mxu1 }
 0x6f4   : > { %v4010_v57 = vadd.f32 %v4009_v3, %v7460_v2  ;;  %v4011_v8 = vpop.f32.mrb[185].mxu1 }
 0x6f5   : > { %v4012_v62 = vadd.f32 %v4011_v8, %v7460_v2 }
 0x6f6   : > { %4438 = vst [vmem:[%s7412_s7 + $0x3c0] sm:$0xff] %v4010_v57 }
 0x6f7   : > { %4439 = vst [vmem:[%s7412_s7 + $0x3c8] sm:$0xff] %v4012_v62  ;;  %v4015_v32 = vpop.f32.mrb[186].mxu1 }
 0x6f8   : > { %v4016_v52 = vadd.f32 %v4015_v32, %v7475_v10  ;;  %v4017_v16 = vpop.f32.mrb[187].mxu1 }
 0x6f9   : > { %v4018_v9 = vadd.f32 %v4017_v16, %v7475_v10 }
 0x6fa   : > { %4463 = vst [vmem:[%s7412_s7 + $0x488] sm:$0xff] %v4016_v52 }
 0x6fb   : > { %4464 = vst [vmem:[%s7412_s7 + $0x490] sm:$0xff] %v4018_v9  ;;  %v4021_v42 = vpop.f32.mrb[188].mxu1 }
 0x6fc   : > { %v4022_v47 = vadd.f32 %v4021_v42, %v7488_v20  ;;  %v4023_v43 = vpop.f32.mrb[189].mxu1 }
 0x6fd   : > { %v4024_v50 = vadd.f32 %v4023_v43, %v7488_v20 }
 0x6fe   : > { %4488 = vst [vmem:[%s7412_s7 + $0x550] sm:$0xff] %v4022_v47 }
 0x6ff   : > { %4489 = vst [vmem:[%s7412_s7 + $0x558] sm:$0xff] %v4024_v50  ;;  %v4027_v60 = vpop.f32.mrb[190].mxu1 }
 0x700   : > { %v4028_v31 = vadd.f32 %v4027_v60, %v7501_v0  ;;  %v4029_v12 = vpop.f32.mrb[191].mxu1 }
 0x701   : > { %v4030_v59 = vadd.f32 %v4029_v12, %v7501_v0 }
 0x702   : > { %4513 = vst [vmem:[%s7412_s7 + $0x618] sm:$0xff] %v4028_v31 }
 0x703   : > { %4514 = vst [vmem:[%s7412_s7 + $0x620] sm:$0xff] %v4030_v59  ;;  %v4033_v26 = vpop.f32.mrb[192].mxu1 }
 0x704   : > { %v4034_v17 = vadd.f32 %v4033_v26, %v7514_v34  ;;  %v4035_v29 = vpop.f32.mrb[193].mxu1 }
 0x705   : > { %v4036_v21 = vadd.f32 %v4035_v29, %v7514_v34 }
 0x706   : > { %4538 = vst [vmem:[%s7412_s7 + $0x6e0] sm:$0xff] %v4034_v17 }
 0x707   : > { %4539 = vst [vmem:[%s7412_s7 + $0x6e8] sm:$0xff] %v4036_v21  ;;  %v4039_v36 = vpop.f32.mrb[194].mxu1 }
 0x708   : > { %v4040_v58 = vadd.f32 %v4039_v36, %v7529_v41  ;;  %v4041_v11 = vpop.f32.mrb[195].mxu1 }
 0x709   : > { %v4042_v35 = vadd.f32 %v4041_v11, %v7529_v41 }
 0x70a   : > { %4563 = vst [vmem:[%s7412_s7 + $0x7a8] sm:$0xff] %v4040_v58 }
 0x70b   : > { %4564 = vst [vmem:[%s7412_s7 + $0x7b0] sm:$0xff] %v4042_v35  ;;  %v4045_v45 = vpop.f32.mrb[196].mxu1 }
 0x70c   : > { %v4046_v53 = vadd.f32 %v4045_v45, %v7546_v6  ;;  %v4047_v46 = vpop.f32.mrb[197].mxu1 }
 0x70d   : > { %v4048_v44 = vadd.f32 %v4047_v46, %v7546_v6 }
 0x70e   : > { %4588 = vst [vmem:[%s7412_s7 + $0x870] sm:$0xff] %v4046_v53 }
 0x70f   : > { %4589 = vst [vmem:[%s7412_s7 + $0x878] sm:$0xff] %v4048_v44  ;;  %v4051_v39 = vpop.f32.mrb[198].mxu1 }
 0x710   : > { %v4052_v56 = vadd.f32 %v4051_v39, %v7563_v19  ;;  %v4053_v13 = vpop.f32.mrb[199].mxu1 }
 0x711   : > { %v4054_v51 = vadd.f32 %v4053_v13, %v7563_v19 }
 0x712   : > { %4613 = vst [vmem:[%s7412_s7 + $0x938] sm:$0xff] %v4052_v56 }
 0x713   : > { %4614 = vst [vmem:[%s7412_s7 + $0x940] sm:$0xff] %v4054_v51  ;;  %v5075_v15 = vpop.f32.mrb[200].mxu1 }
 0x714   : > { %v4265_v28 = vadd.f32 %v5075_v15, %v7410_v25  ;;  %v4259_v24 = vpop.f32.mrb[201].mxu1 }
 0x715   : > { %v4260_v18 = vadd.f32 %v4259_v24, %v7398_v27 }
 0x716   : > { %4367 = vst.msk [vmem:[%s7412_s7 + $0x188] sm:$0xff] %vm623_vm0, %v4265_v28 }
 0x717   : > { %4342 = vst.msk [vmem:[%s7412_s7 + $0xc0] sm:$0xff] %vm623_vm0, %v4260_v18  ;;  %v5078_v48 = vpop.f32.mrb[202].mxu1 }
 0x718   : > { %v4275_v22 = vadd.f32 %v5078_v48, %v7444_v14  ;;  %v4269_v63 = vpop.f32.mrb[203].mxu1 }
 0x719   : > { %v4270_v55 = vadd.f32 %v4269_v63, %v7428_v33 }
 0x71a   : > { %4417 = vst.msk [vmem:[%s7412_s7 + $0x318] sm:$0xff] %vm623_vm0, %v4275_v22 }
 0x71b   : > { %4392 = vst.msk [vmem:[%s7412_s7 + $0x250] sm:$0xff] %vm623_vm0, %v4270_v55  ;;  %v5081_v25 = vpop.f32.mrb[204].mxu1 }
 0x71c   : > { %v4285_v27 = vadd.f32 %v5081_v25, %v7475_v10  ;;  %v4279_v38 = vpop.f32.mrb[205].mxu1 }
 0x71d   : > { %v4280_v23 = vadd.f32 %v4279_v38, %v7460_v2 }
 0x71e   : > { %4467 = vst.msk [vmem:[%s7412_s7 + $0x4a8] sm:$0xff] %vm623_vm0, %v4285_v27 }
 0x71f   : > { %4442 = vst.msk [vmem:[%s7412_s7 + $0x3e0] sm:$0xff] %vm623_vm0, %v4280_v23  ;;  %v5084_v14 = vpop.f32.mrb[206].mxu1 }
 0x720   : > { %v4295_v33 = vadd.f32 %v5084_v14, %v7501_v0  ;;  %v4289_v40 = vpop.f32.mrb[207].mxu1 }
 0x721   : > { %v4290_v7 = vadd.f32 %v4289_v40, %v7488_v20 }
 0x722   : > { %4517 = vst.msk [vmem:[%s7412_s7 + $0x638] sm:$0xff] %vm623_vm0, %v4295_v33 }
 0x723   : > { %4492 = vst.msk [vmem:[%s7412_s7 + $0x570] sm:$0xff] %vm623_vm0, %v4290_v7  ;;  %v5087_v10 = vpop.f32.mrb[208].mxu1 }
 0x724   : > { %v4305_v2 = vadd.f32 %v5087_v10, %v7529_v41  ;;  %v4299_v54 = vpop.f32.mrb[209].mxu1 }
 0x725   : > { %v4300_v4 = vadd.f32 %v4299_v54, %v7514_v34 }
 0x726   : > { %4567 = vst.msk [vmem:[%s7412_s7 + $0x7c8] sm:$0xff] %vm623_vm0, %v4305_v2 }
 0x727   : > { %4542 = vst.msk [vmem:[%s7412_s7 + $0x700] sm:$0xff] %vm623_vm0, %v4300_v4  ;;  %v5090_v20 = vpop.f32.mrb[210].mxu1 }
 0x728   : > { %v4315_v0 = vadd.f32 %v5090_v20, %v7563_v19  ;;  %v4309_v49 = vpop.f32.mrb[211].mxu1 }
 0x729   : > { %v4310_v41 = vadd.f32 %v4309_v49, %v7546_v6 }
 0x72a   : > { %4617 = vst.msk [vmem:[%s7412_s7 + $0x958] sm:$0xff] %vm623_vm0, %v4315_v0 }
 0x72b   : > { %4592 = vst.msk [vmem:[%s7412_s7 + $0x890] sm:$0xff] %vm623_vm0, %v4310_v41 }
 0x72c   : > { %5575 = shalt.err (!%p5572_p11)
}
 0x72d   : > { %s5576_s12 = scalar_lea.hbm %s8186_s10, 38400  ;;  %s5580_s15 = scalar_lea.hbm %s8243_s5, 76800 }
 0x72e   : > { %p5577_p13 = scmp.ne.s32.totalorder %s8186_s10, %s5576_s12  ;;  %p5581_p6 = scmp.lt.u32.totalorder %s8186_s10, %s8243_s5 }
 0x72f   : > { %p5582_p9 = scmp.lt.u32.totalorder %s5580_s15, %s5576_s12  ;;  %p5584_p10 = scmp.lt.u32.totalorder %s5576_s12, %s8186_s10 }
 0x730   : > { %p5578_p5 = pnand %p5577_p13, %p8788_p1 }
 0x731   : > { %p5583_p12 = por %p5582_p9, %p5581_p6 }
 0x732   : > { %p5579_p0 = pneg %p5578_p5 }
 0x733   : > { %p5585_p2 = por %p5584_p10, %p5583_p12 }
 0x735   : > { %p5586_p3 = pnand %p5585_p2, %p5579_p0 }
 0x737   : > { %5589 = shalt.err (!%p5586_p3)
}
 0x738   : > { %s5641_s7 = smov 3200   ;;  %s5642_s23 = smov 200  }
 0x739   : > { %5421 = dma.vmem_to_hbm [thread:$0]  (%p8788_p1), %s8189_s6, 38400, %s8186_s10, %s8197_s22, %s5641_s7, %s5641_s7, %s5642_s23  }
 0x73a PF: > { %p5439_p4 = scmp.ge.s32.totalorder %s5632_s21, 2  ;;  %s4648_s30 = sand.u32 1, %s5620_s18  }
 0x73b   : > { %p8789_p7 = scmp.ne.s32.totalorder %s8452_s29, 0  ;;  %s4649_s8 = scalar_lea.sflag [#allocation4], %s4648_s30 }
 0x73d   : > { %p5431_p8 = pnand %p5439_p4, %p8789_p7 }
 0x73f   : > { %5615 = dma.done.wait (!%p5431_p8), %s4649_s8, 38400  }
 0x740   : > { %5617 = vsyncadd (!%p5431_p8), %s4649_s8, 4294928896  ;;  %p17_p11 = scmp.ge.s32.totalorder %s5698_s24, 4   ;;  %s8790_s18 = smov %s5624_s19 }
 0x741   : > { %s8791_s19 = smov %s5628_s20  ;;  %s8792_s20 = smov %s5709_s27 }
 0x742   : > { %s8793_s21 = smov %s5698_s24  ;;  %19 = sbr.rel (!%p17_p11) target bundleno = 5 (0x5), region = 90 }
 0x749   :  { %4654 = vsyncpa [#allocation3], 1 }
 0x74a   :  { %4656 = vsyncpa [#allocation3 + $0x1], 1 }
 0x74b   :  { %4657 = vsyncpa [#allocation6], 1 }
 0x74c   :  { %4658 = vsyncpa [#allocation4], 1 }
 0x74d   :  { %4660 = vsyncpa [#allocation4 + $0x1], 1 }

</bundles_post_ra>
